<compile_context>
chip_gen: v5e
topology: v5e:2x2
jax: 0.10.0
libtpu: 0.0.40
codegen_flags: <defaults>
</compile_context>

<pallas_src>
import math

import jax
import jax.numpy as jnp
from jax.experimental import pallas as pl
from jax.experimental.pallas import tpu as pltpu


# --------------------------------------------------------------------- kernels

def _conv_pool_kernel(x_ref, w_ref, b_ref, o_ref):
    """Fused conv-as-GEMM + bias + ReLU + 2x2 max-pool.

    x_ref: (4, tm, K) bf16  -- leading axis = the 4 positions of each 2x2
                               pooling window (patch rows already gathered).
    w_ref: (K, Cout) bf16, b_ref: (1, Cout) f32, o_ref: (tm, Cout) bf16.
    """
    w = w_ref[...]
    b = b_ref[...]
    y = jnp.maximum(
        jnp.dot(x_ref[0], w, preferred_element_type=jnp.float32) + b, 0.0)
    for g in range(1, 4):                      # static unroll, MXU GEMMs
        yg = jnp.maximum(
            jnp.dot(x_ref[g], w, preferred_element_type=jnp.float32) + b, 0.0)
        y = jnp.maximum(y, yg)                 # max-pool epilogue (VPU)
    o_ref[...] = y.astype(o_ref.dtype)


def _mlp_kernel(x_ref, w1_ref, b1_ref, w2_ref, b2_ref, w3_ref, b3_ref,
                w4_ref, b4_ref, o_ref):
    # Whole classifier head fused; all dims lane-padded (256/128/128/128).
    h = jnp.dot(x_ref[...], w1_ref[...], preferred_element_type=jnp.float32)
    h = jnp.maximum(h + b1_ref[...], 0.0).astype(jnp.bfloat16)
    h = jnp.dot(h, w2_ref[...], preferred_element_type=jnp.float32)
    h = jnp.maximum(h + b2_ref[...], 0.0).astype(jnp.bfloat16)
    h = jnp.dot(h, w3_ref[...], preferred_element_type=jnp.float32)
    h = jnp.maximum(h + b3_ref[...], 0.0).astype(jnp.bfloat16)
    h = jnp.dot(h, w4_ref[...], preferred_element_type=jnp.float32)
    o_ref[...] = (h + b4_ref[...]).astype(o_ref.dtype)


# ------------------------------------------------------------------- wrappers

def conv_pool_gemm(pgroups, w, b, out_dtype=jnp.bfloat16, max_tile=512):
    """pgroups:(4,M,K) bf16, w:(K,Cout) bf16, b:(1,Cout) f32 -> (M,Cout) bf16.

    M is the *pooled* row count (N*Ho/2*Wo/2).  Single maximal block unless
    M > max_tile, in which case rows are tiled with 'parallel' semantics
    (lets v7x megacore shard tiles; on v5e/v6e one big block is best anyway).
    """
    _, M, K = pgroups.shape
    Cout = w.shape[1]

    if M <= max_tile:
        tm, Mp = M, M                      # block == full dims -> no padding
    else:
        tm = max_tile                      # multiple of 8 (bf16 packs fine)
        Mp = pl.cdiv(M, tm) * tm
        if Mp != M:
            pgroups = jnp.pad(pgroups, ((0, 0), (0, Mp - M), (0, 0)))
    grid = (Mp // tm,)

    flops = 2 * 4 * Mp * K * Cout
    bytes_accessed = int(4 * Mp * K * 2 + K * Cout * 2 + Cout * 4
                         + Mp * Cout * 2)

    out = pl.pallas_call(
        _conv_pool_kernel,
        grid=grid,
        in_specs=[
            pl.BlockSpec((4, tm, K), lambda i: (0, i, 0)),
            pl.BlockSpec((K, Cout), lambda i: (0, 0)),
            pl.BlockSpec((1, Cout), lambda i: (0, 0)),
        ],
        out_specs=pl.BlockSpec((tm, Cout), lambda i: (i, 0)),
        out_shape=jax.ShapeDtypeStruct((Mp, Cout), out_dtype),
        compiler_params=pltpu.CompilerParams(
            dimension_semantics=("parallel",)),
        cost_estimate=pl.CostEstimate(flops=int(flops), transcendentals=0,
                                      bytes_accessed=bytes_accessed),
    )(pgroups, w, b)
    return out[:M] if Mp != M else out


def mlp_head(feat, fc_params, row_tile=256):
    """feat:(N,700) bf16 -> (N,10) f32. Whole 4-layer head in one kernel,
    row-tiled over batch (weights stay resident across tiles)."""
    N, F = feat.shape
    if N <= row_tile:
        tm, Np = N, N
    else:
        tm = row_tile
        Np = pl.cdiv(N, tm) * tm
        if Np != N:
            feat = jnp.pad(feat, ((0, Np - N), (0, 0)))
    grid = (Np // tm,)

    args = [feat]
    in_specs = [pl.BlockSpec((tm, F), lambda i: (i, 0))]
    for w, b in fc_params:
        args.append(w)
        in_specs.append(pl.BlockSpec(w.shape, lambda i: (0, 0)))
        args.append(b)
        in_specs.append(pl.BlockSpec(b.shape, lambda i: (0, 0)))
    n_out = fc_params[-1][0].shape[1]      # 128 (lane-padded)

    flops, prev = 0, F
    for w, _ in fc_params:
        flops += 2 * Np * prev * w.shape[1]
        prev = w.shape[1]
    bytes_accessed = int(Np * F * 2
                         + sum(w.size * 2 + b.size * 4 for w, b in fc_params)
                         + Np * n_out * 4)

    out = pl.pallas_call(
        _mlp_kernel,
        grid=grid,
        in_specs=in_specs,
        out_specs=pl.BlockSpec((tm, n_out), lambda i: (i, 0)),
        out_shape=jax.ShapeDtypeStruct((Np, n_out), jnp.float32),
        compiler_params=pltpu.CompilerParams(
            dimension_semantics=("parallel",)),
        cost_estimate=pl.CostEstimate(flops=int(flops), transcendentals=0,
                                      bytes_accessed=bytes_accessed),
    )(*args)
    return out[:N, :10]


# ------------------------------------------------------------------------ glue

def im2col_pooled(x, k):
    """NHWC -> (4, N*Hp*Wp, k*k*C) patches for a valid kxk conv followed by a
    2x2/2 max-pool.  Leading axis g = 2*dh+dw indexes the pooling-window
    position; row m = (n, h2, w2) indexes the pooled output pixel.
    K is ordered (kh, kw, Cin) to match the GEMM weight layout."""
    N, H, W, C = x.shape
    Ho, Wo = H - k + 1, W - k + 1
    Hp, Wp = Ho // 2, Wo // 2
    groups = []
    for dh in range(2):
        for dw in range(2):
            taps = []
            for i in range(k):
                for j in range(k):
                    taps.append(x[:, dh + i: dh + i + 2 * Hp - 1: 2,
                                     dw + j: dw + j + 2 * Wp - 1: 2, :])
            g = jnp.concatenate(taps, axis=-1)          # (N, Hp, Wp, k*k*C)
            groups.append(g.reshape(N * Hp * Wp, k * k * C))
    return jnp.stack(groups, axis=0), (N, Hp, Wp)


def _uniform(key, shape, bound):
    return jax.random.uniform(key, shape, jnp.float32, -bound, bound)


def init_conv(key, cin, cout, k):
    kw_, kb = jax.random.split(key)
    bound = 1.0 / math.sqrt(cin * k * k)
    # PyTorch (cout,cin,kh,kw) reordered to GEMM layout (kh*kw*cin, cout), bf16.
    w = _uniform(kw_, (k, k, cin, cout), bound).reshape(k * k * cin, cout)
    b = _uniform(kb, (1, cout), bound)                 # bias stays f32
    return w.astype(jnp.bfloat16), b


def init_fc(key, fin, fout, fin_pad, fout_pad, chw=None):
    kw_, kb = jax.random.split(key)
    bound = 1.0 / math.sqrt(fin)
    w = _uniform(kw_, (fin, fout), bound)
    if chw is not None:
        # PyTorch flatten order is (C,H,W); our NHWC path flattens (H,W,C).
        # Permute fc1's weight rows once at init so no runtime transpose needed.
        c, h, ww = chw
        w = w.reshape(c, h, ww, fout).transpose(1, 2, 0, 3).reshape(fin, fout)
    b = _uniform(kb, (1, fout), bound)
    if fin_pad != fin or fout_pad != fout:
        # Zero padding: padded cols get 0 weight + 0 bias -> stay 0 after ReLU.
        w = jnp.pad(w, ((0, fin_pad - fin), (0, fout_pad - fout)))
        b = jnp.pad(b, ((0, 0), (0, fout_pad - fout)))
    return w.astype(jnp.bfloat16), b


def init_params(key):
    ks = jax.random.split(key, 7)
    return {
        "conv1": init_conv(ks[0], 3, 15, 3),
        "conv2": init_conv(ks[1], 15, 75, 4),
        "conv3": init_conv(ks[2], 75, 175, 3),
        "fc": [init_fc(ks[3], 700, 200, 700, 256, chw=(175, 2, 2)),
               init_fc(ks[4], 200, 120, 256, 128),
               init_fc(ks[5], 120, 84, 128, 128),
               init_fc(ks[6], 84, 10, 128, 128)],
    }


def forward(params, x_nchw):
    x = jnp.transpose(x_nchw, (0, 2, 3, 1)).astype(jnp.bfloat16)   # NCHW->NHWC

    def conv_block(x, wb, k):
        w, b = wb
        pg, (n, hp, wp) = im2col_pooled(x, k)
        y = conv_pool_gemm(pg, w, b)            # fused GEMM+bias+ReLU+maxpool
        return y.reshape(n, hp, wp, w.shape[1])

    x = conv_block(x, params["conv1"], 3)       # (N, 15, 15,  15)
    x = conv_block(x, params["conv2"], 4)       # (N,  6,  6,  75)
    x = conv_block(x, params["conv3"], 3)       # (N,  2,  2, 175)

    # Flatten stays in (H,W,C) order (fc1 rows were permuted at init): no
    # runtime transpose on the critical path.
    feat = x.reshape(x.shape[0], -1)            # (N, 700) bf16
    return mlp_head(feat, params["fc"])         # (N, 10) f32


if __name__ == "__main__":
    key = jax.random.PRNGKey(0)
    pkey, xkey = jax.random.split(key)
    params = init_params(pkey)
    x = jax.random.normal(xkey, (2, 3, 32, 32), jnp.float32)   # NCHW, as PyTorch
    fwd = jax.jit(forward)
    out = fwd(params, x)
    jax.block_until_ready(out)
    assert out.shape == (2, 10) and out.dtype == jnp.float32
    print("KERNEL_OK")
</pallas_src>

<mosaic_0001>
module attributes {stable_mosaic.version = 11 : i64} {
  func.func @_conv_pool_kernel(%arg0: i32, %arg1: memref<4x450x27xbf16, #tpu.memory_space<vmem>>, %arg2: memref<27x15xbf16, #tpu.memory_space<vmem>>, %arg3: memref<1x15xf32, #tpu.memory_space<vmem>>, %arg4: memref<450x15xbf16, #tpu.memory_space<vmem>>) attributes {dimension_semantics = [#tpu.dimension_semantics<parallel>], iteration_bounds = array<i64: 1>, scalar_prefetch = 0 : i64, scratch_operands = 0 : i64, tpu.core_type = #tpu.core_type<tc>, window_params = [{transform_indices = @transform_0, window_bounds = array<i64: 4, 450, 27>}, {pipeline_mode = #tpu.pipeline_mode<synchronous>, transform_indices = @transform_1, window_bounds = array<i64: 27, 15>}, {pipeline_mode = #tpu.pipeline_mode<synchronous>, transform_indices = @transform_2, window_bounds = array<i64: 1, 15>}, {transform_indices = @transform_3, window_bounds = array<i64: 450, 15>}]} {
    %c0 = arith.constant 0 : index
    %c0_0 = arith.constant 0 : index
    %0 = vector.load %arg2[%c0, %c0_0] : memref<27x15xbf16, #tpu.memory_space<vmem>>, vector<27x15xbf16>
    %c0_1 = arith.constant 0 : index
    %c0_2 = arith.constant 0 : index
    %1 = vector.load %arg3[%c0_1, %c0_2] : memref<1x15xf32, #tpu.memory_space<vmem>>, vector<1x15xf32>
    %c0_3 = arith.constant 0 : index
    %c0_4 = arith.constant 0 : index
    %c0_5 = arith.constant 0 : index
    %2 = vector.load %arg1[%c0_3, %c0_4, %c0_5] : memref<4x450x27xbf16, #tpu.memory_space<vmem>>, vector<1x450x27xbf16>
    %3 = vector.shape_cast %2 : vector<1x450x27xbf16> to vector<450x27xbf16>
    %cst = arith.constant dense<0.000000e+00> : vector<450x15xf32>
    %4 = tpu.matmul %3, %0, %cst {dimension_numbers = #tpu.dot_dimension_numbers<[1], [0], [0], [1], [0, 0, 1, 1], [], []>} : vector<450x27xbf16>, vector<27x15xbf16>, vector<450x15xf32> -> vector<450x15xf32>
    %5 = vector.broadcast %1 : vector<1x15xf32> to vector<450x15xf32>
    %6 = arith.addf %4, %5 : vector<450x15xf32>
    %cst_6 = arith.constant 0.000000e+00 : f32
    %7 = vector.broadcast %cst_6 : f32 to vector<450x15xf32>
    %8 = arith.maximumf %6, %7 : vector<450x15xf32>
    %c1 = arith.constant 1 : index
    %c0_7 = arith.constant 0 : index
    %c0_8 = arith.constant 0 : index
    %9 = vector.load %arg1[%c1, %c0_7, %c0_8] : memref<4x450x27xbf16, #tpu.memory_space<vmem>>, vector<1x450x27xbf16>
    %10 = vector.shape_cast %9 : vector<1x450x27xbf16> to vector<450x27xbf16>
    %cst_9 = arith.constant dense<0.000000e+00> : vector<450x15xf32>
    %11 = tpu.matmul %10, %0, %cst_9 {dimension_numbers = #tpu.dot_dimension_numbers<[1], [0], [0], [1], [0, 0, 1, 1], [], []>} : vector<450x27xbf16>, vector<27x15xbf16>, vector<450x15xf32> -> vector<450x15xf32>
    %12 = vector.broadcast %1 : vector<1x15xf32> to vector<450x15xf32>
    %13 = arith.addf %11, %12 : vector<450x15xf32>
    %cst_10 = arith.constant 0.000000e+00 : f32
    %14 = vector.broadcast %cst_10 : f32 to vector<450x15xf32>
    %15 = arith.maximumf %13, %14 : vector<450x15xf32>
    %16 = arith.maximumf %8, %15 : vector<450x15xf32>
    %c2 = arith.constant 2 : index
    %c0_11 = arith.constant 0 : index
    %c0_12 = arith.constant 0 : index
    %17 = vector.load %arg1[%c2, %c0_11, %c0_12] : memref<4x450x27xbf16, #tpu.memory_space<vmem>>, vector<1x450x27xbf16>
    %18 = vector.shape_cast %17 : vector<1x450x27xbf16> to vector<450x27xbf16>
    %cst_13 = arith.constant dense<0.000000e+00> : vector<450x15xf32>
    %19 = tpu.matmul %18, %0, %cst_13 {dimension_numbers = #tpu.dot_dimension_numbers<[1], [0], [0], [1], [0, 0, 1, 1], [], []>} : vector<450x27xbf16>, vector<27x15xbf16>, vector<450x15xf32> -> vector<450x15xf32>
    %20 = vector.broadcast %1 : vector<1x15xf32> to vector<450x15xf32>
    %21 = arith.addf %19, %20 : vector<450x15xf32>
    %cst_14 = arith.constant 0.000000e+00 : f32
    %22 = vector.broadcast %cst_14 : f32 to vector<450x15xf32>
    %23 = arith.maximumf %21, %22 : vector<450x15xf32>
    %24 = arith.maximumf %16, %23 : vector<450x15xf32>
    %c3 = arith.constant 3 : index
    %c0_15 = arith.constant 0 : index
    %c0_16 = arith.constant 0 : index
    %25 = vector.load %arg1[%c3, %c0_15, %c0_16] : memref<4x450x27xbf16, #tpu.memory_space<vmem>>, vector<1x450x27xbf16>
    %26 = vector.shape_cast %25 : vector<1x450x27xbf16> to vector<450x27xbf16>
    %cst_17 = arith.constant dense<0.000000e+00> : vector<450x15xf32>
    %27 = tpu.matmul %26, %0, %cst_17 {dimension_numbers = #tpu.dot_dimension_numbers<[1], [0], [0], [1], [0, 0, 1, 1], [], []>} : vector<450x27xbf16>, vector<27x15xbf16>, vector<450x15xf32> -> vector<450x15xf32>
    %28 = vector.broadcast %1 : vector<1x15xf32> to vector<450x15xf32>
    %29 = arith.addf %27, %28 : vector<450x15xf32>
    %cst_18 = arith.constant 0.000000e+00 : f32
    %30 = vector.broadcast %cst_18 : f32 to vector<450x15xf32>
    %31 = arith.maximumf %29, %30 : vector<450x15xf32>
    %32 = arith.maximumf %24, %31 : vector<450x15xf32>
    %33 = arith.truncf %32 : vector<450x15xf32> to vector<450x15xbf16>
    %c0_19 = arith.constant 0 : index
    %c0_20 = arith.constant 0 : index
    %34 = vector.load %arg4[%c0_19, %c0_20] : memref<450x15xbf16, #tpu.memory_space<vmem>>, vector<450x15xbf16>
    tpu.vector_store %arg4[%c0_19, %c0_20], %33 {strides = array<i32>} : memref<450x15xbf16, #tpu.memory_space<vmem>>, vector<450x15xbf16>,
    return
  }
  func.func @transform_0(%arg0: i32) -> (i32, i32, i32) {
    %c0_i32 = arith.constant 0 : i32
    %c0_i32_0 = arith.constant 0 : i32
    %c0_i32_1 = arith.constant 0 : i32
    return %c0_i32, %arg0, %c0_i32_0 : i32, i32, i32
  }
  func.func @transform_1(%arg0: i32) -> (i32, i32) {
    %c0_i32 = arith.constant 0 : i32
    %c0_i32_0 = arith.constant 0 : i32
    %c0_i32_1 = arith.constant 0 : i32
    return %c0_i32, %c0_i32_0 : i32, i32
  }
  func.func @transform_2(%arg0: i32) -> (i32, i32) {
    %c0_i32 = arith.constant 0 : i32
    %c0_i32_0 = arith.constant 0 : i32
    %c0_i32_1 = arith.constant 0 : i32
    return %c0_i32, %c0_i32_0 : i32, i32
  }
  func.func @transform_3(%arg0: i32) -> (i32, i32) {
    %c0_i32 = arith.constant 0 : i32
    %c0_i32_0 = arith.constant 0 : i32
    return %arg0, %c0_i32 : i32, i32
  }
}

module attributes {stable_mosaic.version = 11 : i64} {
  func.func @_conv_pool_kernel(%arg0: i32, %arg1: memref<4x72x240xbf16, #tpu.memory_space<vmem>>, %arg2: memref<240x75xbf16, #tpu.memory_space<vmem>>, %arg3: memref<1x75xf32, #tpu.memory_space<vmem>>, %arg4: memref<72x75xbf16, #tpu.memory_space<vmem>>) attributes {dimension_semantics = [#tpu.dimension_semantics<parallel>], iteration_bounds = array<i64: 1>, scalar_prefetch = 0 : i64, scratch_operands = 0 : i64, tpu.core_type = #tpu.core_type<tc>, window_params = [{transform_indices = @transform_0, window_bounds = array<i64: 4, 72, 240>}, {pipeline_mode = #tpu.pipeline_mode<synchronous>, transform_indices = @transform_1, window_bounds = array<i64: 240, 75>}, {pipeline_mode = #tpu.pipeline_mode<synchronous>, transform_indices = @transform_2, window_bounds = array<i64: 1, 75>}, {transform_indices = @transform_3, window_bounds = array<i64: 72, 75>}]} {
    %c0 = arith.constant 0 : index
    %c0_0 = arith.constant 0 : index
    %0 = vector.load %arg2[%c0, %c0_0] : memref<240x75xbf16, #tpu.memory_space<vmem>>, vector<240x75xbf16>
    %c0_1 = arith.constant 0 : index
    %c0_2 = arith.constant 0 : index
    %1 = vector.load %arg3[%c0_1, %c0_2] : memref<1x75xf32, #tpu.memory_space<vmem>>, vector<1x75xf32>
    %c0_3 = arith.constant 0 : index
    %c0_4 = arith.constant 0 : index
    %c0_5 = arith.constant 0 : index
    %2 = vector.load %arg1[%c0_3, %c0_4, %c0_5] : memref<4x72x240xbf16, #tpu.memory_space<vmem>>, vector<1x72x240xbf16>
    %3 = vector.shape_cast %2 : vector<1x72x240xbf16> to vector<72x240xbf16>
    %cst = arith.constant dense<0.000000e+00> : vector<72x75xf32>
    %4 = tpu.matmul %3, %0, %cst {dimension_numbers = #tpu.dot_dimension_numbers<[1], [0], [0], [1], [0, 0, 1, 1], [], []>} : vector<72x240xbf16>, vector<240x75xbf16>, vector<72x75xf32> -> vector<72x75xf32>
    %5 = vector.broadcast %1 : vector<1x75xf32> to vector<72x75xf32>
    %6 = arith.addf %4, %5 : vector<72x75xf32>
    %cst_6 = arith.constant 0.000000e+00 : f32
    %7 = vector.broadcast %cst_6 : f32 to vector<72x75xf32>
    %8 = arith.maximumf %6, %7 : vector<72x75xf32>
    %c1 = arith.constant 1 : index
    %c0_7 = arith.constant 0 : index
    %c0_8 = arith.constant 0 : index
    %9 = vector.load %arg1[%c1, %c0_7, %c0_8] : memref<4x72x240xbf16, #tpu.memory_space<vmem>>, vector<1x72x240xbf16>
    %10 = vector.shape_cast %9 : vector<1x72x240xbf16> to vector<72x240xbf16>
    %cst_9 = arith.constant dense<0.000000e+00> : vector<72x75xf32>
    %11 = tpu.matmul %10, %0, %cst_9 {dimension_numbers = #tpu.dot_dimension_numbers<[1], [0], [0], [1], [0, 0, 1, 1], [], []>} : vector<72x240xbf16>, vector<240x75xbf16>, vector<72x75xf32> -> vector<72x75xf32>
    %12 = vector.broadcast %1 : vector<1x75xf32> to vector<72x75xf32>
    %13 = arith.addf %11, %12 : vector<72x75xf32>
    %cst_10 = arith.constant 0.000000e+00 : f32
    %14 = vector.broadcast %cst_10 : f32 to vector<72x75xf32>
    %15 = arith.maximumf %13, %14 : vector<72x75xf32>
    %16 = arith.maximumf %8, %15 : vector<72x75xf32>
    %c2 = arith.constant 2 : index
    %c0_11 = arith.constant 0 : index
    %c0_12 = arith.constant 0 : index
    %17 = vector.load %arg1[%c2, %c0_11, %c0_12] : memref<4x72x240xbf16, #tpu.memory_space<vmem>>, vector<1x72x240xbf16>
    %18 = vector.shape_cast %17 : vector<1x72x240xbf16> to vector<72x240xbf16>
    %cst_13 = arith.constant dense<0.000000e+00> : vector<72x75xf32>
    %19 = tpu.matmul %18, %0, %cst_13 {dimension_numbers = #tpu.dot_dimension_numbers<[1], [0], [0], [1], [0, 0, 1, 1], [], []>} : vector<72x240xbf16>, vector<240x75xbf16>, vector<72x75xf32> -> vector<72x75xf32>
    %20 = vector.broadcast %1 : vector<1x75xf32> to vector<72x75xf32>
    %21 = arith.addf %19, %20 : vector<72x75xf32>
    %cst_14 = arith.constant 0.000000e+00 : f32
    %22 = vector.broadcast %cst_14 : f32 to vector<72x75xf32>
    %23 = arith.maximumf %21, %22 : vector<72x75xf32>
    %24 = arith.maximumf %16, %23 : vector<72x75xf32>
    %c3 = arith.constant 3 : index
    %c0_15 = arith.constant 0 : index
    %c0_16 = arith.constant 0 : index
    %25 = vector.load %arg1[%c3, %c0_15, %c0_16] : memref<4x72x240xbf16, #tpu.memory_space<vmem>>, vector<1x72x240xbf16>
    %26 = vector.shape_cast %25 : vector<1x72x240xbf16> to vector<72x240xbf16>
    %cst_17 = arith.constant dense<0.000000e+00> : vector<72x75xf32>
    %27 = tpu.matmul %26, %0, %cst_17 {dimension_numbers = #tpu.dot_dimension_numbers<[1], [0], [0], [1], [0, 0, 1, 1], [], []>} : vector<72x240xbf16>, vector<240x75xbf16>, vector<72x75xf32> -> vector<72x75xf32>
    %28 = vector.broadcast %1 : vector<1x75xf32> to vector<72x75xf32>
    %29 = arith.addf %27, %28 : vector<72x75xf32>
    %cst_18 = arith.constant 0.000000e+00 : f32
    %30 = vector.broadcast %cst_18 : f32 to vector<72x75xf32>
    %31 = arith.maximumf %29, %30 : vector<72x75xf32>
    %32 = arith.maximumf %24, %31 : vector<72x75xf32>
    %33 = arith.truncf %32 : vector<72x75xf32> to vector<72x75xbf16>
    %c0_19 = arith.constant 0 : index
    %c0_20 = arith.constant 0 : index
    %34 = vector.load %arg4[%c0_19, %c0_20] : memref<72x75xbf16, #tpu.memory_space<vmem>>, vector<72x75xbf16>
    tpu.vector_store %arg4[%c0_19, %c0_20], %33 {strides = array<i32>} : memref<72x75xbf16, #tpu.memory_space<vmem>>, vector<72x75xbf16>,
    return
  }
  func.func @transform_0(%arg0: i32) -> (i32, i32, i32) {
    %c0_i32 = arith.constant 0 : i32
    %c0_i32_0 = arith.constant 0 : i32
    %c0_i32_1 = arith.constant 0 : i32
    return %c0_i32, %arg0, %c0_i32_0 : i32, i32, i32
  }
  func.func @transform_1(%arg0: i32) -> (i32, i32) {
    %c0_i32 = arith.constant 0 : i32
    %c0_i32_0 = arith.constant 0 : i32
    %c0_i32_1 = arith.constant 0 : i32
    return %c0_i32, %c0_i32_0 : i32, i32
  }
  func.func @transform_2(%arg0: i32) -> (i32, i32) {
    %c0_i32 = arith.constant 0 : i32
    %c0_i32_0 = arith.constant 0 : i32
    %c0_i32_1 = arith.constant 0 : i32
    return %c0_i32, %c0_i32_0 : i32, i32
  }
  func.func @transform_3(%arg0: i32) -> (i32, i32) {
    %c0_i32 = arith.constant 0 : i32
    %c0_i32_0 = arith.constant 0 : i32
    return %arg0, %c0_i32 : i32, i32
  }
}

module attributes {stable_mosaic.version = 11 : i64} {
  func.func @_mlp_kernel(%arg0: i32, %arg1: memref<2x700xbf16, #tpu.memory_space<vmem>>, %arg2: memref<700x256xbf16, #tpu.memory_space<vmem>>, %arg3: memref<1x256xf32, #tpu.memory_space<vmem>>, %arg4: memref<256x128xbf16, #tpu.memory_space<vmem>>, %arg5: memref<1x128xf32, #tpu.memory_space<vmem>>, %arg6: memref<128x128xbf16, #tpu.memory_space<vmem>>, %arg7: memref<1x128xf32, #tpu.memory_space<vmem>>, %arg8: memref<128x128xbf16, #tpu.memory_space<vmem>>, %arg9: memref<1x128xf32, #tpu.memory_space<vmem>>, %arg10: memref<2x128xf32, #tpu.memory_space<vmem>>) attributes {dimension_semantics = [#tpu.dimension_semantics<parallel>], iteration_bounds = array<i64: 1>, scalar_prefetch = 0 : i64, scratch_operands = 0 : i64, tpu.core_type = #tpu.core_type<tc>, window_params = [{transform_indices = @transform_0, window_bounds = array<i64: 2, 700>}, {pipeline_mode = #tpu.pipeline_mode<synchronous>, transform_indices = @transform_1, window_bounds = array<i64: 700, 256>}, {pipeline_mode = #tpu.pipeline_mode<synchronous>, transform_indices = @transform_2, window_bounds = array<i64: 1, 256>}, {pipeline_mode = #tpu.pipeline_mode<synchronous>, transform_indices = @transform_3, window_bounds = array<i64: 256, 128>}, {pipeline_mode = #tpu.pipeline_mode<synchronous>, transform_indices = @transform_4, window_bounds = array<i64: 1, 128>}, {pipeline_mode = #tpu.pipeline_mode<synchronous>, transform_indices = @transform_5, window_bounds = array<i64: 128, 128>}, {pipeline_mode = #tpu.pipeline_mode<synchronous>, transform_indices = @transform_6, window_bounds = array<i64: 1, 128>}, {pipeline_mode = #tpu.pipeline_mode<synchronous>, transform_indices = @transform_7, window_bounds = array<i64: 128, 128>}, {pipeline_mode = #tpu.pipeline_mode<synchronous>, transform_indices = @transform_8, window_bounds = array<i64: 1, 128>}, {transform_indices = @transform_9, window_bounds = array<i64: 2, 128>}]} {
    %c0 = arith.constant 0 : index
    %c0_0 = arith.constant 0 : index
    %0 = vector.load %arg1[%c0, %c0_0] : memref<2x700xbf16, #tpu.memory_space<vmem>>, vector<2x700xbf16>
    %c0_1 = arith.constant 0 : index
    %c0_2 = arith.constant 0 : index
    %1 = vector.load %arg2[%c0_1, %c0_2] : memref<700x256xbf16, #tpu.memory_space<vmem>>, vector<700x256xbf16>
    %cst = arith.constant dense<0.000000e+00> : vector<2x256xf32>
    %2 = tpu.matmul %0, %1, %cst {dimension_numbers = #tpu.dot_dimension_numbers<[1], [0], [0], [1], [0, 0, 1, 1], [], []>} : vector<2x700xbf16>, vector<700x256xbf16>, vector<2x256xf32> -> vector<2x256xf32>
    %c0_3 = arith.constant 0 : index
    %c0_4 = arith.constant 0 : index
    %3 = vector.load %arg3[%c0_3, %c0_4] : memref<1x256xf32, #tpu.memory_space<vmem>>, vector<1x256xf32>
    %4 = vector.broadcast %3 : vector<1x256xf32> to vector<2x256xf32>
    %5 = arith.addf %2, %4 : vector<2x256xf32>
    %cst_5 = arith.constant 0.000000e+00 : f32
    %6 = vector.broadcast %cst_5 : f32 to vector<2x256xf32>
    %7 = arith.maximumf %5, %6 : vector<2x256xf32>
    %8 = arith.truncf %7 : vector<2x256xf32> to vector<2x256xbf16>
    %c0_6 = arith.constant 0 : index
    %c0_7 = arith.constant 0 : index
    %9 = vector.load %arg4[%c0_6, %c0_7] : memref<256x128xbf16, #tpu.memory_space<vmem>>, vector<256x128xbf16>
    %cst_8 = arith.constant dense<0.000000e+00> : vector<2x128xf32>
    %10 = tpu.matmul %8, %9, %cst_8 {dimension_numbers = #tpu.dot_dimension_numbers<[1], [0], [0], [1], [0, 0, 1, 1], [], []>} : vector<2x256xbf16>, vector<256x128xbf16>, vector<2x128xf32> -> vector<2x128xf32>
    %c0_9 = arith.constant 0 : index
    %c0_10 = arith.constant 0 : index
    %11 = vector.load %arg5[%c0_9, %c0_10] : memref<1x128xf32, #tpu.memory_space<vmem>>, vector<1x128xf32>
    %12 = vector.broadcast %11 : vector<1x128xf32> to vector<2x128xf32>
    %13 = arith.addf %10, %12 : vector<2x128xf32>
    %cst_11 = arith.constant 0.000000e+00 : f32
    %14 = vector.broadcast %cst_11 : f32 to vector<2x128xf32>
    %15 = arith.maximumf %13, %14 : vector<2x128xf32>
    %16 = arith.truncf %15 : vector<2x128xf32> to vector<2x128xbf16>
    %c0_12 = arith.constant 0 : index
    %c0_13 = arith.constant 0 : index
    %17 = vector.load %arg6[%c0_12, %c0_13] : memref<128x128xbf16, #tpu.memory_space<vmem>>, vector<128x128xbf16>
    %cst_14 = arith.constant dense<0.000000e+00> : vector<2x128xf32>
    %18 = tpu.matmul %16, %17, %cst_14 {dimension_numbers = #tpu.dot_dimension_numbers<[1], [0], [0], [1], [0, 0, 1, 1], [], []>} : vector<2x128xbf16>, vector<128x128xbf16>, vector<2x128xf32> -> vector<2x128xf32>
    %c0_15 = arith.constant 0 : index
    %c0_16 = arith.constant 0 : index
    %19 = vector.load %arg7[%c0_15, %c0_16] : memref<1x128xf32, #tpu.memory_space<vmem>>, vector<1x128xf32>
    %20 = vector.broadcast %19 : vector<1x128xf32> to vector<2x128xf32>
    %21 = arith.addf %18, %20 : vector<2x128xf32>
    %cst_17 = arith.constant 0.000000e+00 : f32
    %22 = vector.broadcast %cst_17 : f32 to vector<2x128xf32>
    %23 = arith.maximumf %21, %22 : vector<2x128xf32>
    %24 = arith.truncf %23 : vector<2x128xf32> to vector<2x128xbf16>
    %c0_18 = arith.constant 0 : index
    %c0_19 = arith.constant 0 : index
    %25 = vector.load %arg8[%c0_18, %c0_19] : memref<128x128xbf16, #tpu.memory_space<vmem>>, vector<128x128xbf16>
    %cst_20 = arith.constant dense<0.000000e+00> : vector<2x128xf32>
    %26 = tpu.matmul %24, %25, %cst_20 {dimension_numbers = #tpu.dot_dimension_numbers<[1], [0], [0], [1], [0, 0, 1, 1], [], []>} : vector<2x128xbf16>, vector<128x128xbf16>, vector<2x128xf32> -> vector<2x128xf32>
    %c0_21 = arith.constant 0 : index
    %c0_22 = arith.constant 0 : index
    %27 = vector.load %arg9[%c0_21, %c0_22] : memref<1x128xf32, #tpu.memory_space<vmem>>, vector<1x128xf32>
    %28 = vector.broadcast %27 : vector<1x128xf32> to vector<2x128xf32>
    %29 = arith.addf %26, %28 : vector<2x128xf32>
    %c0_23 = arith.constant 0 : index
    %c0_24 = arith.constant 0 : index
    %30 = vector.load %arg10[%c0_23, %c0_24] : memref<2x128xf32, #tpu.memory_space<vmem>>, vector<2x128xf32>
    tpu.vector_store %arg10[%c0_23, %c0_24], %29 {strides = array<i32>} : memref<2x128xf32, #tpu.memory_space<vmem>>, vector<2x128xf32>,
    return
  }
  func.func @transform_0(%arg0: i32) -> (i32, i32) {
    %c0_i32 = arith.constant 0 : i32
    %c0_i32_0 = arith.constant 0 : i32
    return %arg0, %c0_i32 : i32, i32
  }
  func.func @transform_1(%arg0: i32) -> (i32, i32) {
    %c0_i32 = arith.constant 0 : i32
    %c0_i32_0 = arith.constant 0 : i32
    %c0_i32_1 = arith.constant 0 : i32
    return %c0_i32, %c0_i32_0 : i32, i32
  }
  func.func @transform_2(%arg0: i32) -> (i32, i32) {
    %c0_i32 = arith.constant 0 : i32
    %c0_i32_0 = arith.constant 0 : i32
    %c0_i32_1 = arith.constant 0 : i32
    return %c0_i32, %c0_i32_0 : i32, i32
  }
  func.func @transform_3(%arg0: i32) -> (i32, i32) {
    %c0_i32 = arith.constant 0 : i32
    %c0_i32_0 = arith.constant 0 : i32
    %c0_i32_1 = arith.constant 0 : i32
    return %c0_i32, %c0_i32_0 : i32, i32
  }
  func.func @transform_4(%arg0: i32) -> (i32, i32) {
    %c0_i32 = arith.constant 0 : i32
    %c0_i32_0 = arith.constant 0 : i32
    %c0_i32_1 = arith.constant 0 : i32
    return %c0_i32, %c0_i32_0 : i32, i32
  }
  func.func @transform_5(%arg0: i32) -> (i32, i32) {
    %c0_i32 = arith.constant 0 : i32
    %c0_i32_0 = arith.constant 0 : i32
    %c0_i32_1 = arith.constant 0 : i32
    return %c0_i32, %c0_i32_0 : i32, i32
  }
  func.func @transform_6(%arg0: i32) -> (i32, i32) {
    %c0_i32 = arith.constant 0 : i32
    %c0_i32_0 = arith.constant 0 : i32
    %c0_i32_1 = arith.constant 0 : i32
    return %c0_i32, %c0_i32_0 : i32, i32
  }
  func.func @transform_7(%arg0: i32) -> (i32, i32) {
    %c0_i32 = arith.constant 0 : i32
    %c0_i32_0 = arith.constant 0 : i32
    %c0_i32_1 = arith.constant 0 : i32
    return %c0_i32, %c0_i32_0 : i32, i32
  }
  func.func @transform_8(%arg0: i32) -> (i32, i32) {
    %c0_i32 = arith.constant 0 : i32
    %c0_i32_0 = arith.constant 0 : i32
    %c0_i32_1 = arith.constant 0 : i32
    return %c0_i32, %c0_i32_0 : i32, i32
  }
  func.func @transform_9(%arg0: i32) -> (i32, i32) {
    %c0_i32 = arith.constant 0 : i32
    %c0_i32_0 = arith.constant 0 : i32
    return %arg0, %c0_i32 : i32, i32
  }
}

module attributes {stable_mosaic.version = 11 : i64} {
  func.func @_conv_pool_kernel(%arg0: i32, %arg1: memref<4x8x675xbf16, #tpu.memory_space<vmem>>, %arg2: memref<675x175xbf16, #tpu.memory_space<vmem>>, %arg3: memref<1x175xf32, #tpu.memory_space<vmem>>, %arg4: memref<8x175xbf16, #tpu.memory_space<vmem>>) attributes {dimension_semantics = [#tpu.dimension_semantics<parallel>], iteration_bounds = array<i64: 1>, scalar_prefetch = 0 : i64, scratch_operands = 0 : i64, tpu.core_type = #tpu.core_type<tc>, window_params = [{transform_indices = @transform_0, window_bounds = array<i64: 4, 8, 675>}, {pipeline_mode = #tpu.pipeline_mode<synchronous>, transform_indices = @transform_1, window_bounds = array<i64: 675, 175>}, {pipeline_mode = #tpu.pipeline_mode<synchronous>, transform_indices = @transform_2, window_bounds = array<i64: 1, 175>}, {transform_indices = @transform_3, window_bounds = array<i64: 8, 175>}]} {
    %c0 = arith.constant 0 : index
    %c0_0 = arith.constant 0 : index
    %0 = vector.load %arg2[%c0, %c0_0] : memref<675x175xbf16, #tpu.memory_space<vmem>>, vector<675x175xbf16>
    %c0_1 = arith.constant 0 : index
    %c0_2 = arith.constant 0 : index
    %1 = vector.load %arg3[%c0_1, %c0_2] : memref<1x175xf32, #tpu.memory_space<vmem>>, vector<1x175xf32>
    %c0_3 = arith.constant 0 : index
    %c0_4 = arith.constant 0 : index
    %c0_5 = arith.constant 0 : index
    %2 = vector.load %arg1[%c0_3, %c0_4, %c0_5] : memref<4x8x675xbf16, #tpu.memory_space<vmem>>, vector<1x8x675xbf16>
    %3 = vector.shape_cast %2 : vector<1x8x675xbf16> to vector<8x675xbf16>
    %cst = arith.constant dense<0.000000e+00> : vector<8x175xf32>
    %4 = tpu.matmul %3, %0, %cst {dimension_numbers = #tpu.dot_dimension_numbers<[1], [0], [0], [1], [0, 0, 1, 1], [], []>} : vector<8x675xbf16>, vector<675x175xbf16>, vector<8x175xf32> -> vector<8x175xf32>
    %5 = vector.broadcast %1 : vector<1x175xf32> to vector<8x175xf32>
    %6 = arith.addf %4, %5 : vector<8x175xf32>
    %cst_6 = arith.constant 0.000000e+00 : f32
    %7 = vector.broadcast %cst_6 : f32 to vector<8x175xf32>
    %8 = arith.maximumf %6, %7 : vector<8x175xf32>
    %c1 = arith.constant 1 : index
    %c0_7 = arith.constant 0 : index
    %c0_8 = arith.constant 0 : index
    %9 = vector.load %arg1[%c1, %c0_7, %c0_8] : memref<4x8x675xbf16, #tpu.memory_space<vmem>>, vector<1x8x675xbf16>
    %10 = vector.shape_cast %9 : vector<1x8x675xbf16> to vector<8x675xbf16>
    %cst_9 = arith.constant dense<0.000000e+00> : vector<8x175xf32>
    %11 = tpu.matmul %10, %0, %cst_9 {dimension_numbers = #tpu.dot_dimension_numbers<[1], [0], [0], [1], [0, 0, 1, 1], [], []>} : vector<8x675xbf16>, vector<675x175xbf16>, vector<8x175xf32> -> vector<8x175xf32>
    %12 = vector.broadcast %1 : vector<1x175xf32> to vector<8x175xf32>
    %13 = arith.addf %11, %12 : vector<8x175xf32>
    %cst_10 = arith.constant 0.000000e+00 : f32
    %14 = vector.broadcast %cst_10 : f32 to vector<8x175xf32>
    %15 = arith.maximumf %13, %14 : vector<8x175xf32>
    %16 = arith.maximumf %8, %15 : vector<8x175xf32>
    %c2 = arith.constant 2 : index
    %c0_11 = arith.constant 0 : index
    %c0_12 = arith.constant 0 : index
    %17 = vector.load %arg1[%c2, %c0_11, %c0_12] : memref<4x8x675xbf16, #tpu.memory_space<vmem>>, vector<1x8x675xbf16>
    %18 = vector.shape_cast %17 : vector<1x8x675xbf16> to vector<8x675xbf16>
    %cst_13 = arith.constant dense<0.000000e+00> : vector<8x175xf32>
    %19 = tpu.matmul %18, %0, %cst_13 {dimension_numbers = #tpu.dot_dimension_numbers<[1], [0], [0], [1], [0, 0, 1, 1], [], []>} : vector<8x675xbf16>, vector<675x175xbf16>, vector<8x175xf32> -> vector<8x175xf32>
    %20 = vector.broadcast %1 : vector<1x175xf32> to vector<8x175xf32>
    %21 = arith.addf %19, %20 : vector<8x175xf32>
    %cst_14 = arith.constant 0.000000e+00 : f32
    %22 = vector.broadcast %cst_14 : f32 to vector<8x175xf32>
    %23 = arith.maximumf %21, %22 : vector<8x175xf32>
    %24 = arith.maximumf %16, %23 : vector<8x175xf32>
    %c3 = arith.constant 3 : index
    %c0_15 = arith.constant 0 : index
    %c0_16 = arith.constant 0 : index
    %25 = vector.load %arg1[%c3, %c0_15, %c0_16] : memref<4x8x675xbf16, #tpu.memory_space<vmem>>, vector<1x8x675xbf16>
    %26 = vector.shape_cast %25 : vector<1x8x675xbf16> to vector<8x675xbf16>
    %cst_17 = arith.constant dense<0.000000e+00> : vector<8x175xf32>
    %27 = tpu.matmul %26, %0, %cst_17 {dimension_numbers = #tpu.dot_dimension_numbers<[1], [0], [0], [1], [0, 0, 1, 1], [], []>} : vector<8x675xbf16>, vector<675x175xbf16>, vector<8x175xf32> -> vector<8x175xf32>
    %28 = vector.broadcast %1 : vector<1x175xf32> to vector<8x175xf32>
    %29 = arith.addf %27, %28 : vector<8x175xf32>
    %cst_18 = arith.constant 0.000000e+00 : f32
    %30 = vector.broadcast %cst_18 : f32 to vector<8x175xf32>
    %31 = arith.maximumf %29, %30 : vector<8x175xf32>
    %32 = arith.maximumf %24, %31 : vector<8x175xf32>
    %33 = arith.truncf %32 : vector<8x175xf32> to vector<8x175xbf16>
    %c0_19 = arith.constant 0 : index
    %c0_20 = arith.constant 0 : index
    %34 = vector.load %arg4[%c0_19, %c0_20] : memref<8x175xbf16, #tpu.memory_space<vmem>>, vector<8x175xbf16>
    tpu.vector_store %arg4[%c0_19, %c0_20], %33 {strides = array<i32>} : memref<8x175xbf16, #tpu.memory_space<vmem>>, vector<8x175xbf16>,
    return
  }
  func.func @transform_0(%arg0: i32) -> (i32, i32, i32) {
    %c0_i32 = arith.constant 0 : i32
    %c0_i32_0 = arith.constant 0 : i32
    %c0_i32_1 = arith.constant 0 : i32
    return %c0_i32, %arg0, %c0_i32_0 : i32, i32, i32
  }
  func.func @transform_1(%arg0: i32) -> (i32, i32) {
    %c0_i32 = arith.constant 0 : i32
    %c0_i32_0 = arith.constant 0 : i32
    %c0_i32_1 = arith.constant 0 : i32
    return %c0_i32, %c0_i32_0 : i32, i32
  }
  func.func @transform_2(%arg0: i32) -> (i32, i32) {
    %c0_i32 = arith.constant 0 : i32
    %c0_i32_0 = arith.constant 0 : i32
    %c0_i32_1 = arith.constant 0 : i32
    return %c0_i32, %c0_i32_0 : i32, i32
  }
  func.func @transform_3(%arg0: i32) -> (i32, i32) {
    %c0_i32 = arith.constant 0 : i32
    %c0_i32_0 = arith.constant 0 : i32
    return %arg0, %c0_i32 : i32, i32
  }
}

</mosaic_0001>

<bundles_post_ra>
// kernel: forward.4
= control target key start
LH: loop header
LB: loop body
LE: loop exit
PB: predicated region body
PF: predicated region fallthrough
CT: control target
= control target key end

     0   :  { %vm322_vm0 = vcmask 1044480   ;;  %vm323_vm1 = vcmask 1045504   ;;  %v3185_v2 = vmov 65535   ;;  %vm234_vm2 = vcmask 220160   ;;  %s4149_s1 = inlined_call_operand.vmem [shape: bf16[27,15], index: 1, kind: input, shape index: {}]   ;;  %s4150_s2 = inlined_call_operand.vmem [shape: f32[1,15], index: 2, kind: input, shape index: {}]   ;;  %s4151_s0 = inlined_call_operand.vmem [shape: bf16[4,450,27], index: 0, kind: input, shape index: {}]   ;;  %s4152_s3 = inlined_call_operand.vmem [shape: bf16[450,15], index: 3, kind: output, shape index: {}]  }
   0x1   :  { %v2442_v0 = vld [vmem:[%s4149_s1 + $0x8] sm:$0xf]  ;;  %v3068_v1 = vld [vmem:[%s4149_s1 + $0x8] sm:$0x30]  ;;  %v324_v3 = vsel %vm322_vm0, 4294967295, %v3185_v2  ;;  %v3067_v7 = vld [vmem:[%s4149_s1] sm:$0xff] }
   0x2   :  { %v2443_v4 = vor.u32 %v3068_v1, %v2442_v0  ;;  %v325_v5 = vsel %vm323_vm1, %v324_v3, 0  ;;  %v3069_v8 = vld [vmem:[%s4151_s0] sm:$0xff]  ;;  %v3125_v10 = vld [vmem:[%s4151_s0 + $0x1c8] sm:$0xff]  ;;  %v3126_v14 = vld [vmem:[%s4151_s0 + $0x1d0] sm:$0xff]  ;;  %vm2261_vm3 = vcmask 117760   ;;  %vm2318_vm4 = vcmask 114688  }
   0x3   :  { %v3097_v9 = vld [vmem:[%s4151_s0 + $0xe4] sm:$0xff]  ;;  %v3153_v11 = vld [vmem:[%s4151_s0 + $0x2ac] sm:$0xff]  ;;  %v3154_v15 = vld [vmem:[%s4151_s0 + $0x2b4] sm:$0xff] }
   0x4   :  { %v327_v6 = vand.u32 %v2443_v4, %v325_v5  ;;  %v3070_v12 = vld [vmem:[%s4151_s0 + $0x8] sm:$0xff]  ;;  %v3071_v16 = vld [vmem:[%s4151_s0 + $0x10] sm:$0xff]  ;;  %v3127_v18 = vld [vmem:[%s4151_s0 + $0x1d8] sm:$0xff] }
   0x5   :  { %v3098_v13 = vld [vmem:[%s4151_s0 + $0xec] sm:$0xff]  ;;  %v3099_v17 = vld [vmem:[%s4151_s0 + $0xf4] sm:$0xff]  ;;  %v3155_v19 = vld [vmem:[%s4151_s0 + $0x2bc] sm:$0xff] }
   0x6   :  { %335 = vmatpush.bf16.msra.mxu0 %v327_v6  ;;  %833 = vmatpush.bf16.msra.mxu1 %v327_v6  ;;  %v3072_v20 = vld [vmem:[%s4151_s0 + $0x18] sm:$0xff]  ;;  %v3128_v22 = vld [vmem:[%s4151_s0 + $0x1e0] sm:$0xff]  ;;  %v3129_v26 = vld [vmem:[%s4151_s0 + $0x1e8] sm:$0xff] }
   0x7   :  { %1388 = vmatpush.bf16.msra.mxu2 %v327_v6  ;;  %1943 = vmatpush.bf16.msra.mxu3 %v327_v6  ;;  %v3100_v21 = vld [vmem:[%s4151_s0 + $0xfc] sm:$0xff]  ;;  %v3156_v23 = vld [vmem:[%s4151_s0 + $0x2c4] sm:$0xff]  ;;  %v3157_v27 = vld [vmem:[%s4151_s0 + $0x2cc] sm:$0xff] }
   0x8   :  { %v3073_v24 = vld [vmem:[%s4151_s0 + $0x20] sm:$0xff]  ;;  %v3074_v28 = vld [vmem:[%s4151_s0 + $0x28] sm:$0xff]  ;;  %v3130_v30 = vld [vmem:[%s4151_s0 + $0x1f0] sm:$0xff] }
   0x9   :  { %v3101_v25 = vld [vmem:[%s4151_s0 + $0x104] sm:$0xff]  ;;  %v3102_v29 = vld [vmem:[%s4151_s0 + $0x10c] sm:$0xff]  ;;  %v3158_v31 = vld [vmem:[%s4151_s0 + $0x2d4] sm:$0xff] }
   0xa   :  { %336 = vmatpush.bf16.msra.mxu0 %v3067_v7  ;;  %834 = vmatpush.bf16.msra.mxu1 %v3067_v7  ;;  %v3075_v32 = vld [vmem:[%s4151_s0 + $0x30] sm:$0xff]  ;;  %v3131_v34 = vld [vmem:[%s4151_s0 + $0x1f8] sm:$0xff]  ;;  %v3132_v38 = vld [vmem:[%s4151_s0 + $0x200] sm:$0xff] }
   0xb   :  { %1389 = vmatpush.bf16.msra.mxu2 %v3067_v7  ;;  %1944 = vmatpush.bf16.msra.mxu3 %v3067_v7  ;;  %v3103_v33 = vld [vmem:[%s4151_s0 + $0x114] sm:$0xff]  ;;  %v3159_v35 = vld [vmem:[%s4151_s0 + $0x2dc] sm:$0xff]  ;;  %v3160_v39 = vld [vmem:[%s4151_s0 + $0x2e4] sm:$0xff] }
   0xc   :  { %v3076_v36 = vld [vmem:[%s4151_s0 + $0x38] sm:$0xff]  ;;  %v3346_v40 = vld [vmem:[%s4150_s2] ss:$0 sm:$0xff]  ;;  %v3105_v42 = vld [vmem:[%s4151_s0 + $0x124] sm:$0xff] }
   0xd   :  { %2444 = vmatmul.msk.bf16.vlgmr.msra.gmra.mxu0 %vm234_vm2, %v3069_v8  ;;  %2642 = vmatmul.msk.bf16.vlgmr.msra.gmra.mxu1 %vm234_vm2, %v3097_v9  ;;  %v3104_v37 = vld [vmem:[%s4151_s0 + $0x11c] sm:$0xff]  ;;  %v3133_v45 = vld [vmem:[%s4151_s0 + $0x208] sm:$0xff] }
   0xe   :  { %2840 = vmatmul.msk.bf16.vlgmr.msra.gmra.mxu2 %vm234_vm2, %v3125_v10  ;;  %3038 = vmatmul.msk.bf16.vlgmr.msra.gmra.mxu3 %vm234_vm2, %v3153_v11  ;;  %v3077_v41 = vld [vmem:[%s4151_s0 + $0x40] sm:$0xff]  ;;  %v3161_v46 = vld [vmem:[%s4151_s0 + $0x2ec] sm:$0xff] }
   0xf   :  { %v3078_v4 = vld [vmem:[%s4151_s0 + $0x48] sm:$0xff]  ;;  %v3134_v11 = vld [vmem:[%s4151_s0 + $0x210] sm:$0xff] }
  0x10   :  { %v3106_v5 = vld [vmem:[%s4151_s0 + $0x12c] sm:$0xff] }
  0x1d   :  { %2445 = vmatmul.msk.bf16.gmra.mxu0 %vm234_vm2, %v3070_v12  ;;  %2643 = vmatmul.msk.bf16.gmra.mxu1 %vm234_vm2, %v3098_v13  ;;  %v3162_v12 = vld [vmem:[%s4151_s0 + $0x2f4] sm:$0xff] }
  0x1e   :  { %2841 = vmatmul.msk.bf16.gmra.mxu2 %vm234_vm2, %v3126_v14  ;;  %3039 = vmatmul.msk.bf16.gmra.mxu3 %vm234_vm2, %v3154_v15 }
  0x2d   :  { %2446 = vmatmul.msk.bf16.gmra.mxu0 %vm234_vm2, %v3071_v16  ;;  %2644 = vmatmul.msk.bf16.gmra.mxu1 %vm234_vm2, %v3099_v17 }
  0x2e   :  { %2842 = vmatmul.msk.bf16.gmra.mxu2 %vm234_vm2, %v3127_v18  ;;  %3040 = vmatmul.msk.bf16.gmra.mxu3 %vm234_vm2, %v3155_v19 }
  0x3d   :  { %2447 = vmatmul.msk.bf16.gmra.mxu0 %vm234_vm2, %v3072_v20  ;;  %2645 = vmatmul.msk.bf16.gmra.mxu1 %vm234_vm2, %v3100_v21 }
  0x3e   :  { %2843 = vmatmul.msk.bf16.gmra.mxu2 %vm234_vm2, %v3128_v22  ;;  %3041 = vmatmul.msk.bf16.gmra.mxu3 %vm234_vm2, %v3156_v23 }
  0x4d   :  { %2448 = vmatmul.msk.bf16.gmra.mxu0 %vm234_vm2, %v3073_v24  ;;  %2646 = vmatmul.msk.bf16.gmra.mxu1 %vm234_vm2, %v3101_v25 }
  0x4e   :  { %2844 = vmatmul.msk.bf16.gmra.mxu2 %vm234_vm2, %v3129_v26  ;;  %3042 = vmatmul.msk.bf16.gmra.mxu3 %vm234_vm2, %v3157_v27 }
  0x5d   :  { %2449 = vmatmul.msk.bf16.gmra.mxu0 %vm234_vm2, %v3074_v28  ;;  %2647 = vmatmul.msk.bf16.gmra.mxu1 %vm234_vm2, %v3102_v29 }
  0x5e   :  { %2845 = vmatmul.msk.bf16.gmra.mxu2 %vm234_vm2, %v3130_v30  ;;  %3043 = vmatmul.msk.bf16.gmra.mxu3 %vm234_vm2, %v3158_v31 }
  0x6d   :  { %2450 = vmatmul.msk.bf16.gmra.mxu0 %vm234_vm2, %v3075_v32  ;;  %2648 = vmatmul.msk.bf16.gmra.mxu1 %vm234_vm2, %v3103_v33 }
  0x6e   :  { %2846 = vmatmul.msk.bf16.gmra.mxu2 %vm234_vm2, %v3131_v34  ;;  %3044 = vmatmul.msk.bf16.gmra.mxu3 %vm234_vm2, %v3159_v35 }
  0x7d   :  { %2451 = vmatmul.msk.bf16.gmra.mxu0 %vm234_vm2, %v3076_v36  ;;  %2649 = vmatmul.msk.bf16.gmra.mxu1 %vm234_vm2, %v3104_v37 }
  0x7e   :  { %2847 = vmatmul.msk.bf16.gmra.mxu2 %vm234_vm2, %v3132_v38  ;;  %3045 = vmatmul.msk.bf16.gmra.mxu3 %vm234_vm2, %v3160_v39 }
  0x8a   :  { %v338_v43 = vpop.f32.mrf.mxu0  ;;  %v836_v44 = vpop.f32.mrf.mxu1 }
  0x8b   :  { %v339_v47 = vadd.f32 %v3346_v40, %v338_v43  ;;  %v837_v48 = vadd.f32 %v3346_v40, %v836_v44 }
  0x8d   :  { %2452 = vmatmul.msk.bf16.gmra.mxu0 %vm234_vm2, %v3077_v41  ;;  %2650 = vmatmul.msk.bf16.gmra.mxu1 %vm234_vm2, %v3105_v42  ;;  %v482_v49 = vmax.f32 %v339_v47, 0.0  ;;  %v980_v50 = vmax.f32 %v837_v48, 0.0  ;;  %v3079_v41 = vld [vmem:[%s4151_s0 + $0x50] sm:$0xff]  ;;  %v3135_v48 = vld [vmem:[%s4151_s0 + $0x218] sm:$0xff] }
  0x8e   :  { %2848 = vmatmul.msk.bf16.gmra.mxu2 %vm234_vm2, %v3133_v45  ;;  %3046 = vmatmul.msk.bf16.gmra.mxu3 %vm234_vm2, %v3161_v46  ;;  %v3107_v42 = vld [vmem:[%s4151_s0 + $0x134] sm:$0xff] }
  0x8f   :  { %v1037_v53 = vmax.f32 %v482_v49, %v980_v50  ;;  %v3163_v49 = vld [vmem:[%s4151_s0 + $0x2fc] sm:$0xff] }
  0x91   :  { %v1391_v51 = vpop.f32.mrf.mxu2  ;;  %v1946_v52 = vpop.f32.mrf.mxu3 }
  0x92   :  { %v1392_v54 = vadd.f32 %v3346_v40, %v1391_v51  ;;  %v1947_v55 = vadd.f32 %v3346_v40, %v1946_v52  ;;  %v340_v56 = vpop.f32.mrf.mxu0  ;;  %v838_v57 = vpop.f32.mrf.mxu1 }
  0x93   :  { %v341_v60 = vadd.f32 %v3346_v40, %v340_v56  ;;  %v839_v61 = vadd.f32 %v3346_v40, %v838_v57 }
  0x94   :  { %v1535_v58 = vmax.f32 %v1392_v54, 0.0  ;;  %v2090_v59 = vmax.f32 %v1947_v55, 0.0 }
  0x95   :  { %v483_v0 = vmax.f32 %v341_v60, 0.0  ;;  %v981_v1 = vmax.f32 %v839_v61, 0.0 }
  0x96   :  { %v1592_v62 = vmax.f32 %v1037_v53, %v1535_v58 }
  0x97   :  { %v1038_v15 = vmax.f32 %v483_v0, %v981_v1 }
  0x98   :  { %v2147_v63 = vmax.f32 %v1592_v62, %v2090_v59 }
  0x99   :  { %v1393_v2 = vpop.f32.mrf.mxu2  ;;  %v1948_v3 = vpop.f32.mrf.mxu3 }
  0x9a   :  { %v2204_v6 = vpack.c.bf16 %v2147_v63, %v2147_v63  ;;  %v1394_v7 = vadd.f32 %v3346_v40, %v1393_v2  ;;  %v1949_v8 = vadd.f32 %v3346_v40, %v1948_v3  ;;  %v343_v9 = vpop.f32.mrf.mxu0  ;;  %v841_v10 = vpop.f32.mrf.mxu1 }
  0x9b   :  { %v344_v13 = vadd.f32 %v3346_v40, %v343_v9  ;;  %v842_v14 = vadd.f32 %v3346_v40, %v841_v10 }
  0x9c   :  { %2262 = vst.msk [vmem:[%s4152_s3] sm:$0xf] %vm2261_vm3, %v2204_v6  ;;  %v1536_v16 = vmax.f32 %v1394_v7, 0.0  ;;  %v2091_v18 = vmax.f32 %v1949_v8, 0.0 }
  0x9d   :  { %2453 = vmatmul.msk.bf16.gmra.mxu0 %vm234_vm2, %v3078_v4  ;;  %2651 = vmatmul.msk.bf16.gmra.mxu1 %vm234_vm2, %v3106_v5  ;;  %v484_v19 = vmax.f32 %v344_v13, 0.0  ;;  %v982_v20 = vmax.f32 %v842_v14, 0.0  ;;  %v3080_v13 = vld [vmem:[%s4151_s0 + $0x58] sm:$0xff] }
  0x9e   :  { %v1593_v17 = vmax.f32 %v1038_v15, %v1536_v16  ;;  %2849 = vmatmul.msk.bf16.gmra.mxu2 %vm234_vm2, %v3134_v11  ;;  %3047 = vmatmul.msk.bf16.gmra.mxu3 %vm234_vm2, %v3162_v12  ;;  %v3108_v14 = vld [vmem:[%s4151_s0 + $0x13c] sm:$0xff] }
  0x9f   :  { %v1039_v25 = vmax.f32 %v484_v19, %v982_v20  ;;  %v3136_v20 = vld [vmem:[%s4151_s0 + $0x220] sm:$0xff] }
  0xa0   :  { %v2148_v21 = vmax.f32 %v1593_v17, %v2091_v18 }
  0xa1   :  { %v1396_v22 = vpop.f32.mrf.mxu2  ;;  %v1951_v23 = vpop.f32.mrf.mxu3 }
  0xa2   :  { %v2205_v24 = vpack.c.bf16 %v2148_v21, %v2148_v21  ;;  %v1397_v26 = vadd.f32 %v3346_v40, %v1396_v22  ;;  %v1952_v27 = vadd.f32 %v3346_v40, %v1951_v23  ;;  %v345_v28 = vpop.f32.mrf.mxu0  ;;  %v843_v29 = vpop.f32.mrf.mxu1  ;;  %v3164_v21 = vld [vmem:[%s4151_s0 + $0x304] sm:$0xff] }
  0xa3   :  { %v346_v32 = vadd.f32 %v3346_v40, %v345_v28  ;;  %v844_v33 = vadd.f32 %v3346_v40, %v843_v29 }
  0xa4   :  { %2263 = vst.msk [vmem:[%s4152_s3 + $0x4] sm:$0xf] %vm2261_vm3, %v2205_v24  ;;  %v1537_v30 = vmax.f32 %v1397_v26, 0.0  ;;  %v2092_v31 = vmax.f32 %v1952_v27, 0.0 }
  0xa5   :  { %v485_v36 = vmax.f32 %v346_v32, 0.0  ;;  %v983_v37 = vmax.f32 %v844_v33, 0.0 }
  0xa6   :  { %v1594_v34 = vmax.f32 %v1039_v25, %v1537_v30 }
  0xa7   :  { %v1040_v52 = vmax.f32 %v485_v36, %v983_v37 }
  0xa8   :  { %v2149_v35 = vmax.f32 %v1594_v34, %v2092_v31 }
  0xa9   :  { %v1398_v38 = vpop.f32.mrf.mxu2  ;;  %v1953_v39 = vpop.f32.mrf.mxu3 }
  0xaa   :  { %v2206_v43 = vpack.c.bf16 %v2149_v35, %v2149_v35  ;;  %v1399_v44 = vadd.f32 %v3346_v40, %v1398_v38  ;;  %v1954_v45 = vadd.f32 %v3346_v40, %v1953_v39  ;;  %v348_v46 = vpop.f32.mrf.mxu0  ;;  %v846_v47 = vpop.f32.mrf.mxu1 }
  0xab   :  { %v349_v50 = vadd.f32 %v3346_v40, %v348_v46  ;;  %v847_v51 = vadd.f32 %v3346_v40, %v846_v47 }
  0xac   :  { %2264 = vst.msk [vmem:[%s4152_s3 + $0x8] sm:$0xf] %vm2261_vm3, %v2206_v43  ;;  %v1538_v53 = vmax.f32 %v1399_v44, 0.0  ;;  %v2093_v55 = vmax.f32 %v1954_v45, 0.0 }
  0xad   :  { %2454 = vmatmul.msk.bf16.gmra.mxu0 %vm234_vm2, %v3079_v41  ;;  %2652 = vmatmul.msk.bf16.gmra.mxu1 %vm234_vm2, %v3107_v42  ;;  %v486_v56 = vmax.f32 %v349_v50, 0.0  ;;  %v984_v57 = vmax.f32 %v847_v51, 0.0  ;;  %v3081_v50 = vld [vmem:[%s4151_s0 + $0x60] sm:$0xff] }
  0xae   :  { %v1595_v54 = vmax.f32 %v1040_v52, %v1538_v53  ;;  %2850 = vmatmul.msk.bf16.gmra.mxu2 %vm234_vm2, %v3135_v48  ;;  %3048 = vmatmul.msk.bf16.gmra.mxu3 %vm234_vm2, %v3163_v49  ;;  %v3109_v51 = vld [vmem:[%s4151_s0 + $0x144] sm:$0xff] }
  0xaf   :  { %v1041_v62 = vmax.f32 %v486_v56, %v984_v57  ;;  %v3137_v57 = vld [vmem:[%s4151_s0 + $0x228] sm:$0xff] }
  0xb0   :  { %v2150_v58 = vmax.f32 %v1595_v54, %v2093_v55 }
  0xb1   :  { %v1401_v59 = vpop.f32.mrf.mxu2  ;;  %v1956_v60 = vpop.f32.mrf.mxu3 }
  0xb2   :  { %v2207_v61 = vpack.c.bf16 %v2150_v58, %v2150_v58  ;;  %v1402_v63 = vadd.f32 %v3346_v40, %v1401_v59  ;;  %v1957_v0 = vadd.f32 %v3346_v40, %v1956_v60  ;;  %v350_v1 = vpop.f32.mrf.mxu0  ;;  %v848_v2 = vpop.f32.mrf.mxu1  ;;  %v3165_v58 = vld [vmem:[%s4151_s0 + $0x30c] sm:$0xff] }
  0xb3   :  { %v351_v5 = vadd.f32 %v3346_v40, %v350_v1  ;;  %v849_v6 = vadd.f32 %v3346_v40, %v848_v2 }
  0xb4   :  { %2265 = vst.msk [vmem:[%s4152_s3 + $0xc] sm:$0xf] %vm2261_vm3, %v2207_v61  ;;  %v1539_v3 = vmax.f32 %v1402_v63, 0.0  ;;  %v2094_v4 = vmax.f32 %v1957_v0, 0.0 }
  0xb5   :  { %v487_v9 = vmax.f32 %v351_v5, 0.0  ;;  %v985_v10 = vmax.f32 %v849_v6, 0.0 }
  0xb6   :  { %v1596_v7 = vmax.f32 %v1041_v62, %v1539_v3 }
  0xb7   :  { %v1042_v24 = vmax.f32 %v487_v9, %v985_v10 }
  0xb8   :  { %v2151_v8 = vmax.f32 %v1596_v7, %v2094_v4 }
  0xb9   :  { %v1403_v11 = vpop.f32.mrf.mxu2  ;;  %v1958_v12 = vpop.f32.mrf.mxu3 }
  0xba   :  { %v2208_v15 = vpack.c.bf16 %v2151_v8, %v2151_v8  ;;  %v1404_v16 = vadd.f32 %v3346_v40, %v1403_v11  ;;  %v1959_v17 = vadd.f32 %v3346_v40, %v1958_v12  ;;  %v353_v18 = vpop.f32.mrf.mxu0  ;;  %v851_v19 = vpop.f32.mrf.mxu1 }
  0xbb   :  { %v354_v22 = vadd.f32 %v3346_v40, %v353_v18  ;;  %v852_v23 = vadd.f32 %v3346_v40, %v851_v19 }
  0xbc   :  { %2266 = vst.msk [vmem:[%s4152_s3 + $0x10] sm:$0xf] %vm2261_vm3, %v2208_v15  ;;  %v1540_v25 = vmax.f32 %v1404_v16, 0.0  ;;  %v2095_v27 = vmax.f32 %v1959_v17, 0.0 }
  0xbd   :  { %2455 = vmatmul.msk.bf16.gmra.mxu0 %vm234_vm2, %v3080_v13  ;;  %2653 = vmatmul.msk.bf16.gmra.mxu1 %vm234_vm2, %v3108_v14  ;;  %v488_v28 = vmax.f32 %v354_v22, 0.0  ;;  %v986_v29 = vmax.f32 %v852_v23, 0.0  ;;  %v3082_v22 = vld [vmem:[%s4151_s0 + $0x68] sm:$0xff] }
  0xbe   :  { %v1597_v26 = vmax.f32 %v1042_v24, %v1540_v25  ;;  %2851 = vmatmul.msk.bf16.gmra.mxu2 %vm234_vm2, %v3136_v20  ;;  %3049 = vmatmul.msk.bf16.gmra.mxu3 %vm234_vm2, %v3164_v21  ;;  %v3110_v23 = vld [vmem:[%s4151_s0 + $0x14c] sm:$0xff] }
  0xbf   :  { %v1043_v34 = vmax.f32 %v488_v28, %v986_v29  ;;  %v3138_v29 = vld [vmem:[%s4151_s0 + $0x230] sm:$0xff] }
  0xc0   :  { %v2152_v30 = vmax.f32 %v1597_v26, %v2095_v27 }
  0xc1   :  { %v1406_v31 = vpop.f32.mrf.mxu2  ;;  %v1961_v32 = vpop.f32.mrf.mxu3 }
  0xc2   :  { %v2209_v33 = vpack.c.bf16 %v2152_v30, %v2152_v30  ;;  %v1407_v35 = vadd.f32 %v3346_v40, %v1406_v31  ;;  %v1962_v36 = vadd.f32 %v3346_v40, %v1961_v32  ;;  %v355_v37 = vpop.f32.mrf.mxu0  ;;  %v853_v38 = vpop.f32.mrf.mxu1  ;;  %v3166_v30 = vld [vmem:[%s4151_s0 + $0x314] sm:$0xff] }
  0xc3   :  { %v356_v42 = vadd.f32 %v3346_v40, %v355_v37  ;;  %v854_v43 = vadd.f32 %v3346_v40, %v853_v38 }
  0xc4   :  { %2267 = vst.msk [vmem:[%s4152_s3 + $0x14] sm:$0xf] %vm2261_vm3, %v2209_v33  ;;  %v1541_v39 = vmax.f32 %v1407_v35, 0.0  ;;  %v2096_v41 = vmax.f32 %v1962_v36, 0.0 }
  0xc5   :  { %v489_v46 = vmax.f32 %v356_v42, 0.0  ;;  %v987_v47 = vmax.f32 %v854_v43, 0.0 }
  0xc6   :  { %v1598_v44 = vmax.f32 %v1043_v34, %v1541_v39 }
  0xc7   :  { %v1044_v61 = vmax.f32 %v489_v46, %v987_v47 }
  0xc8   :  { %v2153_v45 = vmax.f32 %v1598_v44, %v2096_v41 }
  0xc9   :  { %v1408_v48 = vpop.f32.mrf.mxu2  ;;  %v1963_v49 = vpop.f32.mrf.mxu3 }
  0xca   :  { %v2210_v52 = vpack.c.bf16 %v2153_v45, %v2153_v45  ;;  %v1409_v53 = vadd.f32 %v3346_v40, %v1408_v48  ;;  %v1964_v54 = vadd.f32 %v3346_v40, %v1963_v49  ;;  %v358_v55 = vpop.f32.mrf.mxu0  ;;  %v856_v56 = vpop.f32.mrf.mxu1 }
  0xcb   :  { %v359_v59 = vadd.f32 %v3346_v40, %v358_v55  ;;  %v857_v60 = vadd.f32 %v3346_v40, %v856_v56 }
  0xcc   :  { %2268 = vst.msk [vmem:[%s4152_s3 + $0x18] sm:$0xf] %vm2261_vm3, %v2210_v52  ;;  %v1542_v62 = vmax.f32 %v1409_v53, 0.0  ;;  %v2097_v0 = vmax.f32 %v1964_v54, 0.0 }
  0xcd   :  { %2456 = vmatmul.msk.bf16.gmra.mxu0 %vm234_vm2, %v3081_v50  ;;  %2654 = vmatmul.msk.bf16.gmra.mxu1 %vm234_vm2, %v3109_v51  ;;  %v490_v1 = vmax.f32 %v359_v59, 0.0  ;;  %v988_v2 = vmax.f32 %v857_v60, 0.0  ;;  %v3083_v59 = vld [vmem:[%s4151_s0 + $0x70] sm:$0xff] }
  0xce   :  { %v1599_v63 = vmax.f32 %v1044_v61, %v1542_v62  ;;  %2852 = vmatmul.msk.bf16.gmra.mxu2 %vm234_vm2, %v3137_v57  ;;  %3050 = vmatmul.msk.bf16.gmra.mxu3 %vm234_vm2, %v3165_v58  ;;  %v3111_v60 = vld [vmem:[%s4151_s0 + $0x154] sm:$0xff] }
  0xcf   :  { %v1045_v7 = vmax.f32 %v490_v1, %v988_v2  ;;  %v3139_v2 = vld [vmem:[%s4151_s0 + $0x238] sm:$0xff] }
  0xd0   :  { %v2154_v3 = vmax.f32 %v1599_v63, %v2097_v0 }
  0xd1   :  { %v1411_v4 = vpop.f32.mrf.mxu2  ;;  %v1966_v5 = vpop.f32.mrf.mxu3 }
  0xd2   :  { %v2211_v6 = vpack.c.bf16 %v2154_v3, %v2154_v3  ;;  %v1412_v8 = vadd.f32 %v3346_v40, %v1411_v4  ;;  %v1967_v9 = vadd.f32 %v3346_v40, %v1966_v5  ;;  %v360_v10 = vpop.f32.mrf.mxu0  ;;  %v858_v11 = vpop.f32.mrf.mxu1  ;;  %v3167_v3 = vld [vmem:[%s4151_s0 + $0x31c] sm:$0xff] }
  0xd3   :  { %v361_v14 = vadd.f32 %v3346_v40, %v360_v10  ;;  %v859_v15 = vadd.f32 %v3346_v40, %v858_v11 }
  0xd4   :  { %2269 = vst.msk [vmem:[%s4152_s3 + $0x1c] sm:$0xf] %vm2261_vm3, %v2211_v6  ;;  %v1543_v12 = vmax.f32 %v1412_v8, 0.0  ;;  %v2098_v13 = vmax.f32 %v1967_v9, 0.0 }
  0xd5   :  { %v491_v18 = vmax.f32 %v361_v14, 0.0  ;;  %v989_v19 = vmax.f32 %v859_v15, 0.0 }
  0xd6   :  { %v1600_v16 = vmax.f32 %v1045_v7, %v1543_v12 }
  0xd7   :  { %v1046_v33 = vmax.f32 %v491_v18, %v989_v19 }
  0xd8   :  { %v2155_v17 = vmax.f32 %v1600_v16, %v2098_v13 }
  0xd9   :  { %v1413_v20 = vpop.f32.mrf.mxu2  ;;  %v1968_v21 = vpop.f32.mrf.mxu3 }
  0xda   :  { %v2212_v24 = vpack.c.bf16 %v2155_v17, %v2155_v17  ;;  %v1414_v25 = vadd.f32 %v3346_v40, %v1413_v20  ;;  %v1969_v26 = vadd.f32 %v3346_v40, %v1968_v21  ;;  %v363_v27 = vpop.f32.mrf.mxu0  ;;  %v861_v28 = vpop.f32.mrf.mxu1 }
  0xdb   :  { %v364_v31 = vadd.f32 %v3346_v40, %v363_v27  ;;  %v862_v32 = vadd.f32 %v3346_v40, %v861_v28 }
  0xdc   :  { %2270 = vst.msk [vmem:[%s4152_s3 + $0x20] sm:$0xf] %vm2261_vm3, %v2212_v24  ;;  %v1544_v34 = vmax.f32 %v1414_v25, 0.0  ;;  %v2099_v36 = vmax.f32 %v1969_v26, 0.0 }
  0xdd   :  { %2457 = vmatmul.msk.bf16.gmra.mxu0 %vm234_vm2, %v3082_v22  ;;  %2655 = vmatmul.msk.bf16.gmra.mxu1 %vm234_vm2, %v3110_v23  ;;  %v492_v37 = vmax.f32 %v364_v31, 0.0  ;;  %v990_v38 = vmax.f32 %v862_v32, 0.0  ;;  %v3084_v31 = vld [vmem:[%s4151_s0 + $0x78] sm:$0xff] }
  0xde   :  { %v1601_v35 = vmax.f32 %v1046_v33, %v1544_v34  ;;  %2853 = vmatmul.msk.bf16.gmra.mxu2 %vm234_vm2, %v3138_v29  ;;  %3051 = vmatmul.msk.bf16.gmra.mxu3 %vm234_vm2, %v3166_v30  ;;  %v3112_v32 = vld [vmem:[%s4151_s0 + $0x15c] sm:$0xff] }
  0xdf   :  { %v1047_v44 = vmax.f32 %v492_v37, %v990_v38  ;;  %v3140_v38 = vld [vmem:[%s4151_s0 + $0x240] sm:$0xff] }
  0xe0   :  { %v2156_v39 = vmax.f32 %v1601_v35, %v2099_v36 }
  0xe1   :  { %v1416_v41 = vpop.f32.mrf.mxu2  ;;  %v1971_v42 = vpop.f32.mrf.mxu3 }
  0xe2   :  { %v2213_v43 = vpack.c.bf16 %v2156_v39, %v2156_v39  ;;  %v1417_v45 = vadd.f32 %v3346_v40, %v1416_v41  ;;  %v1972_v46 = vadd.f32 %v3346_v40, %v1971_v42  ;;  %v365_v47 = vpop.f32.mrf.mxu0  ;;  %v863_v48 = vpop.f32.mrf.mxu1  ;;  %v3168_v39 = vld [vmem:[%s4151_s0 + $0x324] sm:$0xff] }
  0xe3   :  { %v366_v51 = vadd.f32 %v3346_v40, %v365_v47  ;;  %v864_v52 = vadd.f32 %v3346_v40, %v863_v48 }
  0xe4   :  { %2271 = vst.msk [vmem:[%s4152_s3 + $0x24] sm:$0xf] %vm2261_vm3, %v2213_v43  ;;  %v1545_v49 = vmax.f32 %v1417_v45, 0.0  ;;  %v2100_v50 = vmax.f32 %v1972_v46, 0.0 }
  0xe5   :  { %v493_v55 = vmax.f32 %v366_v51, 0.0  ;;  %v991_v56 = vmax.f32 %v864_v52, 0.0 }
  0xe6   :  { %v1602_v53 = vmax.f32 %v1047_v44, %v1545_v49 }
  0xe7   :  { %v1048_v6 = vmax.f32 %v493_v55, %v991_v56 }
  0xe8   :  { %v2157_v54 = vmax.f32 %v1602_v53, %v2100_v50 }
  0xe9   :  { %v1418_v57 = vpop.f32.mrf.mxu2  ;;  %v1973_v58 = vpop.f32.mrf.mxu3 }
  0xea   :  { %v2214_v61 = vpack.c.bf16 %v2157_v54, %v2157_v54  ;;  %v1419_v62 = vadd.f32 %v3346_v40, %v1418_v57  ;;  %v1974_v63 = vadd.f32 %v3346_v40, %v1973_v58  ;;  %v368_v0 = vpop.f32.mrf.mxu0  ;;  %v866_v1 = vpop.f32.mrf.mxu1 }
  0xeb   :  { %v369_v4 = vadd.f32 %v3346_v40, %v368_v0  ;;  %v867_v5 = vadd.f32 %v3346_v40, %v866_v1 }
  0xec   :  { %2272 = vst.msk [vmem:[%s4152_s3 + $0x28] sm:$0xf] %vm2261_vm3, %v2214_v61  ;;  %v1546_v7 = vmax.f32 %v1419_v62, 0.0  ;;  %v2101_v9 = vmax.f32 %v1974_v63, 0.0 }
  0xed   :  { %2458 = vmatmul.msk.bf16.gmra.mxu0 %vm234_vm2, %v3083_v59  ;;  %2656 = vmatmul.msk.bf16.gmra.mxu1 %vm234_vm2, %v3111_v60  ;;  %v494_v10 = vmax.f32 %v369_v4, 0.0  ;;  %v992_v11 = vmax.f32 %v867_v5, 0.0  ;;  %v3085_v4 = vld [vmem:[%s4151_s0 + $0x80] sm:$0xff] }
  0xee   :  { %v1603_v8 = vmax.f32 %v1048_v6, %v1546_v7  ;;  %2854 = vmatmul.msk.bf16.gmra.mxu2 %vm234_vm2, %v3139_v2  ;;  %3052 = vmatmul.msk.bf16.gmra.mxu3 %vm234_vm2, %v3167_v3  ;;  %v3113_v5 = vld [vmem:[%s4151_s0 + $0x164] sm:$0xff] }
  0xef   :  { %v1049_v16 = vmax.f32 %v494_v10, %v992_v11  ;;  %v3141_v11 = vld [vmem:[%s4151_s0 + $0x248] sm:$0xff] }
  0xf0   :  { %v2158_v12 = vmax.f32 %v1603_v8, %v2101_v9 }
  0xf1   :  { %v1421_v13 = vpop.f32.mrf.mxu2  ;;  %v1976_v14 = vpop.f32.mrf.mxu3 }
  0xf2   :  { %v2215_v15 = vpack.c.bf16 %v2158_v12, %v2158_v12  ;;  %v1422_v17 = vadd.f32 %v3346_v40, %v1421_v13  ;;  %v1977_v18 = vadd.f32 %v3346_v40, %v1976_v14  ;;  %v370_v19 = vpop.f32.mrf.mxu0  ;;  %v868_v20 = vpop.f32.mrf.mxu1  ;;  %v3169_v12 = vld [vmem:[%s4151_s0 + $0x32c] sm:$0xff] }
  0xf3   :  { %v371_v23 = vadd.f32 %v3346_v40, %v370_v19  ;;  %v869_v24 = vadd.f32 %v3346_v40, %v868_v20 }
  0xf4   :  { %2273 = vst.msk [vmem:[%s4152_s3 + $0x2c] sm:$0xf] %vm2261_vm3, %v2215_v15  ;;  %v1547_v21 = vmax.f32 %v1422_v17, 0.0  ;;  %v2102_v22 = vmax.f32 %v1977_v18, 0.0 }
  0xf5   :  { %v495_v27 = vmax.f32 %v371_v23, 0.0  ;;  %v993_v28 = vmax.f32 %v869_v24, 0.0 }
  0xf6   :  { %v1604_v25 = vmax.f32 %v1049_v16, %v1547_v21 }
  0xf7   :  { %v1050_v43 = vmax.f32 %v495_v27, %v993_v28 }
  0xf8   :  { %v2159_v26 = vmax.f32 %v1604_v25, %v2102_v22 }
  0xf9   :  { %v1423_v29 = vpop.f32.mrf.mxu2  ;;  %v1978_v30 = vpop.f32.mrf.mxu3 }
  0xfa   :  { %v2216_v33 = vpack.c.bf16 %v2159_v26, %v2159_v26  ;;  %v1424_v34 = vadd.f32 %v3346_v40, %v1423_v29  ;;  %v1979_v35 = vadd.f32 %v3346_v40, %v1978_v30  ;;  %v373_v36 = vpop.f32.mrf.mxu0  ;;  %v871_v37 = vpop.f32.mrf.mxu1 }
  0xfb   :  { %v374_v41 = vadd.f32 %v3346_v40, %v373_v36  ;;  %v872_v42 = vadd.f32 %v3346_v40, %v871_v37 }
  0xfc   :  { %2274 = vst.msk [vmem:[%s4152_s3 + $0x30] sm:$0xf] %vm2261_vm3, %v2216_v33  ;;  %v1548_v44 = vmax.f32 %v1424_v34, 0.0  ;;  %v2103_v46 = vmax.f32 %v1979_v35, 0.0 }
  0xfd   :  { %2459 = vmatmul.msk.bf16.gmra.mxu0 %vm234_vm2, %v3084_v31  ;;  %2657 = vmatmul.msk.bf16.gmra.mxu1 %vm234_vm2, %v3112_v32  ;;  %v496_v47 = vmax.f32 %v374_v41, 0.0  ;;  %v994_v48 = vmax.f32 %v872_v42, 0.0  ;;  %v3086_v41 = vld [vmem:[%s4151_s0 + $0x88] sm:$0xff] }
  0xfe   :  { %v1605_v45 = vmax.f32 %v1050_v43, %v1548_v44  ;;  %2855 = vmatmul.msk.bf16.gmra.mxu2 %vm234_vm2, %v3140_v38  ;;  %3053 = vmatmul.msk.bf16.gmra.mxu3 %vm234_vm2, %v3168_v39  ;;  %v3114_v42 = vld [vmem:[%s4151_s0 + $0x16c] sm:$0xff] }
  0xff   :  { %v1051_v53 = vmax.f32 %v496_v47, %v994_v48  ;;  %v3142_v48 = vld [vmem:[%s4151_s0 + $0x250] sm:$0xff] }
 0x100   :  { %v2160_v49 = vmax.f32 %v1605_v45, %v2103_v46 }
 0x101   :  { %v1426_v50 = vpop.f32.mrf.mxu2  ;;  %v1981_v51 = vpop.f32.mrf.mxu3 }
 0x102   :  { %v2217_v52 = vpack.c.bf16 %v2160_v49, %v2160_v49  ;;  %v1427_v54 = vadd.f32 %v3346_v40, %v1426_v50  ;;  %v1982_v55 = vadd.f32 %v3346_v40, %v1981_v51  ;;  %v375_v56 = vpop.f32.mrf.mxu0  ;;  %v873_v57 = vpop.f32.mrf.mxu1  ;;  %v3170_v49 = vld [vmem:[%s4151_s0 + $0x334] sm:$0xff] }
 0x103   :  { %v376_v60 = vadd.f32 %v3346_v40, %v375_v56  ;;  %v874_v61 = vadd.f32 %v3346_v40, %v873_v57 }
 0x104   :  { %2275 = vst.msk [vmem:[%s4152_s3 + $0x34] sm:$0xf] %vm2261_vm3, %v2217_v52  ;;  %v1549_v58 = vmax.f32 %v1427_v54, 0.0  ;;  %v2104_v59 = vmax.f32 %v1982_v55, 0.0 }
 0x105   :  { %v497_v0 = vmax.f32 %v376_v60, 0.0  ;;  %v995_v1 = vmax.f32 %v874_v61, 0.0 }
 0x106   :  { %v1606_v62 = vmax.f32 %v1051_v53, %v1549_v58 }
 0x107   :  { %v1052_v15 = vmax.f32 %v497_v0, %v995_v1 }
 0x108   :  { %v2161_v63 = vmax.f32 %v1606_v62, %v2104_v59 }
 0x109   :  { %v1428_v2 = vpop.f32.mrf.mxu2  ;;  %v1983_v3 = vpop.f32.mrf.mxu3 }
 0x10a   :  { %v2218_v6 = vpack.c.bf16 %v2161_v63, %v2161_v63  ;;  %v1429_v7 = vadd.f32 %v3346_v40, %v1428_v2  ;;  %v1984_v8 = vadd.f32 %v3346_v40, %v1983_v3  ;;  %v378_v9 = vpop.f32.mrf.mxu0  ;;  %v876_v10 = vpop.f32.mrf.mxu1 }
 0x10b   :  { %v379_v13 = vadd.f32 %v3346_v40, %v378_v9  ;;  %v877_v14 = vadd.f32 %v3346_v40, %v876_v10 }
 0x10c   :  { %2276 = vst.msk [vmem:[%s4152_s3 + $0x38] sm:$0xf] %vm2261_vm3, %v2218_v6  ;;  %v1550_v16 = vmax.f32 %v1429_v7, 0.0  ;;  %v2105_v18 = vmax.f32 %v1984_v8, 0.0 }
 0x10d   :  { %2460 = vmatmul.msk.bf16.gmra.mxu0 %vm234_vm2, %v3085_v4  ;;  %2658 = vmatmul.msk.bf16.gmra.mxu1 %vm234_vm2, %v3113_v5  ;;  %v498_v19 = vmax.f32 %v379_v13, 0.0  ;;  %v996_v20 = vmax.f32 %v877_v14, 0.0  ;;  %v3087_v13 = vld [vmem:[%s4151_s0 + $0x90] sm:$0xff] }
 0x10e   :  { %v1607_v17 = vmax.f32 %v1052_v15, %v1550_v16  ;;  %2856 = vmatmul.msk.bf16.gmra.mxu2 %vm234_vm2, %v3141_v11  ;;  %3054 = vmatmul.msk.bf16.gmra.mxu3 %vm234_vm2, %v3169_v12  ;;  %v3115_v14 = vld [vmem:[%s4151_s0 + $0x174] sm:$0xff] }
 0x10f   :  { %v1053_v25 = vmax.f32 %v498_v19, %v996_v20  ;;  %v3143_v20 = vld [vmem:[%s4151_s0 + $0x258] sm:$0xff] }
 0x110   :  { %v2162_v21 = vmax.f32 %v1607_v17, %v2105_v18 }
 0x111   :  { %v1431_v22 = vpop.f32.mrf.mxu2  ;;  %v1986_v23 = vpop.f32.mrf.mxu3 }
 0x112   :  { %v2219_v24 = vpack.c.bf16 %v2162_v21, %v2162_v21  ;;  %v1432_v26 = vadd.f32 %v3346_v40, %v1431_v22  ;;  %v1987_v27 = vadd.f32 %v3346_v40, %v1986_v23  ;;  %v380_v28 = vpop.f32.mrf.mxu0  ;;  %v878_v29 = vpop.f32.mrf.mxu1  ;;  %v3171_v21 = vld [vmem:[%s4151_s0 + $0x33c] sm:$0xff] }
 0x113   :  { %v381_v32 = vadd.f32 %v3346_v40, %v380_v28  ;;  %v879_v33 = vadd.f32 %v3346_v40, %v878_v29 }
 0x114   :  { %2277 = vst.msk [vmem:[%s4152_s3 + $0x3c] sm:$0xf] %vm2261_vm3, %v2219_v24  ;;  %v1551_v30 = vmax.f32 %v1432_v26, 0.0  ;;  %v2106_v31 = vmax.f32 %v1987_v27, 0.0 }
 0x115   :  { %v499_v36 = vmax.f32 %v381_v32, 0.0  ;;  %v997_v37 = vmax.f32 %v879_v33, 0.0 }
 0x116   :  { %v1608_v34 = vmax.f32 %v1053_v25, %v1551_v30 }
 0x117   :  { %v1054_v52 = vmax.f32 %v499_v36, %v997_v37 }
 0x118   :  { %v2163_v35 = vmax.f32 %v1608_v34, %v2106_v31 }
 0x119   :  { %v1433_v38 = vpop.f32.mrf.mxu2  ;;  %v1988_v39 = vpop.f32.mrf.mxu3 }
 0x11a   :  { %v2220_v43 = vpack.c.bf16 %v2163_v35, %v2163_v35  ;;  %v1434_v44 = vadd.f32 %v3346_v40, %v1433_v38  ;;  %v1989_v45 = vadd.f32 %v3346_v40, %v1988_v39  ;;  %v383_v46 = vpop.f32.mrf.mxu0  ;;  %v881_v47 = vpop.f32.mrf.mxu1 }
 0x11b   :  { %v384_v50 = vadd.f32 %v3346_v40, %v383_v46  ;;  %v882_v51 = vadd.f32 %v3346_v40, %v881_v47 }
 0x11c   :  { %2278 = vst.msk [vmem:[%s4152_s3 + $0x40] sm:$0xf] %vm2261_vm3, %v2220_v43  ;;  %v1552_v53 = vmax.f32 %v1434_v44, 0.0  ;;  %v2107_v55 = vmax.f32 %v1989_v45, 0.0 }
 0x11d   :  { %2461 = vmatmul.msk.bf16.gmra.mxu0 %vm234_vm2, %v3086_v41  ;;  %2659 = vmatmul.msk.bf16.gmra.mxu1 %vm234_vm2, %v3114_v42  ;;  %v500_v56 = vmax.f32 %v384_v50, 0.0  ;;  %v998_v57 = vmax.f32 %v882_v51, 0.0  ;;  %v3088_v50 = vld [vmem:[%s4151_s0 + $0x98] sm:$0xff] }
 0x11e   :  { %v1609_v54 = vmax.f32 %v1054_v52, %v1552_v53  ;;  %2857 = vmatmul.msk.bf16.gmra.mxu2 %vm234_vm2, %v3142_v48  ;;  %3055 = vmatmul.msk.bf16.gmra.mxu3 %vm234_vm2, %v3170_v49  ;;  %v3116_v51 = vld [vmem:[%s4151_s0 + $0x17c] sm:$0xff] }
 0x11f   :  { %v1055_v62 = vmax.f32 %v500_v56, %v998_v57  ;;  %v3144_v57 = vld [vmem:[%s4151_s0 + $0x260] sm:$0xff] }
 0x120   :  { %v2164_v58 = vmax.f32 %v1609_v54, %v2107_v55 }
 0x121   :  { %v1436_v59 = vpop.f32.mrf.mxu2  ;;  %v1991_v60 = vpop.f32.mrf.mxu3 }
 0x122   :  { %v2221_v61 = vpack.c.bf16 %v2164_v58, %v2164_v58  ;;  %v1437_v63 = vadd.f32 %v3346_v40, %v1436_v59  ;;  %v1992_v0 = vadd.f32 %v3346_v40, %v1991_v60  ;;  %v385_v1 = vpop.f32.mrf.mxu0  ;;  %v883_v2 = vpop.f32.mrf.mxu1  ;;  %v3172_v58 = vld [vmem:[%s4151_s0 + $0x344] sm:$0xff] }
 0x123   :  { %v386_v5 = vadd.f32 %v3346_v40, %v385_v1  ;;  %v884_v6 = vadd.f32 %v3346_v40, %v883_v2 }
 0x124   :  { %2279 = vst.msk [vmem:[%s4152_s3 + $0x44] sm:$0xf] %vm2261_vm3, %v2221_v61  ;;  %v1553_v3 = vmax.f32 %v1437_v63, 0.0  ;;  %v2108_v4 = vmax.f32 %v1992_v0, 0.0 }
 0x125   :  { %v501_v9 = vmax.f32 %v386_v5, 0.0  ;;  %v999_v10 = vmax.f32 %v884_v6, 0.0 }
 0x126   :  { %v1610_v7 = vmax.f32 %v1055_v62, %v1553_v3 }
 0x127   :  { %v1056_v24 = vmax.f32 %v501_v9, %v999_v10 }
 0x128   :  { %v2165_v8 = vmax.f32 %v1610_v7, %v2108_v4 }
 0x129   :  { %v1438_v11 = vpop.f32.mrf.mxu2  ;;  %v1993_v12 = vpop.f32.mrf.mxu3 }
 0x12a   :  { %v2222_v15 = vpack.c.bf16 %v2165_v8, %v2165_v8  ;;  %v1439_v16 = vadd.f32 %v3346_v40, %v1438_v11  ;;  %v1994_v17 = vadd.f32 %v3346_v40, %v1993_v12  ;;  %v388_v18 = vpop.f32.mrf.mxu0  ;;  %v886_v19 = vpop.f32.mrf.mxu1 }
 0x12b   :  { %v389_v22 = vadd.f32 %v3346_v40, %v388_v18  ;;  %v887_v23 = vadd.f32 %v3346_v40, %v886_v19 }
 0x12c   :  { %2280 = vst.msk [vmem:[%s4152_s3 + $0x48] sm:$0xf] %vm2261_vm3, %v2222_v15  ;;  %v1554_v25 = vmax.f32 %v1439_v16, 0.0  ;;  %v2109_v27 = vmax.f32 %v1994_v17, 0.0 }
 0x12d   :  { %2462 = vmatmul.msk.bf16.gmra.mxu0 %vm234_vm2, %v3087_v13  ;;  %2660 = vmatmul.msk.bf16.gmra.mxu1 %vm234_vm2, %v3115_v14  ;;  %v502_v28 = vmax.f32 %v389_v22, 0.0  ;;  %v1000_v29 = vmax.f32 %v887_v23, 0.0  ;;  %v3089_v22 = vld [vmem:[%s4151_s0 + $0xa0] sm:$0xff] }
 0x12e   :  { %v1611_v26 = vmax.f32 %v1056_v24, %v1554_v25  ;;  %2858 = vmatmul.msk.bf16.gmra.mxu2 %vm234_vm2, %v3143_v20  ;;  %3056 = vmatmul.msk.bf16.gmra.mxu3 %vm234_vm2, %v3171_v21  ;;  %v3117_v23 = vld [vmem:[%s4151_s0 + $0x184] sm:$0xff] }
 0x12f   :  { %v1057_v34 = vmax.f32 %v502_v28, %v1000_v29  ;;  %v3145_v29 = vld [vmem:[%s4151_s0 + $0x268] sm:$0xff] }
 0x130   :  { %v2166_v30 = vmax.f32 %v1611_v26, %v2109_v27 }
 0x131   :  { %v1441_v31 = vpop.f32.mrf.mxu2  ;;  %v1996_v32 = vpop.f32.mrf.mxu3 }
 0x132   :  { %v2223_v33 = vpack.c.bf16 %v2166_v30, %v2166_v30  ;;  %v1442_v35 = vadd.f32 %v3346_v40, %v1441_v31  ;;  %v1997_v36 = vadd.f32 %v3346_v40, %v1996_v32  ;;  %v390_v37 = vpop.f32.mrf.mxu0  ;;  %v888_v38 = vpop.f32.mrf.mxu1  ;;  %v3173_v30 = vld [vmem:[%s4151_s0 + $0x34c] sm:$0xff] }
 0x133   :  { %v391_v42 = vadd.f32 %v3346_v40, %v390_v37  ;;  %v889_v43 = vadd.f32 %v3346_v40, %v888_v38 }
 0x134   :  { %2281 = vst.msk [vmem:[%s4152_s3 + $0x4c] sm:$0xf] %vm2261_vm3, %v2223_v33  ;;  %v1555_v39 = vmax.f32 %v1442_v35, 0.0  ;;  %v2110_v41 = vmax.f32 %v1997_v36, 0.0 }
 0x135   :  { %v503_v46 = vmax.f32 %v391_v42, 0.0  ;;  %v1001_v47 = vmax.f32 %v889_v43, 0.0 }
 0x136   :  { %v1612_v44 = vmax.f32 %v1057_v34, %v1555_v39 }
 0x137   :  { %v1058_v61 = vmax.f32 %v503_v46, %v1001_v47 }
 0x138   :  { %v2167_v45 = vmax.f32 %v1612_v44, %v2110_v41  ;;  %v3749_v44 = vld [vmem:[%s4150_s2] ss:$0 sm:$0xff] }
 0x139   :  { %v1443_v48 = vpop.f32.mrf.mxu2  ;;  %v1998_v49 = vpop.f32.mrf.mxu3 }
 0x13a   :  { %v2224_v52 = vpack.c.bf16 %v2167_v45, %v2167_v45  ;;  %v1444_v53 = vadd.f32 %v3346_v40, %v1443_v48  ;;  %v1999_v54 = vadd.f32 %v3346_v40, %v1998_v49  ;;  %v393_v55 = vpop.f32.mrf.mxu0  ;;  %v891_v56 = vpop.f32.mrf.mxu1 }
 0x13b   :  { %v394_v59 = vadd.f32 %v3346_v40, %v393_v55  ;;  %v892_v60 = vadd.f32 %v3346_v40, %v891_v56 }
 0x13c   :  { %2282 = vst.msk [vmem:[%s4152_s3 + $0x50] sm:$0xf] %vm2261_vm3, %v2224_v52  ;;  %v1556_v62 = vmax.f32 %v1444_v53, 0.0  ;;  %v2111_v0 = vmax.f32 %v1999_v54, 0.0 }
 0x13d   :  { %2463 = vmatmul.msk.bf16.gmra.mxu0 %vm234_vm2, %v3088_v50  ;;  %2661 = vmatmul.msk.bf16.gmra.mxu1 %vm234_vm2, %v3116_v51  ;;  %v504_v1 = vmax.f32 %v394_v59, 0.0  ;;  %v1002_v2 = vmax.f32 %v892_v60, 0.0  ;;  %v3090_v59 = vld [vmem:[%s4151_s0 + $0xa8] sm:$0xff] }
 0x13e   :  { %v1613_v63 = vmax.f32 %v1058_v61, %v1556_v62  ;;  %2859 = vmatmul.msk.bf16.gmra.mxu2 %vm234_vm2, %v3144_v57  ;;  %3057 = vmatmul.msk.bf16.gmra.mxu3 %vm234_vm2, %v3172_v58  ;;  %v3118_v60 = vld [vmem:[%s4151_s0 + $0x18c] sm:$0xff] }
 0x13f   :  { %v1059_v7 = vmax.f32 %v504_v1, %v1002_v2  ;;  %v3146_v2 = vld [vmem:[%s4151_s0 + $0x270] sm:$0xff] }
 0x140   :  { %v2168_v3 = vmax.f32 %v1613_v63, %v2111_v0 }
 0x141   :  { %v1446_v4 = vpop.f32.mrf.mxu2  ;;  %v2001_v5 = vpop.f32.mrf.mxu3 }
 0x142   :  { %v2225_v6 = vpack.c.bf16 %v2168_v3, %v2168_v3  ;;  %v1447_v8 = vadd.f32 %v3346_v40, %v1446_v4  ;;  %v2002_v9 = vadd.f32 %v3346_v40, %v2001_v5  ;;  %v395_v10 = vpop.f32.mrf.mxu0  ;;  %v893_v11 = vpop.f32.mrf.mxu1  ;;  %v3174_v3 = vld [vmem:[%s4151_s0 + $0x354] sm:$0xff] }
 0x143   :  { %v396_v14 = vadd.f32 %v3346_v40, %v395_v10  ;;  %v894_v15 = vadd.f32 %v3346_v40, %v893_v11 }
 0x144   :  { %2283 = vst.msk [vmem:[%s4152_s3 + $0x54] sm:$0xf] %vm2261_vm3, %v2225_v6  ;;  %v1557_v12 = vmax.f32 %v1447_v8, 0.0  ;;  %v2112_v13 = vmax.f32 %v2002_v9, 0.0 }
 0x145   :  { %v505_v18 = vmax.f32 %v396_v14, 0.0  ;;  %v1003_v19 = vmax.f32 %v894_v15, 0.0 }
 0x146   :  { %v1614_v16 = vmax.f32 %v1059_v7, %v1557_v12 }
 0x147   :  { %v1060_v33 = vmax.f32 %v505_v18, %v1003_v19 }
 0x148   :  { %v2169_v17 = vmax.f32 %v1614_v16, %v2112_v13 }
 0x149   :  { %v1448_v20 = vpop.f32.mrf.mxu2  ;;  %v2003_v21 = vpop.f32.mrf.mxu3 }
 0x14a   :  { %v2226_v24 = vpack.c.bf16 %v2169_v17, %v2169_v17  ;;  %v1449_v25 = vadd.f32 %v3346_v40, %v1448_v20  ;;  %v2004_v26 = vadd.f32 %v3346_v40, %v2003_v21  ;;  %v398_v27 = vpop.f32.mrf.mxu0  ;;  %v896_v28 = vpop.f32.mrf.mxu1 }
 0x14b   :  { %v399_v31 = vadd.f32 %v3346_v40, %v398_v27  ;;  %v897_v32 = vadd.f32 %v3346_v40, %v896_v28 }
 0x14c   :  { %2284 = vst.msk [vmem:[%s4152_s3 + $0x58] sm:$0xf] %vm2261_vm3, %v2226_v24  ;;  %v1558_v34 = vmax.f32 %v1449_v25, 0.0  ;;  %v2113_v36 = vmax.f32 %v2004_v26, 0.0 }
 0x14d   :  { %2464 = vmatmul.msk.bf16.gmra.mxu0 %vm234_vm2, %v3089_v22  ;;  %2662 = vmatmul.msk.bf16.gmra.mxu1 %vm234_vm2, %v3117_v23  ;;  %v506_v37 = vmax.f32 %v399_v31, 0.0  ;;  %v1004_v38 = vmax.f32 %v897_v32, 0.0  ;;  %v3091_v31 = vld [vmem:[%s4151_s0 + $0xb0] sm:$0xff] }
 0x14e   :  { %v1615_v35 = vmax.f32 %v1060_v33, %v1558_v34  ;;  %2860 = vmatmul.msk.bf16.gmra.mxu2 %vm234_vm2, %v3145_v29  ;;  %3058 = vmatmul.msk.bf16.gmra.mxu3 %vm234_vm2, %v3173_v30  ;;  %v3119_v32 = vld [vmem:[%s4151_s0 + $0x194] sm:$0xff] }
 0x14f   :  { %v1061_v43 = vmax.f32 %v506_v37, %v1004_v38  ;;  %v3147_v38 = vld [vmem:[%s4151_s0 + $0x278] sm:$0xff] }
 0x150   :  { %v2170_v40 = vmax.f32 %v1615_v35, %v2113_v36 }
 0x151   :  { %v1451_v39 = vpop.f32.mrf.mxu2  ;;  %v2006_v41 = vpop.f32.mrf.mxu3 }
 0x152   :  { %v2227_v42 = vpack.c.bf16 %v2170_v40, %v2170_v40  ;;  %v1452_v45 = vadd.f32 %v3749_v44, %v1451_v39  ;;  %v2007_v46 = vadd.f32 %v3749_v44, %v2006_v41  ;;  %v400_v47 = vpop.f32.mrf.mxu0  ;;  %v898_v48 = vpop.f32.mrf.mxu1  ;;  %v3175_v40 = vld [vmem:[%s4151_s0 + $0x35c] sm:$0xff] }
 0x153   :  { %v401_v51 = vadd.f32 %v3749_v44, %v400_v47  ;;  %v899_v52 = vadd.f32 %v3749_v44, %v898_v48 }
 0x154   :  { %2285 = vst.msk [vmem:[%s4152_s3 + $0x5c] sm:$0xf] %vm2261_vm3, %v2227_v42  ;;  %v1559_v49 = vmax.f32 %v1452_v45, 0.0  ;;  %v2114_v50 = vmax.f32 %v2007_v46, 0.0 }
 0x155   :  { %v507_v55 = vmax.f32 %v401_v51, 0.0  ;;  %v1005_v56 = vmax.f32 %v899_v52, 0.0 }
 0x156   :  { %v1616_v53 = vmax.f32 %v1061_v43, %v1559_v49 }
 0x157   :  { %v1062_v6 = vmax.f32 %v507_v55, %v1005_v56 }
 0x158   :  { %v2171_v54 = vmax.f32 %v1616_v53, %v2114_v50 }
 0x159   :  { %v1453_v57 = vpop.f32.mrf.mxu2  ;;  %v2008_v58 = vpop.f32.mrf.mxu3 }
 0x15a   :  { %v2228_v61 = vpack.c.bf16 %v2171_v54, %v2171_v54  ;;  %v1454_v62 = vadd.f32 %v3749_v44, %v1453_v57  ;;  %v2009_v63 = vadd.f32 %v3749_v44, %v2008_v58  ;;  %v403_v0 = vpop.f32.mrf.mxu0  ;;  %v901_v1 = vpop.f32.mrf.mxu1 }
 0x15b   :  { %v404_v4 = vadd.f32 %v3749_v44, %v403_v0  ;;  %v902_v5 = vadd.f32 %v3749_v44, %v901_v1 }
 0x15c   :  { %2286 = vst.msk [vmem:[%s4152_s3 + $0x60] sm:$0xf] %vm2261_vm3, %v2228_v61  ;;  %v1560_v7 = vmax.f32 %v1454_v62, 0.0  ;;  %v2115_v9 = vmax.f32 %v2009_v63, 0.0 }
 0x15d   :  { %2465 = vmatmul.msk.bf16.gmra.mxu0 %vm234_vm2, %v3090_v59  ;;  %2663 = vmatmul.msk.bf16.gmra.mxu1 %vm234_vm2, %v3118_v60  ;;  %v508_v10 = vmax.f32 %v404_v4, 0.0  ;;  %v1006_v11 = vmax.f32 %v902_v5, 0.0  ;;  %v3092_v4 = vld [vmem:[%s4151_s0 + $0xb8] sm:$0xff] }
 0x15e   :  { %v1617_v8 = vmax.f32 %v1062_v6, %v1560_v7  ;;  %2861 = vmatmul.msk.bf16.gmra.mxu2 %vm234_vm2, %v3146_v2  ;;  %3059 = vmatmul.msk.bf16.gmra.mxu3 %vm234_vm2, %v3174_v3  ;;  %v3120_v5 = vld [vmem:[%s4151_s0 + $0x19c] sm:$0xff] }
 0x15f   :  { %v1063_v16 = vmax.f32 %v508_v10, %v1006_v11  ;;  %v3148_v11 = vld [vmem:[%s4151_s0 + $0x280] sm:$0xff] }
 0x160   :  { %v2172_v12 = vmax.f32 %v1617_v8, %v2115_v9 }
 0x161   :  { %v1456_v13 = vpop.f32.mrf.mxu2  ;;  %v2011_v14 = vpop.f32.mrf.mxu3 }
 0x162   :  { %v2229_v15 = vpack.c.bf16 %v2172_v12, %v2172_v12  ;;  %v1457_v17 = vadd.f32 %v3749_v44, %v1456_v13  ;;  %v2012_v18 = vadd.f32 %v3749_v44, %v2011_v14  ;;  %v405_v19 = vpop.f32.mrf.mxu0  ;;  %v903_v20 = vpop.f32.mrf.mxu1  ;;  %v3176_v12 = vld [vmem:[%s4151_s0 + $0x364] sm:$0xff] }
 0x163   :  { %v406_v23 = vadd.f32 %v3749_v44, %v405_v19  ;;  %v904_v24 = vadd.f32 %v3749_v44, %v903_v20 }
 0x164   :  { %2287 = vst.msk [vmem:[%s4152_s3 + $0x64] sm:$0xf] %vm2261_vm3, %v2229_v15  ;;  %v1561_v21 = vmax.f32 %v1457_v17, 0.0  ;;  %v2116_v22 = vmax.f32 %v2012_v18, 0.0 }
 0x165   :  { %v509_v27 = vmax.f32 %v406_v23, 0.0  ;;  %v1007_v28 = vmax.f32 %v904_v24, 0.0 }
 0x166   :  { %v1618_v25 = vmax.f32 %v1063_v16, %v1561_v21 }
 0x167   :  { %v1064_v42 = vmax.f32 %v509_v27, %v1007_v28 }
 0x168   :  { %v2173_v26 = vmax.f32 %v1618_v25, %v2116_v22 }
 0x169   :  { %v1458_v29 = vpop.f32.mrf.mxu2  ;;  %v2013_v30 = vpop.f32.mrf.mxu3 }
 0x16a   :  { %v2230_v33 = vpack.c.bf16 %v2173_v26, %v2173_v26  ;;  %v1459_v34 = vadd.f32 %v3749_v44, %v1458_v29  ;;  %v2014_v35 = vadd.f32 %v3749_v44, %v2013_v30  ;;  %v408_v36 = vpop.f32.mrf.mxu0  ;;  %v906_v37 = vpop.f32.mrf.mxu1 }
 0x16b   :  { %v409_v39 = vadd.f32 %v3749_v44, %v408_v36  ;;  %v907_v41 = vadd.f32 %v3749_v44, %v906_v37 }
 0x16c   :  { %2288 = vst.msk [vmem:[%s4152_s3 + $0x68] sm:$0xf] %vm2261_vm3, %v2230_v33  ;;  %v1562_v43 = vmax.f32 %v1459_v34, 0.0  ;;  %v2117_v46 = vmax.f32 %v2014_v35, 0.0 }
 0x16d   :  { %2466 = vmatmul.msk.bf16.gmra.mxu0 %vm234_vm2, %v3091_v31  ;;  %2664 = vmatmul.msk.bf16.gmra.mxu1 %vm234_vm2, %v3119_v32  ;;  %v510_v47 = vmax.f32 %v409_v39, 0.0  ;;  %v1008_v48 = vmax.f32 %v907_v41, 0.0  ;;  %v3093_v39 = vld [vmem:[%s4151_s0 + $0xc0] sm:$0xff] }
 0x16e   :  { %v1619_v45 = vmax.f32 %v1064_v42, %v1562_v43  ;;  %2862 = vmatmul.msk.bf16.gmra.mxu2 %vm234_vm2, %v3147_v38  ;;  %3060 = vmatmul.msk.bf16.gmra.mxu3 %vm234_vm2, %v3175_v40  ;;  %v3121_v41 = vld [vmem:[%s4151_s0 + $0x1a4] sm:$0xff] }
 0x16f   :  { %v1065_v53 = vmax.f32 %v510_v47, %v1008_v48  ;;  %v3149_v48 = vld [vmem:[%s4151_s0 + $0x288] sm:$0xff] }
 0x170   :  { %v2174_v49 = vmax.f32 %v1619_v45, %v2117_v46 }
 0x171   :  { %v1461_v50 = vpop.f32.mrf.mxu2  ;;  %v2016_v51 = vpop.f32.mrf.mxu3 }
 0x172   :  { %v2231_v52 = vpack.c.bf16 %v2174_v49, %v2174_v49  ;;  %v1462_v54 = vadd.f32 %v3749_v44, %v1461_v50  ;;  %v2017_v55 = vadd.f32 %v3749_v44, %v2016_v51  ;;  %v410_v56 = vpop.f32.mrf.mxu0  ;;  %v908_v57 = vpop.f32.mrf.mxu1  ;;  %v3177_v49 = vld [vmem:[%s4151_s0 + $0x36c] sm:$0xff] }
 0x173   :  { %v411_v60 = vadd.f32 %v3749_v44, %v410_v56  ;;  %v909_v61 = vadd.f32 %v3749_v44, %v908_v57 }
 0x174   :  { %2289 = vst.msk [vmem:[%s4152_s3 + $0x6c] sm:$0xf] %vm2261_vm3, %v2231_v52  ;;  %v1563_v58 = vmax.f32 %v1462_v54, 0.0  ;;  %v2118_v59 = vmax.f32 %v2017_v55, 0.0 }
 0x175   :  { %v511_v0 = vmax.f32 %v411_v60, 0.0  ;;  %v1009_v1 = vmax.f32 %v909_v61, 0.0 }
 0x176   :  { %v1620_v62 = vmax.f32 %v1065_v53, %v1563_v58 }
 0x177   :  { %v1066_v15 = vmax.f32 %v511_v0, %v1009_v1 }
 0x178   :  { %v2175_v63 = vmax.f32 %v1620_v62, %v2118_v59 }
 0x179   :  { %v1463_v2 = vpop.f32.mrf.mxu2  ;;  %v2018_v3 = vpop.f32.mrf.mxu3 }
 0x17a   :  { %v2232_v6 = vpack.c.bf16 %v2175_v63, %v2175_v63  ;;  %v1464_v7 = vadd.f32 %v3749_v44, %v1463_v2  ;;  %v2019_v8 = vadd.f32 %v3749_v44, %v2018_v3  ;;  %v413_v9 = vpop.f32.mrf.mxu0  ;;  %v911_v10 = vpop.f32.mrf.mxu1 }
 0x17b   :  { %v414_v13 = vadd.f32 %v3749_v44, %v413_v9  ;;  %v912_v14 = vadd.f32 %v3749_v44, %v911_v10 }
 0x17c   :  { %2290 = vst.msk [vmem:[%s4152_s3 + $0x70] sm:$0xf] %vm2261_vm3, %v2232_v6  ;;  %v1564_v16 = vmax.f32 %v1464_v7, 0.0  ;;  %v2119_v18 = vmax.f32 %v2019_v8, 0.0 }
 0x17d   :  { %2467 = vmatmul.msk.bf16.gmra.mxu0 %vm234_vm2, %v3092_v4  ;;  %2665 = vmatmul.msk.bf16.gmra.mxu1 %vm234_vm2, %v3120_v5  ;;  %v512_v19 = vmax.f32 %v414_v13, 0.0  ;;  %v1010_v20 = vmax.f32 %v912_v14, 0.0  ;;  %v3094_v13 = vld [vmem:[%s4151_s0 + $0xc8] sm:$0xff] }
 0x17e   :  { %v1621_v17 = vmax.f32 %v1066_v15, %v1564_v16  ;;  %2863 = vmatmul.msk.bf16.gmra.mxu2 %vm234_vm2, %v3148_v11  ;;  %3061 = vmatmul.msk.bf16.gmra.mxu3 %vm234_vm2, %v3176_v12  ;;  %v3122_v14 = vld [vmem:[%s4151_s0 + $0x1ac] sm:$0xff] }
 0x17f   :  { %v1067_v25 = vmax.f32 %v512_v19, %v1010_v20  ;;  %v3150_v20 = vld [vmem:[%s4151_s0 + $0x290] sm:$0xff] }
 0x180   :  { %v2176_v21 = vmax.f32 %v1621_v17, %v2119_v18 }
 0x181   :  { %v1466_v22 = vpop.f32.mrf.mxu2  ;;  %v2021_v23 = vpop.f32.mrf.mxu3 }
 0x182   :  { %v2233_v24 = vpack.c.bf16 %v2176_v21, %v2176_v21  ;;  %v1467_v26 = vadd.f32 %v3749_v44, %v1466_v22  ;;  %v2022_v27 = vadd.f32 %v3749_v44, %v2021_v23  ;;  %v415_v28 = vpop.f32.mrf.mxu0  ;;  %v913_v29 = vpop.f32.mrf.mxu1  ;;  %v3178_v21 = vld [vmem:[%s4151_s0 + $0x374] sm:$0xff] }
 0x183   :  { %v416_v32 = vadd.f32 %v3749_v44, %v415_v28  ;;  %v914_v33 = vadd.f32 %v3749_v44, %v913_v29 }
 0x184   :  { %2291 = vst.msk [vmem:[%s4152_s3 + $0x74] sm:$0xf] %vm2261_vm3, %v2233_v24  ;;  %v1565_v30 = vmax.f32 %v1467_v26, 0.0  ;;  %v2120_v31 = vmax.f32 %v2022_v27, 0.0 }
 0x185   :  { %v513_v36 = vmax.f32 %v416_v32, 0.0  ;;  %v1011_v37 = vmax.f32 %v914_v33, 0.0 }
 0x186   :  { %v1622_v34 = vmax.f32 %v1067_v25, %v1565_v30 }
 0x187   :  { %v1068_v52 = vmax.f32 %v513_v36, %v1011_v37 }
 0x188   :  { %v2177_v35 = vmax.f32 %v1622_v34, %v2120_v31 }
 0x189   :  { %v1468_v38 = vpop.f32.mrf.mxu2  ;;  %v2023_v40 = vpop.f32.mrf.mxu3 }
 0x18a   :  { %v2234_v42 = vpack.c.bf16 %v2177_v35, %v2177_v35  ;;  %v1469_v43 = vadd.f32 %v3749_v44, %v1468_v38  ;;  %v2024_v45 = vadd.f32 %v3749_v44, %v2023_v40  ;;  %v418_v46 = vpop.f32.mrf.mxu0  ;;  %v916_v47 = vpop.f32.mrf.mxu1 }
 0x18b   :  { %v419_v50 = vadd.f32 %v3749_v44, %v418_v46  ;;  %v917_v51 = vadd.f32 %v3749_v44, %v916_v47 }
 0x18c   :  { %2292 = vst.msk [vmem:[%s4152_s3 + $0x78] sm:$0xf] %vm2261_vm3, %v2234_v42  ;;  %v1566_v53 = vmax.f32 %v1469_v43, 0.0  ;;  %v2121_v55 = vmax.f32 %v2024_v45, 0.0 }
 0x18d   :  { %2468 = vmatmul.msk.bf16.gmra.mxu0 %vm234_vm2, %v3093_v39  ;;  %2666 = vmatmul.msk.bf16.gmra.mxu1 %vm234_vm2, %v3121_v41  ;;  %v514_v56 = vmax.f32 %v419_v50, 0.0  ;;  %v1012_v57 = vmax.f32 %v917_v51, 0.0  ;;  %v3095_v50 = vld [vmem:[%s4151_s0 + $0xd0] sm:$0xff] }
 0x18e   :  { %v1623_v54 = vmax.f32 %v1068_v52, %v1566_v53  ;;  %2864 = vmatmul.msk.bf16.gmra.mxu2 %vm234_vm2, %v3149_v48  ;;  %3062 = vmatmul.msk.bf16.gmra.mxu3 %vm234_vm2, %v3177_v49  ;;  %v3123_v51 = vld [vmem:[%s4151_s0 + $0x1b4] sm:$0xff] }
 0x18f   :  { %v1069_v62 = vmax.f32 %v514_v56, %v1012_v57  ;;  %v3151_v57 = vld [vmem:[%s4151_s0 + $0x298] sm:$0xff] }
 0x190   :  { %v2178_v58 = vmax.f32 %v1623_v54, %v2121_v55 }
 0x191   :  { %v1471_v59 = vpop.f32.mrf.mxu2  ;;  %v2026_v60 = vpop.f32.mrf.mxu3 }
 0x192   :  { %v2235_v61 = vpack.c.bf16 %v2178_v58, %v2178_v58  ;;  %v1472_v63 = vadd.f32 %v3749_v44, %v1471_v59  ;;  %v2027_v0 = vadd.f32 %v3749_v44, %v2026_v60  ;;  %v420_v1 = vpop.f32.mrf.mxu0  ;;  %v918_v2 = vpop.f32.mrf.mxu1  ;;  %v3179_v58 = vld [vmem:[%s4151_s0 + $0x37c] sm:$0xff] }
 0x193   :  { %v421_v5 = vadd.f32 %v3749_v44, %v420_v1  ;;  %v919_v6 = vadd.f32 %v3749_v44, %v918_v2 }
 0x194   :  { %2293 = vst.msk [vmem:[%s4152_s3 + $0x7c] sm:$0xf] %vm2261_vm3, %v2235_v61  ;;  %v1567_v3 = vmax.f32 %v1472_v63, 0.0  ;;  %v2122_v4 = vmax.f32 %v2027_v0, 0.0 }
 0x195   :  { %v515_v9 = vmax.f32 %v421_v5, 0.0  ;;  %v1013_v10 = vmax.f32 %v919_v6, 0.0 }
 0x196   :  { %v1624_v7 = vmax.f32 %v1069_v62, %v1567_v3 }
 0x197   :  { %v1070_v24 = vmax.f32 %v515_v9, %v1013_v10 }
 0x198   :  { %v2179_v8 = vmax.f32 %v1624_v7, %v2122_v4 }
 0x199   :  { %v1473_v11 = vpop.f32.mrf.mxu2  ;;  %v2028_v12 = vpop.f32.mrf.mxu3 }
 0x19a   :  { %v2236_v15 = vpack.c.bf16 %v2179_v8, %v2179_v8  ;;  %v1474_v16 = vadd.f32 %v3749_v44, %v1473_v11  ;;  %v2029_v17 = vadd.f32 %v3749_v44, %v2028_v12  ;;  %v423_v18 = vpop.f32.mrf.mxu0  ;;  %v921_v19 = vpop.f32.mrf.mxu1 }
 0x19b   :  { %v424_v22 = vadd.f32 %v3749_v44, %v423_v18  ;;  %v922_v23 = vadd.f32 %v3749_v44, %v921_v19 }
 0x19c   :  { %2294 = vst.msk [vmem:[%s4152_s3 + $0x80] sm:$0xf] %vm2261_vm3, %v2236_v15  ;;  %v1568_v25 = vmax.f32 %v1474_v16, 0.0  ;;  %v2123_v27 = vmax.f32 %v2029_v17, 0.0 }
 0x19d   :  { %2469 = vmatmul.msk.bf16.gmra.mxu0 %vm234_vm2, %v3094_v13  ;;  %2667 = vmatmul.msk.bf16.gmra.mxu1 %vm234_vm2, %v3122_v14  ;;  %v516_v28 = vmax.f32 %v424_v22, 0.0  ;;  %v1014_v29 = vmax.f32 %v922_v23, 0.0  ;;  %v3096_v22 = vld [vmem:[%s4151_s0 + $0xd8] sm:$0xff] }
 0x19e   :  { %v1625_v26 = vmax.f32 %v1070_v24, %v1568_v25  ;;  %2865 = vmatmul.msk.bf16.gmra.mxu2 %vm234_vm2, %v3150_v20  ;;  %3063 = vmatmul.msk.bf16.gmra.mxu3 %vm234_vm2, %v3178_v21  ;;  %v3124_v23 = vld [vmem:[%s4151_s0 + $0x1bc] sm:$0xff] }
 0x19f   :  { %v1071_v34 = vmax.f32 %v516_v28, %v1014_v29  ;;  %v3152_v29 = vld [vmem:[%s4151_s0 + $0x2a0] sm:$0xff] }
 0x1a0   :  { %v2180_v30 = vmax.f32 %v1625_v26, %v2123_v27 }
 0x1a1   :  { %v1476_v31 = vpop.f32.mrf.mxu2  ;;  %v2031_v32 = vpop.f32.mrf.mxu3 }
 0x1a2   :  { %v2237_v33 = vpack.c.bf16 %v2180_v30, %v2180_v30  ;;  %v1477_v35 = vadd.f32 %v3749_v44, %v1476_v31  ;;  %v2032_v36 = vadd.f32 %v3749_v44, %v2031_v32  ;;  %v425_v37 = vpop.f32.mrf.mxu0  ;;  %v923_v38 = vpop.f32.mrf.mxu1  ;;  %v3180_v30 = vld [vmem:[%s4151_s0 + $0x384] sm:$0xff] }
 0x1a3   :  { %v426_v41 = vadd.f32 %v3749_v44, %v425_v37  ;;  %v924_v42 = vadd.f32 %v3749_v44, %v923_v38 }
 0x1a4   :  { %2295 = vst.msk [vmem:[%s4152_s3 + $0x84] sm:$0xf] %vm2261_vm3, %v2237_v33  ;;  %v1569_v40 = vmax.f32 %v1477_v35, 0.0  ;;  %v2124_v39 = vmax.f32 %v2032_v36, 0.0 }
 0x1a5   :  { %v517_v46 = vmax.f32 %v426_v41, 0.0  ;;  %v1015_v47 = vmax.f32 %v924_v42, 0.0 }
 0x1a6   :  { %v1626_v43 = vmax.f32 %v1071_v34, %v1569_v40 }
 0x1a7   :  { %v1072_v61 = vmax.f32 %v517_v46, %v1015_v47 }
 0x1a8   :  { %v2181_v45 = vmax.f32 %v1626_v43, %v2124_v39 }
 0x1a9   :  { %v1478_v48 = vpop.f32.mrf.mxu2  ;;  %v2033_v49 = vpop.f32.mrf.mxu3 }
 0x1aa   :  { %v2238_v52 = vpack.c.bf16 %v2181_v45, %v2181_v45  ;;  %v1479_v53 = vadd.f32 %v3749_v44, %v1478_v48  ;;  %v2034_v54 = vadd.f32 %v3749_v44, %v2033_v49  ;;  %v428_v55 = vpop.f32.mrf.mxu0  ;;  %v926_v56 = vpop.f32.mrf.mxu1  ;;  %v76_v49 = vld [vmem:[%s4151_s0 + $0xe0] sm:$0x1] }
 0x1ab   :  { %v429_v59 = vadd.f32 %v3749_v44, %v428_v55  ;;  %v927_v60 = vadd.f32 %v3749_v44, %v926_v56 }
 0x1ac   :  { %2296 = vst.msk [vmem:[%s4152_s3 + $0x88] sm:$0xf] %vm2261_vm3, %v2238_v52  ;;  %v1570_v62 = vmax.f32 %v1479_v53, 0.0  ;;  %v2125_v0 = vmax.f32 %v2034_v54, 0.0  ;;  %v2925_v52 = vld [vmem:[%s4151_s0 + $0x38c] sm:$0x1] }
 0x1ad   :  { %2470 = vmatmul.msk.bf16.gmra.mxu0 %vm234_vm2, %v3095_v50  ;;  %2668 = vmatmul.msk.bf16.gmra.mxu1 %vm234_vm2, %v3123_v51  ;;  %v518_v1 = vmax.f32 %v429_v59, 0.0  ;;  %v1016_v2 = vmax.f32 %v927_v60, 0.0  ;;  %v2529_v50 = vld [vmem:[%s4151_s0 + $0x1c4] sm:$0x1]  ;;  %v2727_v51 = vld [vmem:[%s4151_s0 + $0x2a8] sm:$0x1] }
 0x1ae   :  { %v1627_v63 = vmax.f32 %v1072_v61, %v1570_v62  ;;  %2866 = vmatmul.msk.bf16.gmra.mxu2 %vm234_vm2, %v3151_v57  ;;  %3064 = vmatmul.msk.bf16.gmra.mxu3 %vm234_vm2, %v3179_v58  ;;  %v193_v57 = vunpack.c.l.b16 %v76_v49  ;;  %v710_v58 = vunpack.c.l.b16 %v2529_v50  ;;  %v1265_v59 = vunpack.c.l.b16 %v2727_v51 }
 0x1af   :  { %v1073_v7 = vmax.f32 %v518_v1, %v1016_v2  ;;  %v1820_v61 = vunpack.c.l.b16 %v2925_v52 }
 0x1b0   :  { %v2182_v3 = vmax.f32 %v1627_v63, %v2125_v0 }
 0x1b1   :  { %v1481_v4 = vpop.f32.mrf.mxu2  ;;  %v2036_v5 = vpop.f32.mrf.mxu3 }
 0x1b2   :  { %v2239_v6 = vpack.c.bf16 %v2182_v3, %v2182_v3  ;;  %v1482_v8 = vadd.f32 %v3749_v44, %v1481_v4  ;;  %v2037_v9 = vadd.f32 %v3749_v44, %v2036_v5  ;;  %v430_v10 = vpop.f32.mrf.mxu0  ;;  %v928_v11 = vpop.f32.mrf.mxu1  ;;  %v222_v3 = vpack.c.b16 %v193_v57, %v193_v57 }
 0x1b3   :  { %v431_v14 = vadd.f32 %v3749_v44, %v430_v10  ;;  %v929_v15 = vadd.f32 %v3749_v44, %v928_v11  ;;  %v739_v4 = vpack.c.b16 %v710_v58, %v710_v58  ;;  %v1294_v5 = vpack.c.b16 %v1265_v59, %v1265_v59 }
 0x1b4   :  { %2297 = vst.msk [vmem:[%s4152_s3 + $0x8c] sm:$0xf] %vm2261_vm3, %v2239_v6  ;;  %v1571_v12 = vmax.f32 %v1482_v8, 0.0  ;;  %v2126_v13 = vmax.f32 %v2037_v9, 0.0  ;;  %v1849_v11 = vpack.c.b16 %v1820_v61, %v1820_v61 }
 0x1b5   :  { %v519_v18 = vmax.f32 %v431_v14, 0.0  ;;  %v1017_v19 = vmax.f32 %v929_v15, 0.0 }
 0x1b6   :  { %v1628_v16 = vmax.f32 %v1073_v7, %v1571_v12 }
 0x1b7   :  { %v1074_v33 = vmax.f32 %v519_v18, %v1017_v19 }
 0x1b8   :  { %v2183_v17 = vmax.f32 %v1628_v16, %v2126_v13 }
 0x1b9   :  { %v1483_v20 = vpop.f32.mrf.mxu2  ;;  %v2038_v21 = vpop.f32.mrf.mxu3 }
 0x1ba   :  { %v2240_v24 = vpack.c.bf16 %v2183_v17, %v2183_v17  ;;  %v1484_v25 = vadd.f32 %v3749_v44, %v1483_v20  ;;  %v2039_v26 = vadd.f32 %v3749_v44, %v2038_v21  ;;  %v433_v27 = vpop.f32.mrf.mxu0  ;;  %v931_v28 = vpop.f32.mrf.mxu1 }
 0x1bb   :  { %v434_v31 = vadd.f32 %v3749_v44, %v433_v27  ;;  %v932_v32 = vadd.f32 %v3749_v44, %v931_v28 }
 0x1bc   :  { %2298 = vst.msk [vmem:[%s4152_s3 + $0x90] sm:$0xf] %vm2261_vm3, %v2240_v24  ;;  %v1572_v34 = vmax.f32 %v1484_v25, 0.0  ;;  %v2127_v36 = vmax.f32 %v2039_v26, 0.0 }
 0x1bd   :  { %2471 = vmatmul.msk.bf16.gmra.mxu0 %vm234_vm2, %v3096_v22  ;;  %2669 = vmatmul.msk.bf16.gmra.mxu1 %vm234_vm2, %v3124_v23  ;;  %v520_v37 = vmax.f32 %v434_v31, 0.0  ;;  %v1018_v38 = vmax.f32 %v932_v32, 0.0 }
 0x1be   :  { %v1629_v35 = vmax.f32 %v1074_v33, %v1572_v34  ;;  %2867 = vmatmul.msk.bf16.gmra.mxu2 %vm234_vm2, %v3152_v29  ;;  %3065 = vmatmul.msk.bf16.gmra.mxu3 %vm234_vm2, %v3180_v30 }
 0x1bf   :  { %v1075_v43 = vmax.f32 %v520_v37, %v1018_v38 }
 0x1c0   :  { %v2184_v40 = vmax.f32 %v1629_v35, %v2127_v36 }
 0x1c1   :  { %v1486_v39 = vpop.f32.mrf.mxu2  ;;  %v2041_v41 = vpop.f32.mrf.mxu3 }
 0x1c2   :  { %v2241_v42 = vpack.c.bf16 %v2184_v40, %v2184_v40  ;;  %v1487_v45 = vadd.f32 %v3749_v44, %v1486_v39  ;;  %v2042_v46 = vadd.f32 %v3749_v44, %v2041_v41  ;;  %v435_v47 = vpop.f32.mrf.mxu0  ;;  %v933_v48 = vpop.f32.mrf.mxu1 }
 0x1c3   :  { %v436_v55 = vadd.f32 %v3749_v44, %v435_v47  ;;  %v934_v56 = vadd.f32 %v3749_v44, %v933_v48 }
 0x1c4   :  { %2299 = vst.msk [vmem:[%s4152_s3 + $0x94] sm:$0xf] %vm2261_vm3, %v2241_v42  ;;  %v1573_v53 = vmax.f32 %v1487_v45, 0.0  ;;  %v2128_v54 = vmax.f32 %v2042_v46, 0.0 }
 0x1c5   :  { %v521_v63 = vmax.f32 %v436_v55, 0.0  ;;  %v1019_v0 = vmax.f32 %v934_v56, 0.0 }
 0x1c6   :  { %v1630_v60 = vmax.f32 %v1075_v43, %v1573_v53 }
 0x1c7   :  { %v1076_v14 = vmax.f32 %v521_v63, %v1019_v0 }
 0x1c8   :  { %v2185_v62 = vmax.f32 %v1630_v60, %v2128_v54 }
 0x1c9   :  { %v1488_v1 = vpop.f32.mrf.mxu2  ;;  %v2043_v2 = vpop.f32.mrf.mxu3 }
 0x1ca   :  { %v2242_v6 = vpack.c.bf16 %v2185_v62, %v2185_v62  ;;  %v1489_v7 = vadd.f32 %v3749_v44, %v1488_v1  ;;  %v2044_v8 = vadd.f32 %v3749_v44, %v2043_v2  ;;  %v438_v9 = vpop.f32.mrf.mxu0  ;;  %v936_v10 = vpop.f32.mrf.mxu1 }
 0x1cb   :  { %v439_v12 = vadd.f32 %v3749_v44, %v438_v9  ;;  %v937_v13 = vadd.f32 %v3749_v44, %v936_v10 }
 0x1cc   :  { %2300 = vst.msk [vmem:[%s4152_s3 + $0x98] sm:$0xf] %vm2261_vm3, %v2242_v6  ;;  %v1574_v15 = vmax.f32 %v1489_v7, 0.0  ;;  %v2129_v17 = vmax.f32 %v2044_v8, 0.0 }
 0x1cd   :  { %2472 = vmatmul.msk.bf16.gmra.mxu0 %vm234_vm2, %v222_v3  ;;  %2670 = vmatmul.msk.bf16.gmra.mxu1 %vm234_vm2, %v739_v4  ;;  %v522_v18 = vmax.f32 %v439_v12, 0.0  ;;  %v1020_v19 = vmax.f32 %v937_v13, 0.0 }
 0x1ce   :  { %v1631_v16 = vmax.f32 %v1076_v14, %v1574_v15  ;;  %2868 = vmatmul.msk.bf16.gmra.mxu2 %vm234_vm2, %v1294_v5  ;;  %3066 = vmatmul.msk.bf16.gmra.mxu3 %vm234_vm2, %v1849_v11 }
 0x1cf   :  { %v1077_v24 = vmax.f32 %v522_v18, %v1020_v19 }
 0x1d0   :  { %v2186_v20 = vmax.f32 %v1631_v16, %v2129_v17 }
 0x1d1   :  { %v1491_v21 = vpop.f32.mrf.mxu2  ;;  %v2046_v22 = vpop.f32.mrf.mxu3 }
 0x1d2   :  { %v2243_v23 = vpack.c.bf16 %v2186_v20, %v2186_v20  ;;  %v1492_v25 = vadd.f32 %v3749_v44, %v1491_v21  ;;  %v2047_v26 = vadd.f32 %v3749_v44, %v2046_v22  ;;  %v440_v27 = vpop.f32.mrf.mxu0  ;;  %v938_v28 = vpop.f32.mrf.mxu1 }
 0x1d3   :  { %v441_v31 = vadd.f32 %v3749_v44, %v440_v27  ;;  %v939_v32 = vadd.f32 %v3749_v44, %v938_v28 }
 0x1d4   :  { %2301 = vst.msk [vmem:[%s4152_s3 + $0x9c] sm:$0xf] %vm2261_vm3, %v2243_v23  ;;  %v1575_v29 = vmax.f32 %v1492_v25, 0.0  ;;  %v2130_v30 = vmax.f32 %v2047_v26, 0.0 }
 0x1d5   :  { %v523_v35 = vmax.f32 %v441_v31, 0.0  ;;  %v1021_v36 = vmax.f32 %v939_v32, 0.0 }
 0x1d6   :  { %v1632_v33 = vmax.f32 %v1077_v24, %v1575_v29 }
 0x1d7   :  { %v1078_v47 = vmax.f32 %v523_v35, %v1021_v36 }
 0x1d8   :  { %v2187_v34 = vmax.f32 %v1632_v33, %v2130_v30 }
 0x1d9   :  { %v1493_v37 = vpop.f32.mrf.mxu2  ;;  %v2048_v38 = vpop.f32.mrf.mxu3 }
 0x1da   :  { %v2244_v40 = vpack.c.bf16 %v2187_v34, %v2187_v34  ;;  %v1494_v39 = vadd.f32 %v3749_v44, %v1493_v37  ;;  %v2049_v41 = vadd.f32 %v3749_v44, %v2048_v38  ;;  %v443_v42 = vpop.f32.mrf.mxu0  ;;  %v941_v43 = vpop.f32.mrf.mxu1 }
 0x1db   :  { %v444_v45 = vadd.f32 %v3749_v44, %v443_v42  ;;  %v942_v46 = vadd.f32 %v3749_v44, %v941_v43 }
 0x1dc   :  { %2302 = vst.msk [vmem:[%s4152_s3 + $0xa0] sm:$0xf] %vm2261_vm3, %v2244_v40  ;;  %v1576_v48 = vmax.f32 %v1494_v39, 0.0  ;;  %v2131_v50 = vmax.f32 %v2049_v41, 0.0 }
 0x1dd   :  { %v524_v51 = vmax.f32 %v444_v45, 0.0  ;;  %v1022_v52 = vmax.f32 %v942_v46, 0.0 }
 0x1de   :  { %v1633_v49 = vmax.f32 %v1078_v47, %v1576_v48 }
 0x1df   :  { %v1079_v57 = vmax.f32 %v524_v51, %v1022_v52 }
 0x1e0   :  { %v2188_v53 = vmax.f32 %v1633_v49, %v2131_v50 }
 0x1e1   :  { %v1496_v54 = vpop.f32.mrf.mxu2  ;;  %v2051_v55 = vpop.f32.mrf.mxu3 }
 0x1e2   :  { %v2245_v56 = vpack.c.bf16 %v2188_v53, %v2188_v53  ;;  %v1497_v58 = vadd.f32 %v3749_v44, %v1496_v54  ;;  %v2052_v59 = vadd.f32 %v3749_v44, %v2051_v55  ;;  %v445_v60 = vpop.f32.mrf.mxu0  ;;  %v943_v61 = vpop.f32.mrf.mxu1 }
 0x1e3   :  { %v446_v0 = vadd.f32 %v3749_v44, %v445_v60  ;;  %v944_v1 = vadd.f32 %v3749_v44, %v943_v61 }
 0x1e4   :  { %2303 = vst.msk [vmem:[%s4152_s3 + $0xa4] sm:$0xf] %vm2261_vm3, %v2245_v56  ;;  %v1577_v62 = vmax.f32 %v1497_v58, 0.0  ;;  %v2132_v63 = vmax.f32 %v2052_v59, 0.0 }
 0x1e5   :  { %v525_v4 = vmax.f32 %v446_v0, 0.0  ;;  %v1023_v5 = vmax.f32 %v944_v1, 0.0 }
 0x1e6   :  { %v1634_v2 = vmax.f32 %v1079_v57, %v1577_v62 }
 0x1e7   :  { %v1080_v15 = vmax.f32 %v525_v4, %v1023_v5 }
 0x1e8   :  { %v2189_v3 = vmax.f32 %v1634_v2, %v2132_v63 }
 0x1e9   :  { %v1498_v6 = vpop.f32.mrf.mxu2  ;;  %v2053_v7 = vpop.f32.mrf.mxu3 }
 0x1ea   :  { %v2246_v8 = vpack.c.bf16 %v2189_v3, %v2189_v3  ;;  %v1499_v9 = vadd.f32 %v3749_v44, %v1498_v6  ;;  %v2054_v10 = vadd.f32 %v3749_v44, %v2053_v7  ;;  %v448_v11 = vpop.f32.mrf.mxu0  ;;  %v946_v12 = vpop.f32.mrf.mxu1 }
 0x1eb   :  { %v449_v13 = vadd.f32 %v3749_v44, %v448_v11  ;;  %v947_v14 = vadd.f32 %v3749_v44, %v946_v12 }
 0x1ec   :  { %2304 = vst.msk [vmem:[%s4152_s3 + $0xa8] sm:$0xf] %vm2261_vm3, %v2246_v8  ;;  %v1578_v16 = vmax.f32 %v1499_v9, 0.0  ;;  %v2133_v18 = vmax.f32 %v2054_v10, 0.0 }
 0x1ed   :  { %v526_v19 = vmax.f32 %v449_v13, 0.0  ;;  %v1024_v20 = vmax.f32 %v947_v14, 0.0 }
 0x1ee   :  { %v1635_v17 = vmax.f32 %v1080_v15, %v1578_v16 }
 0x1ef   :  { %v1081_v25 = vmax.f32 %v526_v19, %v1024_v20 }
 0x1f0   :  { %v2190_v21 = vmax.f32 %v1635_v17, %v2133_v18 }
 0x1f1   :  { %v1501_v22 = vpop.f32.mrf.mxu2  ;;  %v2056_v23 = vpop.f32.mrf.mxu3 }
 0x1f2   :  { %v2247_v24 = vpack.c.bf16 %v2190_v21, %v2190_v21  ;;  %v1502_v26 = vadd.f32 %v3749_v44, %v1501_v22  ;;  %v2057_v27 = vadd.f32 %v3749_v44, %v2056_v23  ;;  %v450_v28 = vpop.f32.mrf.mxu0  ;;  %v948_v29 = vpop.f32.mrf.mxu1 }
 0x1f3   :  { %v451_v32 = vadd.f32 %v3749_v44, %v450_v28  ;;  %v949_v33 = vadd.f32 %v3749_v44, %v948_v29 }
 0x1f4   :  { %2305 = vst.msk [vmem:[%s4152_s3 + $0xac] sm:$0xf] %vm2261_vm3, %v2247_v24  ;;  %v1579_v30 = vmax.f32 %v1502_v26, 0.0  ;;  %v2134_v31 = vmax.f32 %v2057_v27, 0.0 }
 0x1f5   :  { %v527_v36 = vmax.f32 %v451_v32, 0.0  ;;  %v1025_v37 = vmax.f32 %v949_v33, 0.0 }
 0x1f6   :  { %v1636_v34 = vmax.f32 %v1081_v25, %v1579_v30 }
 0x1f7   :  { %v1082_v48 = vmax.f32 %v527_v36, %v1025_v37 }
 0x1f8   :  { %v2191_v35 = vmax.f32 %v1636_v34, %v2134_v31 }
 0x1f9   :  { %v1503_v38 = vpop.f32.mrf.mxu2  ;;  %v2058_v40 = vpop.f32.mrf.mxu3 }
 0x1fa   :  { %v2248_v39 = vpack.c.bf16 %v2191_v35, %v2191_v35  ;;  %v1504_v41 = vadd.f32 %v3749_v44, %v1503_v38  ;;  %v2059_v42 = vadd.f32 %v3749_v44, %v2058_v40  ;;  %v453_v43 = vpop.f32.mrf.mxu0  ;;  %v951_v45 = vpop.f32.mrf.mxu1 }
 0x1fb   :  { %v454_v46 = vadd.f32 %v3749_v44, %v453_v43  ;;  %v952_v47 = vadd.f32 %v3749_v44, %v951_v45 }
 0x1fc   :  { %2306 = vst.msk [vmem:[%s4152_s3 + $0xb0] sm:$0xf] %vm2261_vm3, %v2248_v39  ;;  %v1580_v49 = vmax.f32 %v1504_v41, 0.0  ;;  %v2135_v51 = vmax.f32 %v2059_v42, 0.0 }
 0x1fd   :  { %v528_v52 = vmax.f32 %v454_v46, 0.0  ;;  %v1026_v53 = vmax.f32 %v952_v47, 0.0 }
 0x1fe   :  { %v1637_v50 = vmax.f32 %v1082_v48, %v1580_v49 }
 0x1ff   :  { %v1083_v58 = vmax.f32 %v528_v52, %v1026_v53 }
 0x200   :  { %v2192_v54 = vmax.f32 %v1637_v50, %v2135_v51 }
 0x201   :  { %v1506_v55 = vpop.f32.mrf.mxu2  ;;  %v2061_v56 = vpop.f32.mrf.mxu3 }
 0x202   :  { %v2249_v57 = vpack.c.bf16 %v2192_v54, %v2192_v54  ;;  %v1507_v59 = vadd.f32 %v3749_v44, %v1506_v55  ;;  %v2062_v60 = vadd.f32 %v3749_v44, %v2061_v56  ;;  %v455_v61 = vpop.f32.mrf.mxu0  ;;  %v953_v62 = vpop.f32.mrf.mxu1 }
 0x203   :  { %v456_v1 = vadd.f32 %v3749_v44, %v455_v61  ;;  %v954_v2 = vadd.f32 %v3749_v44, %v953_v62 }
 0x204   :  { %2307 = vst.msk [vmem:[%s4152_s3 + $0xb4] sm:$0xf] %vm2261_vm3, %v2249_v57  ;;  %v1581_v63 = vmax.f32 %v1507_v59, 0.0  ;;  %v2136_v0 = vmax.f32 %v2062_v60, 0.0 }
 0x205   :  { %v529_v5 = vmax.f32 %v456_v1, 0.0  ;;  %v1027_v6 = vmax.f32 %v954_v2, 0.0 }
 0x206   :  { %v1638_v3 = vmax.f32 %v1083_v58, %v1581_v63 }
 0x207   :  { %v1084_v16 = vmax.f32 %v529_v5, %v1027_v6 }
 0x208   :  { %v2193_v4 = vmax.f32 %v1638_v3, %v2136_v0 }
 0x209   :  { %v1508_v7 = vpop.f32.mrf.mxu2  ;;  %v2063_v8 = vpop.f32.mrf.mxu3 }
 0x20a   :  { %v2250_v9 = vpack.c.bf16 %v2193_v4, %v2193_v4  ;;  %v1509_v10 = vadd.f32 %v3749_v44, %v1508_v7  ;;  %v2064_v11 = vadd.f32 %v3749_v44, %v2063_v8  ;;  %v458_v12 = vpop.f32.mrf.mxu0  ;;  %v956_v13 = vpop.f32.mrf.mxu1 }
 0x20b   :  { %v459_v14 = vadd.f32 %v3749_v44, %v458_v12  ;;  %v957_v15 = vadd.f32 %v3749_v44, %v956_v13 }
 0x20c   :  { %2308 = vst.msk [vmem:[%s4152_s3 + $0xb8] sm:$0xf] %vm2261_vm3, %v2250_v9  ;;  %v1582_v17 = vmax.f32 %v1509_v10, 0.0  ;;  %v2137_v19 = vmax.f32 %v2064_v11, 0.0 }
 0x20d   :  { %v530_v20 = vmax.f32 %v459_v14, 0.0  ;;  %v1028_v21 = vmax.f32 %v957_v15, 0.0 }
 0x20e   :  { %v1639_v18 = vmax.f32 %v1084_v16, %v1582_v17 }
 0x20f   :  { %v1085_v26 = vmax.f32 %v530_v20, %v1028_v21 }
 0x210   :  { %v2194_v22 = vmax.f32 %v1639_v18, %v2137_v19 }
 0x211   :  { %v1511_v23 = vpop.f32.mrf.mxu2  ;;  %v2066_v24 = vpop.f32.mrf.mxu3 }
 0x212   :  { %v2251_v25 = vpack.c.bf16 %v2194_v22, %v2194_v22  ;;  %v1512_v27 = vadd.f32 %v3749_v44, %v1511_v23  ;;  %v2067_v28 = vadd.f32 %v3749_v44, %v2066_v24  ;;  %v460_v29 = vpop.f32.mrf.mxu0  ;;  %v958_v30 = vpop.f32.mrf.mxu1 }
 0x213   :  { %v461_v33 = vadd.f32 %v3749_v44, %v460_v29  ;;  %v959_v34 = vadd.f32 %v3749_v44, %v958_v30 }
 0x214   :  { %2309 = vst.msk [vmem:[%s4152_s3 + $0xbc] sm:$0xf] %vm2261_vm3, %v2251_v25  ;;  %v1583_v31 = vmax.f32 %v1512_v27, 0.0  ;;  %v2138_v32 = vmax.f32 %v2067_v28, 0.0 }
 0x215   :  { %v531_v37 = vmax.f32 %v461_v33, 0.0  ;;  %v1029_v38 = vmax.f32 %v959_v34, 0.0 }
 0x216   :  { %v1640_v35 = vmax.f32 %v1085_v26, %v1583_v31 }
 0x217   :  { %v1086_v49 = vmax.f32 %v531_v37, %v1029_v38 }
 0x218   :  { %v2195_v36 = vmax.f32 %v1640_v35, %v2138_v32 }
 0x219   :  { %v1513_v40 = vpop.f32.mrf.mxu2  ;;  %v2068_v39 = vpop.f32.mrf.mxu3 }
 0x21a   :  { %v2252_v41 = vpack.c.bf16 %v2195_v36, %v2195_v36  ;;  %v1514_v42 = vadd.f32 %v3749_v44, %v1513_v40  ;;  %v2069_v43 = vadd.f32 %v3749_v44, %v2068_v39  ;;  %v463_v45 = vpop.f32.mrf.mxu0  ;;  %v961_v46 = vpop.f32.mrf.mxu1 }
 0x21b   :  { %v464_v47 = vadd.f32 %v3749_v44, %v463_v45  ;;  %v962_v48 = vadd.f32 %v3749_v44, %v961_v46  ;;  %v4090_v44 = vld [vmem:[%s4150_s2] ss:$0 sm:$0xff] }
 0x21c   :  { %2310 = vst.msk [vmem:[%s4152_s3 + $0xc0] sm:$0xf] %vm2261_vm3, %v2252_v41  ;;  %v1584_v50 = vmax.f32 %v1514_v42, 0.0  ;;  %v2139_v52 = vmax.f32 %v2069_v43, 0.0 }
 0x21d   :  { %v532_v53 = vmax.f32 %v464_v47, 0.0  ;;  %v1030_v54 = vmax.f32 %v962_v48, 0.0 }
 0x21e   :  { %v1641_v51 = vmax.f32 %v1086_v49, %v1584_v50 }
 0x21f   :  { %v1087_v59 = vmax.f32 %v532_v53, %v1030_v54 }
 0x220   :  { %v2196_v55 = vmax.f32 %v1641_v51, %v2139_v52 }
 0x221   :  { %v1516_v56 = vpop.f32.mrf.mxu2  ;;  %v2071_v57 = vpop.f32.mrf.mxu3 }
 0x222   :  { %v2253_v58 = vpack.c.bf16 %v2196_v55, %v2196_v55  ;;  %v1517_v60 = vadd.f32 %v4090_v44, %v1516_v56  ;;  %v2072_v61 = vadd.f32 %v4090_v44, %v2071_v57  ;;  %v465_v62 = vpop.f32.mrf.mxu0  ;;  %v963_v63 = vpop.f32.mrf.mxu1 }
 0x223   :  { %v466_v2 = vadd.f32 %v4090_v44, %v465_v62  ;;  %v964_v3 = vadd.f32 %v4090_v44, %v963_v63 }
 0x224   :  { %2311 = vst.msk [vmem:[%s4152_s3 + $0xc4] sm:$0xf] %vm2261_vm3, %v2253_v58  ;;  %v1585_v0 = vmax.f32 %v1517_v60, 0.0  ;;  %v2140_v1 = vmax.f32 %v2072_v61, 0.0 }
 0x225   :  { %v533_v6 = vmax.f32 %v466_v2, 0.0  ;;  %v1031_v7 = vmax.f32 %v964_v3, 0.0 }
 0x226   :  { %v1642_v4 = vmax.f32 %v1087_v59, %v1585_v0 }
 0x227   :  { %v1088_v17 = vmax.f32 %v533_v6, %v1031_v7 }
 0x228   :  { %v2197_v5 = vmax.f32 %v1642_v4, %v2140_v1 }
 0x229   :  { %v1518_v8 = vpop.f32.mrf.mxu2  ;;  %v2073_v9 = vpop.f32.mrf.mxu3 }
 0x22a   :  { %v2254_v10 = vpack.c.bf16 %v2197_v5, %v2197_v5  ;;  %v1519_v11 = vadd.f32 %v4090_v44, %v1518_v8  ;;  %v2074_v12 = vadd.f32 %v4090_v44, %v2073_v9  ;;  %v468_v13 = vpop.f32.mrf.mxu0  ;;  %v966_v14 = vpop.f32.mrf.mxu1 }
 0x22b   :  { %v469_v15 = vadd.f32 %v4090_v44, %v468_v13  ;;  %v967_v16 = vadd.f32 %v4090_v44, %v966_v14 }
 0x22c   :  { %2312 = vst.msk [vmem:[%s4152_s3 + $0xc8] sm:$0xf] %vm2261_vm3, %v2254_v10  ;;  %v1586_v18 = vmax.f32 %v1519_v11, 0.0  ;;  %v2141_v20 = vmax.f32 %v2074_v12, 0.0 }
 0x22d   :  { %v534_v21 = vmax.f32 %v469_v15, 0.0  ;;  %v1032_v22 = vmax.f32 %v967_v16, 0.0 }
 0x22e   :  { %v1643_v19 = vmax.f32 %v1088_v17, %v1586_v18 }
 0x22f   :  { %v1089_v27 = vmax.f32 %v534_v21, %v1032_v22 }
 0x230   :  { %v2198_v23 = vmax.f32 %v1643_v19, %v2141_v20 }
 0x231   :  { %v1521_v24 = vpop.f32.mrf.mxu2  ;;  %v2076_v25 = vpop.f32.mrf.mxu3 }
 0x232   :  { %v2255_v26 = vpack.c.bf16 %v2198_v23, %v2198_v23  ;;  %v1522_v28 = vadd.f32 %v4090_v44, %v1521_v24  ;;  %v2077_v29 = vadd.f32 %v4090_v44, %v2076_v25  ;;  %v470_v30 = vpop.f32.mrf.mxu0  ;;  %v968_v31 = vpop.f32.mrf.mxu1 }
 0x233   :  { %v471_v34 = vadd.f32 %v4090_v44, %v470_v30  ;;  %v969_v35 = vadd.f32 %v4090_v44, %v968_v31 }
 0x234   :  { %2313 = vst.msk [vmem:[%s4152_s3 + $0xcc] sm:$0xf] %vm2261_vm3, %v2255_v26  ;;  %v1587_v32 = vmax.f32 %v1522_v28, 0.0  ;;  %v2142_v33 = vmax.f32 %v2077_v29, 0.0 }
 0x235   :  { %v535_v38 = vmax.f32 %v471_v34, 0.0  ;;  %v1033_v40 = vmax.f32 %v969_v35, 0.0 }
 0x236   :  { %v1644_v36 = vmax.f32 %v1089_v27, %v1587_v32 }
 0x237   :  { %v1090_v50 = vmax.f32 %v535_v38, %v1033_v40 }
 0x238   :  { %v2199_v37 = vmax.f32 %v1644_v36, %v2142_v33 }
 0x239   :  { %v1523_v39 = vpop.f32.mrf.mxu2  ;;  %v2078_v41 = vpop.f32.mrf.mxu3 }
 0x23a   :  { %v2256_v42 = vpack.c.bf16 %v2199_v37, %v2199_v37  ;;  %v1524_v43 = vadd.f32 %v4090_v44, %v1523_v39  ;;  %v2079_v45 = vadd.f32 %v4090_v44, %v2078_v41  ;;  %v473_v46 = vpop.f32.mrf.mxu0  ;;  %v971_v47 = vpop.f32.mrf.mxu1 }
 0x23b   :  { %v474_v48 = vadd.f32 %v4090_v44, %v473_v46  ;;  %v972_v49 = vadd.f32 %v4090_v44, %v971_v47 }
 0x23c   :  { %2314 = vst.msk [vmem:[%s4152_s3 + $0xd0] sm:$0xf] %vm2261_vm3, %v2256_v42  ;;  %v1588_v51 = vmax.f32 %v1524_v43, 0.0  ;;  %v2143_v53 = vmax.f32 %v2079_v45, 0.0 }
 0x23d   :  { %v536_v54 = vmax.f32 %v474_v48, 0.0  ;;  %v1034_v55 = vmax.f32 %v972_v49, 0.0 }
 0x23e   :  { %v1645_v52 = vmax.f32 %v1090_v50, %v1588_v51 }
 0x23f   :  { %v1091_v60 = vmax.f32 %v536_v54, %v1034_v55 }
 0x240   :  { %v2200_v56 = vmax.f32 %v1645_v52, %v2143_v53 }
 0x241   :  { %v1526_v57 = vpop.f32.mrf.mxu2  ;;  %v2081_v58 = vpop.f32.mrf.mxu3 }
 0x242   :  { %v2257_v59 = vpack.c.bf16 %v2200_v56, %v2200_v56  ;;  %v1527_v61 = vadd.f32 %v4090_v44, %v1526_v57  ;;  %v2082_v62 = vadd.f32 %v4090_v44, %v2081_v58  ;;  %v475_v63 = vpop.f32.mrf.mxu0  ;;  %v973_v0 = vpop.f32.mrf.mxu1 }
 0x243   :  { %v476_v3 = vadd.f32 %v4090_v44, %v475_v63  ;;  %v974_v4 = vadd.f32 %v4090_v44, %v973_v0 }
 0x244   :  { %2315 = vst.msk [vmem:[%s4152_s3 + $0xd4] sm:$0xf] %vm2261_vm3, %v2257_v59  ;;  %v1589_v1 = vmax.f32 %v1527_v61, 0.0  ;;  %v2144_v2 = vmax.f32 %v2082_v62, 0.0 }
 0x245   :  { %v537_v7 = vmax.f32 %v476_v3, 0.0  ;;  %v1035_v8 = vmax.f32 %v974_v4, 0.0 }
 0x246   :  { %v1646_v5 = vmax.f32 %v1091_v60, %v1589_v1 }
 0x247   :  { %v1092_v18 = vmax.f32 %v537_v7, %v1035_v8 }
 0x248   :  { %v2201_v6 = vmax.f32 %v1646_v5, %v2144_v2 }
 0x249   :  { %v1528_v9 = vpop.f32.mrf.mxu2  ;;  %v2083_v10 = vpop.f32.mrf.mxu3 }
 0x24a   :  { %v2258_v11 = vpack.c.bf16 %v2201_v6, %v2201_v6  ;;  %v1529_v12 = vadd.f32 %v4090_v44, %v1528_v9  ;;  %v2084_v13 = vadd.f32 %v4090_v44, %v2083_v10  ;;  %v478_v14 = vpop.f32.mrf.mxu0  ;;  %v976_v15 = vpop.f32.mrf.mxu1 }
 0x24b   :  { %v479_v16 = vadd.f32 %v4090_v44, %v478_v14  ;;  %v977_v17 = vadd.f32 %v4090_v44, %v976_v15 }
 0x24c   :  { %2316 = vst.msk [vmem:[%s4152_s3 + $0xd8] sm:$0xf] %vm2261_vm3, %v2258_v11  ;;  %v1590_v19 = vmax.f32 %v1529_v12, 0.0  ;;  %v2145_v21 = vmax.f32 %v2084_v13, 0.0 }
 0x24d   :  { %v538_v22 = vmax.f32 %v479_v16, 0.0  ;;  %v1036_v23 = vmax.f32 %v977_v17, 0.0 }
 0x24e   :  { %v1647_v20 = vmax.f32 %v1092_v18, %v1590_v19 }
 0x24f   :  { %v1093_v28 = vmax.f32 %v538_v22, %v1036_v23 }
 0x250   :  { %v2202_v24 = vmax.f32 %v1647_v20, %v2145_v21 }
 0x251   :  { %v1531_v25 = vpop.f32.mrf.mxu2  ;;  %v2086_v26 = vpop.f32.mrf.mxu3 }
 0x252   :  { %v2259_v27 = vpack.c.bf16 %v2202_v24, %v2202_v24  ;;  %v1532_v29 = vadd.f32 %v4090_v44, %v1531_v25  ;;  %v2087_v30 = vadd.f32 %v4090_v44, %v2086_v26  ;;  %v480_v31 = vpop.f32.mrf.mxu0  ;;  %v978_v32 = vpop.f32.mrf.mxu1 }
 0x254   :  { %2317 = vst.msk [vmem:[%s4152_s3 + $0xdc] sm:$0xf] %vm2261_vm3, %v2259_v27  ;;  %v1591_v33 = vmax.f32 %v1532_v29, 0.0  ;;  %v2146_v34 = vmax.f32 %v2087_v30, 0.0 }
 0x256   :  { %v1648_v35 = vmax.f32 %v1093_v28, %v1591_v33 }
 0x258   :  { %v2203_v36 = vmax.f32 %v1648_v35, %v2146_v34 }
 0x259   :  { %v1533_v37 = vpop.f32.mrf.mxu2  ;;  %v2088_v38 = vpop.f32.mrf.mxu3 }
 0x25a   :  { %v2260_v40 = vpack.c.bf16 %v2203_v36, %v2203_v36 }
 0x25c   :  { %2319 = vst.msk [vmem:[%s4152_s3 + $0xe0] sm:$0x1] %vm2318_vm4, %v2260_v40 }

// kernel: forward.5
= control target key start
LH: loop header
LB: loop body
LE: loop exit
PB: predicated region body
PF: predicated region fallthrough
CT: control target
= control target key end

     0   :  { %vm190_vm0 = vcmask 916480   ;;  %vm743_vm1 = vcmask 609280   ;;  %s1523_s1 = inlined_call_operand.vmem [shape: bf16[240,75], index: 1, kind: input, shape index: {}]   ;;  %s1524_s0 = inlined_call_operand.vmem [shape: bf16[4,72,240], index: 0, kind: input, shape index: {}]   ;;  %s1525_s2 = inlined_call_operand.vmem [shape: f32[1,75], index: 2, kind: input, shape index: {}]   ;;  %s1526_s3 = inlined_call_operand.vmem [shape: bf16[72,75], index: 3, kind: output, shape index: {}]  }
   0x1   :  { %v1063_v0 = vld [vmem:[%s1523_s1 + $0x38] sm:$0xff]  ;;  %v1068_v1 = vld [vmem:[%s1523_s1 + $0x70] sm:$0xff]  ;;  %v1080_v3 = vld [vmem:[%s1523_s1 + $0x68] sm:$0xff] }
   0x2   :  { %206 = vmatpush.bf16.msra.mxu0 %v1063_v0  ;;  %240 = vmatpush.bf16.msra.mxu1 %v1068_v1  ;;  %v1075_v2 = vld [vmem:[%s1523_s1 + $0x30] sm:$0xff]  ;;  %v1089_v4 = vld [vmem:[%s1523_s1 + $0x28] sm:$0xff]  ;;  %v1094_v5 = vld [vmem:[%s1523_s1 + $0x60] sm:$0xff] }
   0x3   :  { %348 = vmatpush.bf16.msra.mxu2 %v1063_v0  ;;  %382 = vmatpush.bf16.msra.mxu3 %v1068_v1  ;;  %v1103_v6 = vld [vmem:[%s1523_s1 + $0x20] sm:$0xff]  ;;  %v1108_v7 = vld [vmem:[%s1523_s1 + $0x58] sm:$0xff]  ;;  %v1122_v9 = vld [vmem:[%s1523_s1 + $0x50] sm:$0xff] }
   0x4   :  { %v1117_v8 = vld [vmem:[%s1523_s1 + $0x18] sm:$0xff]  ;;  %v1131_v10 = vld [vmem:[%s1523_s1 + $0x10] sm:$0xff]  ;;  %v1136_v11 = vld [vmem:[%s1523_s1 + $0x48] sm:$0xff] }
   0x5   :  { %v1143_v12 = vld [vmem:[%s1523_s1 + $0x8] sm:$0xff]  ;;  %v1150_v13 = vld [vmem:[%s1523_s1 + $0x40] sm:$0xff]  ;;  %v867_v17 = vld [vmem:[%s1524_s0 + $0x50] sm:$0xf0] }
   0x6   :  { %207 = vmatpush.bf16.msra.mxu0 %v1075_v2  ;;  %241 = vmatpush.bf16.msra.mxu1 %v1080_v3  ;;  %v1007_v14 = vld [vmem:[%s1524_s0 + $0x4] sm:$0xf]  ;;  %v761_v15 = vld [vmem:[%s1524_s0 + $0x8] sm:$0xf0]  ;;  %v759_v21 = vld [vmem:[%s1524_s0] sm:$0xf] }
   0x7   :  { %349 = vmatpush.bf16.msra.mxu2 %v1075_v2  ;;  %383 = vmatpush.bf16.msra.mxu3 %v1080_v3  ;;  %v1015_v16 = vld [vmem:[%s1524_s0 + $0x4c] sm:$0xf]  ;;  %v764_v18 = vor.u32 %v1007_v14, %v761_v15  ;;  %v1171_v20 = vld [vmem:[%s1523_s1] sm:$0xff]  ;;  %v1008_v22 = vld [vmem:[%s1524_s0 + $0x4] sm:$0xf0] }
   0x8   :  { %v870_v19 = vor.u32 %v1015_v16, %v867_v17  ;;  %v865_v23 = vld [vmem:[%s1524_s0 + $0x48] sm:$0xf]  ;;  %v1016_v24 = vld [vmem:[%s1524_s0 + $0x4c] sm:$0xf0]  ;;  %v760_v25 = vor.u32 %v1008_v22, %v759_v21  ;;  %v1009_v27 = vld [vmem:[%s1524_s0 + $0x14] sm:$0xf] }
   0x9   :  { %v866_v26 = vor.u32 %v1016_v24, %v865_v23  ;;  %v769_v28 = vld [vmem:[%s1524_s0 + $0x18] sm:$0xf0]  ;;  %v875_v30 = vld [vmem:[%s1524_s0 + $0x60] sm:$0xf0]  ;;  %v767_v33 = vld [vmem:[%s1524_s0 + $0x10] sm:$0xf] }
   0xa   :  { %208 = vmatpush.bf16.msra.mxu0 %v1089_v4  ;;  %242 = vmatpush.bf16.msra.mxu1 %v1094_v5  ;;  %v1017_v29 = vld [vmem:[%s1524_s0 + $0x5c] sm:$0xf]  ;;  %v772_v31 = vor.u32 %v1009_v27, %v769_v28  ;;  %v1010_v34 = vld [vmem:[%s1524_s0 + $0x14] sm:$0xf0]  ;;  %v1018_v36 = vld [vmem:[%s1524_s0 + $0x5c] sm:$0xf0] }
   0xb   :  { %350 = vmatpush.bf16.msra.mxu2 %v1089_v4  ;;  %384 = vmatpush.bf16.msra.mxu3 %v1094_v5  ;;  %v878_v32 = vor.u32 %v1017_v29, %v875_v30  ;;  %v873_v35 = vld [vmem:[%s1524_s0 + $0x58] sm:$0xf]  ;;  %v768_v37 = vor.u32 %v1010_v34, %v767_v33  ;;  %v1011_v39 = vld [vmem:[%s1524_s0 + $0x24] sm:$0xf]  ;;  %v777_v40 = vld [vmem:[%s1524_s0 + $0x28] sm:$0xf0] }
   0xc   :  { %v874_v38 = vor.u32 %v1018_v36, %v873_v35  ;;  %v1019_v41 = vld [vmem:[%s1524_s0 + $0x6c] sm:$0xf]  ;;  %v883_v42 = vld [vmem:[%s1524_s0 + $0x70] sm:$0xf0]  ;;  %v780_v43 = vor.u32 %v1011_v39, %v777_v40  ;;  %v775_v45 = vld [vmem:[%s1524_s0 + $0x20] sm:$0xf] }
   0xd   :  { %v886_v44 = vor.u32 %v1019_v41, %v883_v42  ;;  %v1012_v46 = vld [vmem:[%s1524_s0 + $0x24] sm:$0xf0]  ;;  %v1020_v48 = vld [vmem:[%s1524_s0 + $0x6c] sm:$0xf0]  ;;  %v1013_v51 = vld [vmem:[%s1524_s0 + $0x34] sm:$0xf] }
   0xe   :  { %209 = vmatpush.bf16.msra.mxu0 %v1103_v6  ;;  %243 = vmatpush.bf16.msra.mxu1 %v1108_v7  ;;  %v881_v47 = vld [vmem:[%s1524_s0 + $0x68] sm:$0xf]  ;;  %v776_v49 = vor.u32 %v1012_v46, %v775_v45  ;;  %v785_v52 = vld [vmem:[%s1524_s0 + $0x38] sm:$0xf0]  ;;  %v891_v54 = vld [vmem:[%s1524_s0 + $0x80] sm:$0xf0] }
   0xf   :  { %351 = vmatpush.bf16.msra.mxu2 %v1103_v6  ;;  %385 = vmatpush.bf16.msra.mxu3 %v1108_v7  ;;  %v882_v50 = vor.u32 %v1020_v48, %v881_v47  ;;  %v1021_v53 = vld [vmem:[%s1524_s0 + $0x7c] sm:$0xf]  ;;  %v788_v55 = vor.u32 %v1013_v51, %v785_v52  ;;  %v783_v57 = vld [vmem:[%s1524_s0 + $0x30] sm:$0xf]  ;;  %v1014_v58 = vld [vmem:[%s1524_s0 + $0x34] sm:$0xf0] }
  0x10   :  { %v894_v56 = vor.u32 %v1021_v53, %v891_v54  ;;  %v889_v59 = vld [vmem:[%s1524_s0 + $0x78] sm:$0xf]  ;;  %v1022_v60 = vld [vmem:[%s1524_s0 + $0x7c] sm:$0xf0]  ;;  %v784_v61 = vor.u32 %v1014_v58, %v783_v57  ;;  %v1031_v17 = vld [vmem:[%s1524_s0 + $0xdc] sm:$0xf] }
  0x11   :  { %v890_v62 = vor.u32 %v1022_v60, %v889_v59  ;;  %v54_v63 = vld [vmem:[%s1524_s0 + $0x40] sm:$0xff]  ;;  %v957_v15 = vld [vmem:[%s1524_s0 + $0xd8] sm:$0xf]  ;;  %v1026_v22 = vld [vmem:[%s1524_s0 + $0xa4] sm:$0xf0] }
  0x12   :  { %210 = vmatpush.bf16.msra.mxu0 %v1117_v8  ;;  %244 = vmatpush.bf16.msra.mxu1 %v1122_v9  ;;  %v1032_v16 = vld [vmem:[%s1524_s0 + $0xdc] sm:$0xf0]  ;;  %v1025_v23 = vld [vmem:[%s1524_s0 + $0xa4] sm:$0xf]  ;;  %v921_v24 = vld [vmem:[%s1524_s0 + $0xa8] sm:$0xf0] }
  0x13   :  { %352 = vmatpush.bf16.msra.mxu2 %v1117_v8  ;;  %386 = vmatpush.bf16.msra.mxu3 %v1122_v9  ;;  %v919_v21 = vld [vmem:[%s1524_s0 + $0xa0] sm:$0xf]  ;;  %v965_v27 = vld [vmem:[%s1524_s0 + $0xe8] sm:$0xf]  ;;  %v1034_v28 = vld [vmem:[%s1524_s0 + $0xec] sm:$0xf0] }
  0x14   :  { %v1033_v29 = vld [vmem:[%s1524_s0 + $0xec] sm:$0xf]  ;;  %v967_v30 = vld [vmem:[%s1524_s0 + $0xf0] sm:$0xf0]  ;;  %v927_v33 = vld [vmem:[%s1524_s0 + $0xb0] sm:$0xf] }
  0x15   :  { %v1028_v34 = vld [vmem:[%s1524_s0 + $0xb4] sm:$0xf0]  ;;  %v1027_v35 = vld [vmem:[%s1524_s0 + $0xb4] sm:$0xf]  ;;  %v929_v36 = vld [vmem:[%s1524_s0 + $0xb8] sm:$0xf0] }
  0x16   :  { %211 = vmatpush.bf16.msra.mxu0 %v1131_v10  ;;  %245 = vmatpush.bf16.msra.mxu1 %v1136_v11  ;;  %v973_v39 = vld [vmem:[%s1524_s0 + $0xf8] sm:$0xf]  ;;  %v1036_v40 = vld [vmem:[%s1524_s0 + $0xfc] sm:$0xf0]  ;;  %v1035_v41 = vld [vmem:[%s1524_s0 + $0xfc] sm:$0xf] }
  0x17   :  { %353 = vmatpush.bf16.msra.mxu2 %v1131_v10  ;;  %387 = vmatpush.bf16.msra.mxu3 %v1136_v11  ;;  %v975_v42 = vld [vmem:[%s1524_s0 + $0x100] sm:$0xf0]  ;;  %v935_v45 = vld [vmem:[%s1524_s0 + $0xc0] sm:$0xf]  ;;  %v1030_v46 = vld [vmem:[%s1524_s0 + $0xc4] sm:$0xf0] }
  0x18   :  { %v1029_v47 = vld [vmem:[%s1524_s0 + $0xc4] sm:$0xf]  ;;  %v937_v48 = vld [vmem:[%s1524_s0 + $0xc8] sm:$0xf0]  ;;  %v981_v52 = vld [vmem:[%s1524_s0 + $0x108] sm:$0xf] }
  0x19   :  { %v940_v51 = vor.u32 %v1029_v47, %v937_v48  ;;  %v1038_v53 = vld [vmem:[%s1524_s0 + $0x10c] sm:$0xf0]  ;;  %v1406_v54 = vld [vmem:[%s1525_s2] ss:$0 sm:$0xff] }
  0x1a   :  { %212 = vmatpush.bf16.msra.mxu0 %v1143_v12  ;;  %246 = vmatpush.bf16.msra.mxu1 %v1150_v13  ;;  %v982_v57 = vor.u32 %v1038_v53, %v981_v52 }
  0x1b   :  { %354 = vmatpush.bf16.msra.mxu2 %v1143_v12  ;;  %388 = vmatpush.bf16.msra.mxu3 %v1150_v13 }
  0x1d   :  { %849 = vmatmul.msk.bf16.vlgmr.msra.gmra.mxu1 %vm190_vm0, %v764_v18  ;;  %v959_v18 = vld [vmem:[%s1524_s0 + $0xe0] sm:$0xf0] }
  0x1e   :  { %499 = vmatpush.bf16.msrb.mxu1 %v1063_v0  ;;  %895 = vmatmul.msk.bf16.vlgmr.msra.gmra.mxu3 %vm190_vm0, %v870_v19  ;;  %v958_v19 = vor.u32 %v1032_v16, %v957_v15 }
  0x1f   :  { %533 = vmatpush.bf16.msrb.mxu3 %v1068_v1  ;;  %213 = vmatpush.bf16.msra.mxu0 %v1171_v20 }
  0x20   :  { %355 = vmatpush.bf16.msra.mxu2 %v1171_v20 }
  0x22   :  { %214 = vmatmul.bf16.vlgmr.msra.gmra.mxu0 %v760_v25  ;;  %500 = vmatpush.bf16.msrb.mxu1 %v1075_v2  ;;  %v920_v25 = vor.u32 %v1026_v22, %v919_v21 }
  0x23   :  { %650 = vmatpush.bf16.msrb.mxu0 %v1063_v0  ;;  %534 = vmatpush.bf16.msrb.mxu3 %v1080_v3  ;;  %v862_v0 = vld [vmem:[%s1524_s0 + $0x88] sm:$0xff] }
  0x24   :  { %684 = vmatpush.bf16.msrb.mxu2 %v1068_v1  ;;  %v84_v1 = vunpack.c.h.b16 %v54_v63 }
  0x25   :  { %356 = vmatmul.bf16.vlgmr.msra.gmra.mxu2 %v866_v26  ;;  %v924_v26 = vor.u32 %v1025_v23, %v921_v24 }
  0x26   :  { %501 = vmatpush.bf16.msrb.mxu1 %v1089_v4 }
  0x27   :  { %651 = vmatpush.bf16.msrb.mxu0 %v1075_v2  ;;  %535 = vmatpush.bf16.msrb.mxu3 %v1094_v5  ;;  %v317_v2 = vunpack.c.h.b16 %v862_v0 }
  0x28   :  { %685 = vmatpush.bf16.msrb.mxu2 %v1080_v3  ;;  %v94_v3 = vpack.c.b16 %v84_v1, %v84_v1 }
  0x2a   :  { %502 = vmatpush.bf16.msrb.mxu1 %v1103_v6 }
  0x2b   :  { %652 = vmatpush.bf16.msrb.mxu0 %v1089_v4  ;;  %536 = vmatpush.bf16.msrb.mxu3 %v1108_v7  ;;  %v83_v4 = vunpack.c.l.b16 %v54_v63 }
  0x2c   :  { %686 = vmatpush.bf16.msrb.mxu2 %v1094_v5  ;;  %v327_v5 = vpack.c.b16 %v317_v2, %v317_v2 }
  0x2d   :  { %850 = vmatmul.msk.bf16.gmra.mxu1 %vm190_vm0, %v772_v31  ;;  %v966_v31 = vor.u32 %v1034_v28, %v965_v27 }
  0x2e   :  { %896 = vmatmul.msk.bf16.gmra.mxu3 %vm190_vm0, %v878_v32  ;;  %503 = vmatpush.bf16.msrb.mxu1 %v1117_v8  ;;  %v970_v32 = vor.u32 %v1033_v29, %v967_v30 }
  0x2f   :  { %653 = vmatpush.bf16.msrb.mxu0 %v1103_v6  ;;  %537 = vmatpush.bf16.msrb.mxu3 %v1122_v9  ;;  %v316_v6 = vunpack.c.l.b16 %v862_v0  ;;  %v908_v0 = vld [vmem:[%s1524_s0 + $0xd0] sm:$0xff] }
  0x30   :  { %687 = vmatpush.bf16.msrb.mxu2 %v1108_v7  ;;  %v93_v7 = vpack.c.b16 %v83_v4, %v83_v4  ;;  %v467_v2 = vunpack.c.l.b16 %v908_v0 }
  0x32   :  { %219 = vmatmul.bf16.gmra.mxu0 %v768_v37  ;;  %504 = vmatpush.bf16.msrb.mxu1 %v1131_v10  ;;  %v928_v37 = vor.u32 %v1028_v34, %v927_v33 }
  0x33   :  { %654 = vmatpush.bf16.msrb.mxu0 %v1117_v8  ;;  %538 = vmatpush.bf16.msrb.mxu3 %v1136_v11  ;;  %v326_v8 = vpack.c.b16 %v316_v6, %v316_v6  ;;  %v954_v6 = vld [vmem:[%s1524_s0 + $0x118] sm:$0xff] }
  0x34   :  { %688 = vmatpush.bf16.msrb.mxu2 %v1122_v9  ;;  %v911_v9 = vld [vmem:[%s1524_s0 + $0x90] sm:$0xf] }
  0x35   :  { %361 = vmatmul.bf16.gmra.mxu2 %v874_v38  ;;  %v932_v38 = vor.u32 %v1027_v35, %v929_v36 }
  0x36   :  { %505 = vmatpush.bf16.msrb.mxu1 %v1143_v12 }
  0x37   :  { %655 = vmatpush.bf16.msrb.mxu0 %v1131_v10  ;;  %539 = vmatpush.bf16.msrb.mxu3 %v1150_v13  ;;  %v1024_v10 = vld [vmem:[%s1524_s0 + $0x94] sm:$0xf0] }
  0x38   :  { %689 = vmatpush.bf16.msrb.mxu2 %v1136_v11  ;;  %v1023_v11 = vld [vmem:[%s1524_s0 + $0x94] sm:$0xf] }
  0x3a   :  { %506 = vmatpush.bf16.msrb.mxu1 %v1171_v20 }
  0x3b   :  { %656 = vmatpush.bf16.msrb.mxu0 %v1143_v12  ;;  %v913_v12 = vld [vmem:[%s1524_s0 + $0x98] sm:$0xf0] }
  0x3c   :  { %690 = vmatpush.bf16.msrb.mxu2 %v1150_v13  ;;  %v912_v13 = vor.u32 %v1024_v10, %v911_v9  ;;  %v916_v14 = vor.u32 %v1023_v11, %v913_v12  ;;  %v477_v11 = vpack.c.b16 %v467_v2, %v467_v2  ;;  %v618_v12 = vunpack.c.l.b16 %v954_v6 }
  0x3d   :  { %851 = vmatmul.msk.bf16.gmra.mxu1 %vm190_vm0, %v780_v43  ;;  %v974_v43 = vor.u32 %v1036_v40, %v973_v39 }
  0x3e   :  { %897 = vmatmul.msk.bf16.gmra.mxu3 %vm190_vm0, %v886_v44  ;;  %v978_v44 = vor.u32 %v1035_v41, %v975_v42 }
  0x3f   :  { %657 = vmatpush.bf16.msrb.mxu0 %v1171_v20  ;;  %v962_v20 = vor.u32 %v1031_v17, %v959_v18  ;;  %v619_v17 = vunpack.c.h.b16 %v954_v6 }
  0x41   :  { %v629_v23 = vpack.c.b16 %v619_v17, %v619_v17 }
  0x42   :  { %224 = vmatmul.bf16.gmra.mxu0 %v776_v49  ;;  %v936_v49 = vor.u32 %v1030_v46, %v935_v45 }
  0x45   :  { %366 = vmatmul.bf16.gmra.mxu2 %v882_v50 }
  0x4d   :  { %852 = vmatmul.msk.bf16.gmra.mxu1 %vm190_vm0, %v788_v55  ;;  %v1037_v55 = vld [vmem:[%s1524_s0 + $0x10c] sm:$0xf] }
  0x4e   :  { %898 = vmatmul.msk.bf16.gmra.mxu3 %vm190_vm0, %v894_v56  ;;  %v983_v56 = vld [vmem:[%s1524_s0 + $0x110] sm:$0xf0] }
  0x4f   :  { %v986_v59 = vor.u32 %v1037_v55, %v983_v56 }
  0x52   :  { %229 = vmatmul.bf16.gmra.mxu0 %v784_v61 }
  0x55   :  { %371 = vmatmul.bf16.gmra.mxu2 %v890_v62 }
  0x5d   :  { %853 = vmatmul.msk.bf16.gmra.mxu1 %vm190_vm0, %v94_v3 }
  0x5e   :  { %899 = vmatmul.msk.bf16.gmra.mxu3 %vm190_vm0, %v327_v5  ;;  %v468_v5 = vunpack.c.h.b16 %v908_v0 }
  0x60   :  { %v478_v16 = vpack.c.b16 %v468_v5, %v468_v5 }
  0x62   :  { %234 = vmatmul.bf16.gmra.mxu0 %v93_v7 }
  0x65   :  { %376 = vmatmul.bf16.gmra.mxu2 %v326_v8 }
  0x6d   :  { %507 = vmatmul.bf16.vlgmr.msrb.gmra.mxu1 %v912_v13 }
  0x6e   :  { %941 = vmatmul.msk.bf16.vlgmr.msrb.gmra.mxu3 %vm190_vm0, %v916_v14 }
  0x72   :  { %658 = vmatmul.bf16.vlgmr.msrb.gmra.mxu0 %v958_v19 }
  0x75   :  { %987 = vmatmul.msk.bf16.vlgmr.msrb.gmra.mxu2 %vm190_vm0, %v962_v20  ;;  %v628_v20 = vpack.c.b16 %v618_v12, %v618_v12 }
  0x7d   :  { %512 = vmatmul.bf16.gmra.mxu1 %v920_v25 }
  0x7e   :  { %942 = vmatmul.msk.bf16.gmra.mxu3 %vm190_vm0, %v924_v26 }
  0x82   :  { %663 = vmatmul.bf16.gmra.mxu0 %v966_v31 }
  0x85   :  { %988 = vmatmul.msk.bf16.gmra.mxu2 %vm190_vm0, %v970_v32 }
  0x8d   :  { %517 = vmatmul.bf16.gmra.mxu1 %v928_v37 }
  0x8e   :  { %943 = vmatmul.msk.bf16.gmra.mxu3 %vm190_vm0, %v932_v38 }
  0x92   :  { %668 = vmatmul.bf16.gmra.mxu0 %v974_v43 }
  0x95   :  { %989 = vmatmul.msk.bf16.gmra.mxu2 %vm190_vm0, %v978_v44 }
  0x9a   :  { %v248_v50 = vpop.f32.mrf.mxu1 }
  0x9d   :  { %522 = vmatmul.bf16.gmra.mxu1 %v936_v49 }
  0x9e   :  { %944 = vmatmul.msk.bf16.gmra.mxu3 %vm190_vm0, %v940_v51 }
  0x9f   :  { %v215_v58 = vpop.f32.mrf.mxu0 }
  0xa0   :  { %v216_v60 = vadd.f32 %v1406_v54, %v215_v58 }
  0xa1   :  { %v390_v62 = vpop.f32.mrf.mxu3 }
  0xa2   :  { %v249_v61 = vadd.f32 %v248_v50, %v216_v60  ;;  %673 = vmatmul.bf16.gmra.mxu0 %v982_v57  ;;  %v250_v63 = vpop.f32.mrf.mxu1 }
  0xa4   :  { %v272_v13 = vmax.f32 %v249_v61, 0.0 }
  0xa5   :  { %990 = vmatmul.msk.bf16.gmra.mxu2 %vm190_vm0, %v986_v59 }
  0xa7   :  { %v217_v4 = vpop.f32.mrf.mxu0 }
  0xa8   :  { %v357_v1 = vpop.f32.mrf.mxu2  ;;  %v218_v7 = vadd.f32 %v1406_v54, %v217_v4 }
  0xa9   :  { %v358_v3 = vadd.f32 %v1406_v54, %v357_v1  ;;  %v392_v10 = vpop.f32.mrf.mxu3 }
  0xaa   :  { %v251_v9 = vadd.f32 %v250_v63, %v218_v7  ;;  %v253_v15 = vpop.f32.mrf.mxu1 }
  0xab   :  { %v391_v8 = vadd.f32 %v390_v62, %v358_v3 }
  0xac   :  { %v273_v28 = vmax.f32 %v251_v9, 0.0 }
  0xad   :  { %v414_v14 = vmax.f32 %v391_v8, 0.0  ;;  %527 = vmatmul.bf16.gmra.mxu1 %v477_v11 }
  0xae   :  { %945 = vmatmul.msk.bf16.gmra.mxu3 %vm190_vm0, %v478_v16 }
  0xaf   :  { %v1425_v18 = vmax.f32 %v272_v13, %v414_v14  ;;  %v220_v22 = vpop.f32.mrf.mxu0 }
  0xb0   :  { %v359_v19 = vpop.f32.mrf.mxu2  ;;  %v221_v24 = vadd.f32 %v1406_v54, %v220_v22 }
  0xb1   :  { %v360_v21 = vadd.f32 %v1406_v54, %v359_v19  ;;  %v395_v27 = vpop.f32.mrf.mxu3 }
  0xb2   :  { %v254_v26 = vadd.f32 %v253_v15, %v221_v24  ;;  %678 = vmatmul.bf16.gmra.mxu0 %v628_v20  ;;  %v255_v30 = vpop.f32.mrf.mxu1 }
  0xb3   :  { %v393_v25 = vadd.f32 %v392_v10, %v360_v21 }
  0xb4   :  { %v274_v39 = vmax.f32 %v254_v26, 0.0 }
  0xb5   :  { %v415_v29 = vmax.f32 %v393_v25, 0.0  ;;  %991 = vmatmul.msk.bf16.gmra.mxu2 %vm190_vm0, %v629_v23 }
  0xb7   :  { %v1431_v31 = vmax.f32 %v273_v28, %v415_v29  ;;  %v222_v34 = vpop.f32.mrf.mxu0 }
  0xb8   :  { %v362_v32 = vpop.f32.mrf.mxu2  ;;  %v223_v35 = vadd.f32 %v1406_v54, %v222_v34 }
  0xb9   :  { %v363_v33 = vadd.f32 %v1406_v54, %v362_v32  ;;  %v397_v38 = vpop.f32.mrf.mxu3 }
  0xba   :  { %v256_v37 = vadd.f32 %v255_v30, %v223_v35  ;;  %v258_v41 = vpop.f32.mrf.mxu1 }
  0xbb   :  { %v396_v36 = vadd.f32 %v395_v27, %v363_v33 }
  0xbc   :  { %v275_v50 = vmax.f32 %v256_v37, 0.0 }
  0xbd   :  { %v416_v40 = vmax.f32 %v396_v36, 0.0 }
  0xbf   :  { %v1435_v42 = vmax.f32 %v274_v39, %v416_v40  ;;  %v225_v45 = vpop.f32.mrf.mxu0 }
  0xc0   :  { %v364_v43 = vpop.f32.mrf.mxu2  ;;  %v226_v46 = vadd.f32 %v1406_v54, %v225_v45 }
  0xc1   :  { %v365_v44 = vadd.f32 %v1406_v54, %v364_v43  ;;  %v400_v49 = vpop.f32.mrf.mxu3 }
  0xc2   :  { %v259_v48 = vadd.f32 %v258_v41, %v226_v46  ;;  %v260_v52 = vpop.f32.mrf.mxu1 }
  0xc3   :  { %v398_v47 = vadd.f32 %v397_v38, %v365_v44 }
  0xc4   :  { %v276_v62 = vmax.f32 %v259_v48, 0.0 }
  0xc5   :  { %v417_v51 = vmax.f32 %v398_v47, 0.0 }
  0xc7   :  { %v1439_v53 = vmax.f32 %v275_v50, %v417_v51  ;;  %v227_v57 = vpop.f32.mrf.mxu0 }
  0xc8   :  { %v367_v55 = vpop.f32.mrf.mxu2  ;;  %v228_v58 = vadd.f32 %v1406_v54, %v227_v57 }
  0xc9   :  { %v368_v56 = vadd.f32 %v1406_v54, %v367_v55  ;;  %v402_v61 = vpop.f32.mrf.mxu3 }
  0xca   :  { %v261_v60 = vadd.f32 %v260_v52, %v228_v58  ;;  %v263_v0 = vpop.f32.mrf.mxu1 }
  0xcb   :  { %v401_v59 = vadd.f32 %v400_v49, %v368_v56 }
  0xcc   :  { %v277_v9 = vmax.f32 %v261_v60, 0.0 }
  0xcd   :  { %v418_v63 = vmax.f32 %v401_v59, 0.0 }
  0xcf   :  { %v1443_v1 = vmax.f32 %v276_v62, %v418_v63  ;;  %v230_v4 = vpop.f32.mrf.mxu0 }
  0xd0   :  { %v369_v2 = vpop.f32.mrf.mxu2  ;;  %v231_v5 = vadd.f32 %v1406_v54, %v230_v4 }
  0xd1   :  { %v370_v3 = vadd.f32 %v1406_v54, %v369_v2  ;;  %v405_v8 = vpop.f32.mrf.mxu3 }
  0xd2   :  { %v264_v7 = vadd.f32 %v263_v0, %v231_v5  ;;  %v265_v11 = vpop.f32.mrf.mxu1 }
  0xd3   :  { %v403_v6 = vadd.f32 %v402_v61, %v370_v3 }
  0xd4   :  { %v278_v21 = vmax.f32 %v264_v7, 0.0 }
  0xd5   :  { %v419_v10 = vmax.f32 %v403_v6, 0.0 }
  0xd7   :  { %v1447_v12 = vmax.f32 %v277_v9, %v419_v10  ;;  %v232_v15 = vpop.f32.mrf.mxu0 }
  0xd8   :  { %v372_v13 = vpop.f32.mrf.mxu2  ;;  %v233_v16 = vadd.f32 %v1406_v54, %v232_v15 }
  0xd9   :  { %v373_v14 = vadd.f32 %v1406_v54, %v372_v13  ;;  %v407_v20 = vpop.f32.mrf.mxu3 }
  0xda   :  { %v266_v19 = vadd.f32 %v265_v11, %v233_v16  ;;  %v268_v23 = vpop.f32.mrf.mxu1 }
  0xdb   :  { %v406_v17 = vadd.f32 %v405_v8, %v373_v14 }
  0xdc   :  { %v279_v33 = vmax.f32 %v266_v19, 0.0 }
  0xdd   :  { %v420_v22 = vmax.f32 %v406_v17, 0.0 }
  0xdf   :  { %v1451_v24 = vmax.f32 %v278_v21, %v420_v22  ;;  %v235_v27 = vpop.f32.mrf.mxu0 }
  0xe0   :  { %v374_v25 = vpop.f32.mrf.mxu2  ;;  %v236_v28 = vadd.f32 %v1406_v54, %v235_v27 }
  0xe1   :  { %v375_v26 = vadd.f32 %v1406_v54, %v374_v25  ;;  %v410_v32 = vpop.f32.mrf.mxu3 }
  0xe2   :  { %v269_v30 = vadd.f32 %v268_v23, %v236_v28  ;;  %v270_v35 = vpop.f32.mrf.mxu1 }
  0xe3   :  { %v408_v29 = vadd.f32 %v407_v20, %v375_v26 }
  0xe4   :  { %v280_v43 = vmax.f32 %v269_v30, 0.0 }
  0xe5   :  { %v421_v34 = vmax.f32 %v408_v29, 0.0 }
  0xe7   :  { %v1455_v36 = vmax.f32 %v279_v33, %v421_v34  ;;  %v237_v39 = vpop.f32.mrf.mxu0 }
  0xe8   :  { %v377_v37 = vpop.f32.mrf.mxu2 }
  0xe9   :  { %v378_v38 = vadd.f32 %v1406_v54, %v377_v37  ;;  %v412_v41 = vpop.f32.mrf.mxu3 }
  0xea   :  { %v508_v45 = vpop.f32.mrf.mxu1 }
  0xeb   :  { %v411_v40 = vadd.f32 %v410_v32, %v378_v38  ;;  %v509_v48 = vadd.f32 %v1406_v54, %v508_v45 }
  0xed   :  { %v422_v44 = vmax.f32 %v411_v40, 0.0 }
  0xef   :  { %v1458_v46 = vmax.f32 %v280_v43, %v422_v44  ;;  %v659_v49 = vpop.f32.mrf.mxu0 }
  0xf0   :  { %v379_v47 = vpop.f32.mrf.mxu2  ;;  %v660_v51 = vadd.f32 %v1406_v54, %v659_v49 }
  0xf1   :  { %v541_v50 = vpop.f32.mrf.mxu3 }
  0xf2   :  { %v542_v52 = vadd.f32 %v541_v50, %v509_v48  ;;  %v510_v55 = vpop.f32.mrf.mxu1 }
  0xf3   :  { %v511_v61 = vadd.f32 %v1406_v54, %v510_v55 }
  0xf4   :  { %v565_v56 = vmax.f32 %v542_v52, 0.0 }
  0xf6   :  { %v574_v60 = vmax.f32 %v1425_v18, %v565_v56 }
  0xf7   :  { %v661_v59 = vpop.f32.mrf.mxu0 }
  0xf8   :  { %v692_v57 = vpop.f32.mrf.mxu2  ;;  %v662_v5 = vadd.f32 %v1406_v54, %v661_v59 }
  0xf9   :  { %v693_v58 = vadd.f32 %v692_v57, %v660_v51  ;;  %v543_v63 = vpop.f32.mrf.mxu3 }
  0xfa   :  { %v544_v2 = vadd.f32 %v543_v63, %v511_v61  ;;  %v513_v3 = vpop.f32.mrf.mxu1 }
  0xfb   :  { %v716_v62 = vmax.f32 %v693_v58, 0.0  ;;  %v514_v18 = vadd.f32 %v1406_v54, %v513_v3 }
  0xfc   :  { %v566_v6 = vmax.f32 %v544_v2, 0.0 }
  0xfd   :  { %v725_v0 = vmax.f32 %v574_v60, %v716_v62 }
  0xfe   :  { %v575_v10 = vmax.f32 %v1431_v31, %v566_v6 }
  0xff   :  { %v734_v4 = vpack.c.bf16 %v725_v0, %v725_v0  ;;  %v664_v9 = vpop.f32.mrf.mxu0 }
 0x100   :  { %v694_v7 = vpop.f32.mrf.mxu2  ;;  %v665_v15 = vadd.f32 %v1406_v54, %v664_v9 }
 0x101   :  { %744 = vst.msk [vmem:[%s1526_s3] sm:$0xf] %vm743_vm1, %v734_v4  ;;  %v695_v8 = vadd.f32 %v694_v7, %v662_v5  ;;  %v546_v13 = vpop.f32.mrf.mxu3 }
 0x102   :  { %v547_v16 = vadd.f32 %v546_v13, %v514_v18  ;;  %v515_v17 = vpop.f32.mrf.mxu1 }
 0x103   :  { %v717_v11 = vmax.f32 %v695_v8, 0.0  ;;  %v516_v31 = vadd.f32 %v1406_v54, %v515_v17 }
 0x104   :  { %v567_v20 = vmax.f32 %v547_v16, 0.0 }
 0x105   :  { %v726_v14 = vmax.f32 %v575_v10, %v717_v11 }
 0x106   :  { %v576_v25 = vmax.f32 %v1435_v42, %v567_v20 }
 0x107   :  { %v735_v19 = vpack.c.bf16 %v726_v14, %v726_v14  ;;  %v666_v23 = vpop.f32.mrf.mxu0 }
 0x108   :  { %v697_v21 = vpop.f32.mrf.mxu2  ;;  %v667_v33 = vadd.f32 %v1406_v54, %v666_v23 }
 0x109   :  { %745 = vst.msk [vmem:[%s1526_s3 + $0x4] sm:$0xf] %vm743_vm1, %v735_v19  ;;  %v698_v22 = vadd.f32 %v697_v21, %v665_v15  ;;  %v548_v27 = vpop.f32.mrf.mxu3 }
 0x10a   :  { %v549_v29 = vadd.f32 %v548_v27, %v516_v31  ;;  %v518_v30 = vpop.f32.mrf.mxu1 }
 0x10b   :  { %v718_v26 = vmax.f32 %v698_v22, 0.0  ;;  %v519_v37 = vadd.f32 %v1406_v54, %v518_v30 }
 0x10c   :  { %v568_v34 = vmax.f32 %v549_v29, 0.0 }
 0x10d   :  { %v727_v28 = vmax.f32 %v576_v25, %v718_v26 }
 0x10e   :  { %v577_v39 = vmax.f32 %v1439_v53, %v568_v34 }
 0x10f   :  { %v736_v32 = vpack.c.bf16 %v727_v28, %v727_v28  ;;  %v669_v38 = vpop.f32.mrf.mxu0 }
 0x110   :  { %v699_v35 = vpop.f32.mrf.mxu2  ;;  %v670_v44 = vadd.f32 %v1406_v54, %v669_v38 }
 0x111   :  { %746 = vst.msk [vmem:[%s1526_s3 + $0x8] sm:$0xf] %vm743_vm1, %v736_v32  ;;  %v700_v42 = vadd.f32 %v699_v35, %v667_v33  ;;  %v551_v41 = vpop.f32.mrf.mxu3 }
 0x112   :  { %v552_v45 = vadd.f32 %v551_v41, %v519_v37  ;;  %v520_v47 = vpop.f32.mrf.mxu1 }
 0x113   :  { %v719_v40 = vmax.f32 %v700_v42, 0.0  ;;  %v521_v53 = vadd.f32 %v1406_v54, %v520_v47 }
 0x114   :  { %v569_v49 = vmax.f32 %v552_v45, 0.0 }
 0x115   :  { %v728_v43 = vmax.f32 %v577_v39, %v719_v40 }
 0x116   :  { %v578_v55 = vmax.f32 %v1443_v1, %v569_v49 }
 0x117   :  { %v737_v48 = vpack.c.bf16 %v728_v43, %v728_v43  ;;  %v671_v52 = vpop.f32.mrf.mxu0 }
 0x118   :  { %v702_v50 = vpop.f32.mrf.mxu2  ;;  %v672_v62 = vadd.f32 %v1406_v54, %v671_v52 }
 0x119   :  { %747 = vst.msk [vmem:[%s1526_s3 + $0xc] sm:$0xf] %vm743_vm1, %v737_v48  ;;  %v703_v51 = vadd.f32 %v702_v50, %v670_v44  ;;  %v553_v57 = vpop.f32.mrf.mxu3 }
 0x11a   :  { %v554_v59 = vadd.f32 %v553_v57, %v521_v53  ;;  %v523_v60 = vpop.f32.mrf.mxu1 }
 0x11b   :  { %v720_v56 = vmax.f32 %v703_v51, 0.0  ;;  %v524_v2 = vadd.f32 %v1406_v54, %v523_v60 }
 0x11c   :  { %v570_v63 = vmax.f32 %v554_v59, 0.0 }
 0x11d   :  { %v729_v58 = vmax.f32 %v578_v55, %v720_v56 }
 0x11e   :  { %v579_v4 = vmax.f32 %v1447_v12, %v570_v63 }
 0x11f   :  { %v738_v61 = vpack.c.bf16 %v729_v58, %v729_v58  ;;  %v674_v3 = vpop.f32.mrf.mxu0 }
 0x120   :  { %v704_v0 = vpop.f32.mrf.mxu2  ;;  %v675_v18 = vadd.f32 %v1406_v54, %v674_v3 }
 0x121   :  { %748 = vst.msk [vmem:[%s1526_s3 + $0x10] sm:$0xf] %vm743_vm1, %v738_v61  ;;  %v705_v1 = vadd.f32 %v704_v0, %v672_v62  ;;  %v556_v6 = vpop.f32.mrf.mxu3 }
 0x122   :  { %v557_v8 = vadd.f32 %v556_v6, %v524_v2  ;;  %v525_v9 = vpop.f32.mrf.mxu1 }
 0x123   :  { %v721_v5 = vmax.f32 %v705_v1, 0.0  ;;  %v526_v12 = vadd.f32 %v1406_v54, %v525_v9 }
 0x124   :  { %v571_v11 = vmax.f32 %v557_v8, 0.0 }
 0x125   :  { %v730_v7 = vmax.f32 %v579_v4, %v721_v5 }
 0x126   :  { %v580_v16 = vmax.f32 %v1451_v24, %v571_v11 }
 0x127   :  { %v739_v10 = vpack.c.bf16 %v730_v7, %v730_v7  ;;  %v676_v15 = vpop.f32.mrf.mxu0 }
 0x128   :  { %v707_v13 = vpop.f32.mrf.mxu2  ;;  %v677_v25 = vadd.f32 %v1406_v54, %v676_v15 }
 0x129   :  { %749 = vst.msk [vmem:[%s1526_s3 + $0x14] sm:$0xf] %vm743_vm1, %v739_v10  ;;  %v708_v14 = vadd.f32 %v707_v13, %v675_v18  ;;  %v558_v19 = vpop.f32.mrf.mxu3 }
 0x12a   :  { %v559_v21 = vadd.f32 %v558_v19, %v526_v12  ;;  %v528_v22 = vpop.f32.mrf.mxu1 }
 0x12b   :  { %v722_v17 = vmax.f32 %v708_v14, 0.0  ;;  %v529_v27 = vadd.f32 %v1406_v54, %v528_v22 }
 0x12c   :  { %v572_v31 = vmax.f32 %v559_v21, 0.0 }
 0x12d   :  { %v731_v20 = vmax.f32 %v580_v16, %v722_v17 }
 0x12e   :  { %v581_v29 = vmax.f32 %v1455_v36, %v572_v31 }
 0x12f   :  { %v740_v23 = vpack.c.bf16 %v731_v20, %v731_v20  ;;  %v679_v28 = vpop.f32.mrf.mxu0 }
 0x130   :  { %v709_v26 = vpop.f32.mrf.mxu2  ;;  %v680_v34 = vadd.f32 %v1406_v54, %v679_v28 }
 0x131   :  { %750 = vst.msk [vmem:[%s1526_s3 + $0x18] sm:$0xf] %vm743_vm1, %v740_v23  ;;  %v710_v24 = vadd.f32 %v709_v26, %v677_v25  ;;  %v561_v32 = vpop.f32.mrf.mxu3 }
 0x132   :  { %v562_v35 = vadd.f32 %v561_v32, %v529_v27  ;;  %v530_v37 = vpop.f32.mrf.mxu1 }
 0x133   :  { %v723_v30 = vmax.f32 %v710_v24, 0.0 }
 0x134   :  { %v573_v38 = vmax.f32 %v562_v35, 0.0 }
 0x135   :  { %v732_v33 = vmax.f32 %v581_v29, %v723_v30 }
 0x136   :  { %v582_v43 = vmax.f32 %v1458_v46, %v573_v38 }
 0x137   :  { %v741_v42 = vpack.c.bf16 %v732_v33, %v732_v33  ;;  %v681_v41 = vpop.f32.mrf.mxu0 }
 0x138   :  { %v712_v39 = vpop.f32.mrf.mxu2 }
 0x139   :  { %751 = vst.msk [vmem:[%s1526_s3 + $0x1c] sm:$0xf] %vm743_vm1, %v741_v42  ;;  %v713_v40 = vadd.f32 %v712_v39, %v680_v34  ;;  %v563_v44 = vpop.f32.mrf.mxu3 }
 0x13b   :  { %v724_v36 = vmax.f32 %v713_v40, 0.0 }
 0x13d   :  { %v733_v45 = vmax.f32 %v582_v43, %v724_v36 }
 0x13f   :  { %v742_v47 = vpack.c.bf16 %v733_v45, %v733_v45 }
 0x140   :  { %v714_v48 = vpop.f32.mrf.mxu2 }
 0x141   :  { %752 = vst.msk [vmem:[%s1526_s3 + $0x20] sm:$0xf] %vm743_vm1, %v742_v47 }

// kernel: forward.6
= control target key start
LH: loop header
LB: loop body
LE: loop exit
PB: predicated region body
PF: predicated region fallthrough
CT: control target
= control target key end

     0   :  { %vm558_vm0 = vcmask 1040384   ;;  %vm559_vm1 = vcmask 1041408   ;;  %vm554_vm2 = vcmask 285696   ;;  %vm1288_vm3 = vcmask 1043456   ;;  %s2951_s1 = inlined_call_operand.vmem [shape: bf16[675,175], index: 1, kind: input, shape index: {}]   ;;  %s2952_s0 = inlined_call_operand.vmem [shape: bf16[4,8,675], index: 0, kind: input, shape index: {}]   ;;  %s2953_s2 = inlined_call_operand.vmem [shape: f32[1,175], index: 2, kind: input, shape index: {}]   ;;  %s2954_s3 = inlined_call_operand.vmem [shape: bf16[8,175], index: 3, kind: output, shape index: {}]  }
   0x1   :  { %v1354_v0 = vld [vmem:[%s2951_s1 + $0x70] sm:$0xf]  ;;  %v1664_v1 = vld [vmem:[%s2951_s1 + $0x74] sm:$0xf0]  ;;  %v1346_v11 = vld [vmem:[%s2951_s1 + $0x60] sm:$0xf] }
   0x2   :  { %v1418_v2 = vld [vmem:[%s2951_s1 + $0xf0] sm:$0xf]  ;;  %v1764_v3 = vor.u32 %v1664_v1, %v1354_v0  ;;  %v1680_v4 = vld [vmem:[%s2951_s1 + $0xf4] sm:$0xf0]  ;;  %v1662_v13 = vld [vmem:[%s2951_s1 + $0x64] sm:$0xf0] }
   0x3   :  { %v1482_v5 = vld [vmem:[%s2951_s1 + $0x170] sm:$0xf]  ;;  %v1696_v6 = vld [vmem:[%s2951_s1 + $0x174] sm:$0xf0]  ;;  %v1775_v7 = vor.u32 %v1680_v4, %v1418_v2  ;;  %v1410_v14 = vld [vmem:[%s2951_s1 + $0xe0] sm:$0xf]  ;;  %v1802_v16 = vor.u32 %v1662_v13, %v1346_v11 }
   0x4   :  { %3076 = vst [vmem:[#allocation2_spill] sm:$0xff] %v1764_v3  ;;  %v1777_v8 = vor.u32 %v1696_v6, %v1482_v5  ;;  %v1546_v9 = vld [vmem:[%s2951_s1 + $0x1f0] sm:$0xf]  ;;  %v1712_v10 = vld [vmem:[%s2951_s1 + $0x1f4] sm:$0xf0]  ;;  %568 = vmatpush.bf16.msra.mxu0 %v1764_v3  ;;  %vm1289_vm4 = vcmask 384004  }
   0x5   :  { %3077 = vst [vmem:[#allocation3_spill] sm:$0xff] %v1775_v7  ;;  %v1789_v12 = vor.u32 %v1712_v10, %v1546_v9  ;;  %v1678_v15 = vld [vmem:[%s2951_s1 + $0xe4] sm:$0xf0]  ;;  %581 = vmatpush.bf16.msra.mxu1 %v1775_v7  ;;  %v1474_v18 = vld [vmem:[%s2951_s1 + $0x160] sm:$0xf]  ;;  %vm1290_vm5 = vmor %vm1289_vm4, %vm1288_vm3 }
   0x6   :  { %3078 = vst [vmem:[#allocation4_spill] sm:$0xff] %v1777_v8  ;;  %594 = vmatpush.bf16.msra.mxu2 %v1777_v8  ;;  %v1804_v17 = vor.u32 %v1678_v15, %v1410_v14  ;;  %v1694_v19 = vld [vmem:[%s2951_s1 + $0x164] sm:$0xf0]  ;;  %v1538_v20 = vld [vmem:[%s2951_s1 + $0x1e0] sm:$0xf] }
   0x7   :  { %3079 = vst [vmem:[#allocation5_spill] sm:$0xff] %v1802_v16  ;;  %607 = vmatpush.bf16.msra.mxu3 %v1789_v12  ;;  %v1816_v21 = vor.u32 %v1694_v19, %v1474_v18  ;;  %v1710_v22 = vld [vmem:[%s2951_s1 + $0x1e4] sm:$0xf0]  ;;  %v1338_v23 = vld [vmem:[%s2951_s1 + $0x50] sm:$0xf] }
   0x8   :  { %3080 = vst [vmem:[#allocation6_spill] sm:$0xff] %v1804_v17  ;;  %v1660_v24 = vld [vmem:[%s2951_s1 + $0x54] sm:$0xf0]  ;;  %v1827_v25 = vor.u32 %v1710_v22, %v1538_v20  ;;  %v1402_v26 = vld [vmem:[%s2951_s1 + $0xd0] sm:$0xf]  ;;  %569 = vmatpush.bf16.msra.mxu0 %v1802_v16 }
   0x9   :  { %v1676_v27 = vld [vmem:[%s2951_s1 + $0xd4] sm:$0xf0]  ;;  %v1466_v28 = vld [vmem:[%s2951_s1 + $0x150] sm:$0xf]  ;;  %v1839_v29 = vor.u32 %v1660_v24, %v1338_v23  ;;  %582 = vmatpush.bf16.msra.mxu1 %v1804_v17  ;;  %v1330_v35 = vld [vmem:[%s2951_s1 + $0x40] sm:$0xf] }
   0xa   :  { %3081 = vst [vmem:[#allocation7_spill] sm:$0xff] %v1827_v25  ;;  %v1692_v30 = vld [vmem:[%s2951_s1 + $0x154] sm:$0xf0]  ;;  %v1530_v31 = vld [vmem:[%s2951_s1 + $0x1d0] sm:$0xf]  ;;  %595 = vmatpush.bf16.msra.mxu2 %v1816_v21  ;;  %v1852_v33 = vor.u32 %v1676_v27, %v1402_v26 }
   0xb   :  { %3082 = vst [vmem:[#allocation8_spill] sm:$0xff] %v1839_v29  ;;  %v1708_v32 = vld [vmem:[%s2951_s1 + $0x1d4] sm:$0xf0]  ;;  %v1854_v34 = vor.u32 %v1692_v30, %v1466_v28  ;;  %v1658_v36 = vld [vmem:[%s2951_s1 + $0x44] sm:$0xf0]  ;;  %608 = vmatpush.bf16.msra.mxu3 %v1827_v25 }
   0xc   :  { %3083 = vst [vmem:[#allocation9_spill] sm:$0xff] %v1852_v33  ;;  %v1394_v37 = vld [vmem:[%s2951_s1 + $0xc0] sm:$0xf]  ;;  %v1866_v38 = vor.u32 %v1708_v32, %v1530_v31  ;;  %v1674_v39 = vld [vmem:[%s2951_s1 + $0xc4] sm:$0xf0]  ;;  %570 = vmatpush.bf16.msra.mxu0 %v1839_v29  ;;  %v1884_v44 = vor.u32 %v1658_v36, %v1330_v35 }
   0xd   :  { %v1458_v40 = vld [vmem:[%s2951_s1 + $0x140] sm:$0xf]  ;;  %v1690_v41 = vld [vmem:[%s2951_s1 + $0x144] sm:$0xf0]  ;;  %583 = vmatpush.bf16.msra.mxu1 %v1852_v33  ;;  %v1888_v45 = vor.u32 %v1674_v39, %v1394_v37  ;;  %v1322_v47 = vld [vmem:[%s2951_s1 + $0x30] sm:$0xf] }
   0xe   :  { %3084 = vst [vmem:[#allocation10_spill] sm:$0xff] %v1866_v38  ;;  %v1522_v42 = vld [vmem:[%s2951_s1 + $0x1c0] sm:$0xf]  ;;  %v1706_v43 = vld [vmem:[%s2951_s1 + $0x1c4] sm:$0xf0]  ;;  %596 = vmatpush.bf16.msra.mxu2 %v1854_v34  ;;  %v1890_v46 = vor.u32 %v1690_v41, %v1458_v40  ;;  %v1734_v37 = vmov 65535  }
   0xf   :  { %3085 = vst [vmem:[#allocation11_spill] sm:$0xff] %v1884_v44  ;;  %v1656_v48 = vld [vmem:[%s2951_s1 + $0x34] sm:$0xf0]  ;;  %v1386_v49 = vld [vmem:[%s2951_s1 + $0xb0] sm:$0xf]  ;;  %609 = vmatpush.bf16.msra.mxu3 %v1866_v38  ;;  %v1902_v50 = vor.u32 %v1706_v43, %v1522_v42  ;;  %v560_v39 = vsel %vm558_vm0, 4294967295, %v1734_v37 }
  0x10   :  { %v1672_v51 = vld [vmem:[%s2951_s1 + $0xb4] sm:$0xf0]  ;;  %v1450_v52 = vld [vmem:[%s2951_s1 + $0x130] sm:$0xf]  ;;  %571 = vmatpush.bf16.msra.mxu0 %v1884_v44  ;;  %v1920_v56 = vor.u32 %v1656_v48, %v1322_v47  ;;  %v1314_v59 = vld [vmem:[%s2951_s1 + $0x20] sm:$0xf] }
  0x11   :  { %3086 = vst [vmem:[#allocation12_spill] sm:$0xff] %v1902_v50  ;;  %v1688_v53 = vld [vmem:[%s2951_s1 + $0x134] sm:$0xf0]  ;;  %v1514_v54 = vld [vmem:[%s2951_s1 + $0x1b0] sm:$0xf]  ;;  %584 = vmatpush.bf16.msra.mxu1 %v1888_v45  ;;  %v1924_v57 = vor.u32 %v1672_v51, %v1386_v49  ;;  %v101_v40 = vld [vmem:[%s2952_s0] sm:$0xff] }
  0x12   :  { %v1704_v55 = vld [vmem:[%s2951_s1 + $0x1b4] sm:$0xf0]  ;;  %3087 = vst [vmem:[#allocation13_spill] sm:$0xff] %v1920_v56  ;;  %597 = vmatpush.bf16.msra.mxu2 %v1890_v46  ;;  %v1926_v58 = vor.u32 %v1688_v53, %v1450_v52  ;;  %v1654_v60 = vld [vmem:[%s2951_s1 + $0x24] sm:$0xf0] }
  0x13   :  { %v1378_v61 = vld [vmem:[%s2951_s1 + $0xa0] sm:$0xf]  ;;  %610 = vmatpush.bf16.msra.mxu3 %v1902_v50  ;;  %v1938_v62 = vor.u32 %v1704_v55, %v1514_v54  ;;  %v1670_v63 = vld [vmem:[%s2951_s1 + $0xa4] sm:$0xf0]  ;;  %v1956_v5 = vor.u32 %v1654_v60, %v1314_v59  ;;  %v1306_v10 = vld [vmem:[%s2951_s1 + $0x10] sm:$0xf]  ;;  %v113_v60 = vunpack.c.h.b16 %v101_v40 }
  0x14   :  { %v1442_v0 = vld [vmem:[%s2951_s1 + $0x120] sm:$0xf]  ;;  %v1686_v1 = vld [vmem:[%s2951_s1 + $0x124] sm:$0xf0]  ;;  %572 = vmatpush.bf16.msra.mxu0 %v1920_v56  ;;  %v1960_v6 = vor.u32 %v1670_v63, %v1378_v61  ;;  %v1652_v11 = vld [vmem:[%s2951_s1 + $0x14] sm:$0xf0] }
  0x15   :  { %3088 = vst [vmem:[#allocation14_spill] sm:$0xff] %v1938_v62  ;;  %v1506_v2 = vld [vmem:[%s2951_s1 + $0x1a0] sm:$0xf]  ;;  %v1702_v4 = vld [vmem:[%s2951_s1 + $0x1a4] sm:$0xf0]  ;;  %585 = vmatpush.bf16.msra.mxu1 %v1924_v57  ;;  %v1962_v9 = vor.u32 %v1686_v1, %v1442_v0  ;;  %v1997_v24 = vor.u32 %v1652_v11, %v1306_v10  ;;  %v2050_v54 = vsel %vm559_vm1, %v560_v39, 0 }
  0x16   :  { %3089 = vst [vmem:[#allocation15_spill] sm:$0xff] %v1956_v5  ;;  %598 = vmatpush.bf16.msra.mxu2 %v1926_v58  ;;  %v1370_v13 = vld [vmem:[%s2951_s1 + $0x90] sm:$0xf]  ;;  %v1974_v14 = vor.u32 %v1702_v4, %v1506_v2  ;;  %v1668_v15 = vld [vmem:[%s2951_s1 + $0x94] sm:$0xf0]  ;;  %v102_v47 = vld [vmem:[%s2952_s0 + $0x8] sm:$0xff]  ;;  %v112_v4 = vunpack.c.l.b16 %v101_v40 }
  0x17   :  { %611 = vmatpush.bf16.msra.mxu3 %v1938_v62  ;;  %v1434_v18 = vld [vmem:[%s2951_s1 + $0x110] sm:$0xf]  ;;  %v1684_v19 = vld [vmem:[%s2951_s1 + $0x114] sm:$0xf0]  ;;  %v1994_v23 = vld [vmem:[%s2951_s1 + $0x2a0] sm:$0x33]  ;;  %v2011_v31 = vor.u32 %v1668_v15, %v1370_v13  ;;  %v114_v2 = vunpack.c.l.b16 %v102_v47  ;;  %v115_v13 = vunpack.c.h.b16 %v102_v47 }
  0x18   :  { %3090 = vst [vmem:[#allocation16_spill] sm:$0xff] %v1974_v14  ;;  %v1498_v20 = vld [vmem:[%s2951_s1 + $0x190] sm:$0xf]  ;;  %v1700_v22 = vld [vmem:[%s2951_s1 + $0x194] sm:$0xf0]  ;;  %573 = vmatpush.bf16.msra.mxu0 %v1956_v5  ;;  %v382_v30 = vunpack.c.l.b16 %v1994_v23  ;;  %v2013_v32 = vor.u32 %v1684_v19, %v1434_v18  ;;  %v2113_v40 = vpack.c.b16 %v112_v4, %v112_v4 }
  0x19   :  { %v1298_v26 = vld [vmem:[%s2951_s1] sm:$0xf]  ;;  %v1650_v27 = vld [vmem:[%s2951_s1 + $0x4] sm:$0xf0]  ;;  %586 = vmatpush.bf16.msra.mxu1 %v1960_v6  ;;  %3091 = vst [vmem:[#allocation17_spill] sm:$0xff] %v2011_v31  ;;  %v2026_v41 = vor.u32 %v1700_v22, %v1498_v20  ;;  %v2111_v39 = vpack.c.b16 %v114_v2, %v114_v2  ;;  %v2122_v47 = vpack.c.b16 %v115_v13, %v115_v13 }
  0x1a   :  { %v1362_v28 = vld [vmem:[%s2951_s1 + $0x80] sm:$0xf]  ;;  %599 = vmatpush.bf16.msra.mxu2 %v1962_v9  ;;  %3092 = vst [vmem:[#allocation18_spill] sm:$0xff] %v2013_v32  ;;  %v1666_v35 = vld [vmem:[%s2951_s1 + $0x84] sm:$0xf0]  ;;  %v468_v52 = vpack.c.b16 %v382_v30, %v382_v30  ;;  %v2047_v53 = vor.u32 %v1650_v27, %v1298_v26 }
  0x1b   :  { %v1426_v36 = vld [vmem:[%s2951_s1 + $0x100] sm:$0xf]  ;;  %612 = vmatpush.bf16.msra.mxu3 %v1974_v14  ;;  %3093 = vst [vmem:[#allocation19_spill] sm:$0xff] %v2026_v41  ;;  %v1682_v42 = vld [vmem:[%s2951_s1 + $0x104] sm:$0xf0]  ;;  %v2060_v61 = vor.u32 %v1666_v35, %v1362_v28  ;;  %v2101_v35 = vpack.c.b16 %v113_v60, %v113_v60 }
  0x1c   :  { %v1490_v43 = vld [vmem:[%s2951_s1 + $0x180] sm:$0xf]  ;;  %v1698_v48 = vld [vmem:[%s2951_s1 + $0x184] sm:$0xf0]  ;;  %v1610_v49 = vld [vmem:[%s2951_s1 + $0x270] sm:$0xf]  ;;  %574 = vmatpush.bf16.msra.mxu0 %v1997_v24  ;;  %v2062_v63 = vor.u32 %v1682_v42, %v1426_v36  ;;  %v2076_v15 = vand.u32 %v2050_v54, %v468_v52 }
  0x1d   :  { %v1728_v51 = vld [vmem:[%s2951_s1 + $0x274] sm:$0xf0]  ;;  %v1663_v55 = vld [vmem:[%s2951_s1 + $0x74] sm:$0xf]  ;;  %v1356_v59 = vld [vmem:[%s2951_s1 + $0x78] sm:$0xf0]  ;;  %587 = vmatpush.bf16.msra.mxu1 %v2011_v31  ;;  %v2071_v10 = vor.u32 %v1698_v48, %v1490_v43 }
  0x1e   :  { %600 = vmatpush.bf16.msra.mxu2 %v2013_v32  ;;  %3094 = vst [vmem:[#allocation20_spill] sm:$0xff] %v2060_v61  ;;  %v1679_v0 = vld [vmem:[%s2951_s1 + $0xf4] sm:$0xf]  ;;  %v1420_v1 = vld [vmem:[%s2951_s1 + $0xf8] sm:$0xf0]  ;;  %v2073_v11 = vor.u32 %v1728_v51, %v1610_v49  ;;  %v2078_v18 = vor.u32 %v1663_v55, %v1356_v59 }
  0x1f   :  { %3095 = vst [vmem:[#allocation21_spill] sm:$0xff] %v2062_v63  ;;  %613 = vmatpush.bf16.msra.mxu3 %v2026_v41  ;;  %v1602_v19 = vld [vmem:[%s2951_s1 + $0x260] sm:$0xf]  ;;  %v1726_v20 = vld [vmem:[%s2951_s1 + $0x264] sm:$0xf0]  ;;  %v2090_v26 = vor.u32 %v1679_v0, %v1420_v1 }
  0x20   :  { %3096 = vst [vmem:[#allocation22_spill] sm:$0xff] %v2071_v10  ;;  %v1626_v22 = vld [vmem:[%s2951_s1 + $0x290] sm:$0xf]  ;;  %575 = vmatpush.bf16.msra.mxu0 %v2047_v53  ;;  %v1732_v27 = vld [vmem:[%s2951_s1 + $0x294] sm:$0xf0]  ;;  %v2117_v42 = vor.u32 %v1726_v20, %v1602_v19 }
  0x21   :  { %3097 = vst [vmem:[#allocation23_spill] sm:$0xff] %v2076_v15  ;;  %v1661_v28 = vld [vmem:[%s2951_s1 + $0x64] sm:$0xf]  ;;  %v1348_v30 = vld [vmem:[%s2951_s1 + $0x68] sm:$0xf0]  ;;  %588 = vmatpush.bf16.msra.mxu1 %v2060_v61  ;;  %v2126_v48 = vor.u32 %v1732_v27, %v1626_v22 }
  0x22   :  { %3098 = vst [vmem:[#allocation24_spill] sm:$0xff] %v2078_v18  ;;  %601 = vmatpush.bf16.msra.mxu2 %v2062_v63  ;;  %v1677_v36 = vld [vmem:[%s2951_s1 + $0xe4] sm:$0xf]  ;;  %v1412_v37 = vld [vmem:[%s2951_s1 + $0xe8] sm:$0xf0]  ;;  %v2128_v49 = vor.u32 %v1661_v28, %v1348_v30 }
  0x23   :  { %3099 = vst [vmem:[#allocation25_spill] sm:$0xff] %v2090_v26  ;;  %614 = vmatpush.bf16.msra.mxu3 %v2071_v10  ;;  %v1594_v43 = vld [vmem:[%s2951_s1 + $0x250] sm:$0xf]  ;;  %v1724_v51 = vld [vmem:[%s2951_s1 + $0x254] sm:$0xf0]  ;;  %v2140_v59 = vor.u32 %v1677_v36, %v1412_v37  ;;  %576 = vmatmul.bf16.vlgmr.msra.gmra.mxu0 %v2113_v40 }
  0x24   :  { %620 = vmatpush.bf16.msrb.mxu0 %v2073_v11  ;;  %3100 = vst [vmem:[#allocation26_spill] sm:$0xff] %v2126_v48  ;;  %v1618_v52 = vld [vmem:[%s2951_s1 + $0x280] sm:$0xf]  ;;  %v1730_v55 = vld [vmem:[%s2951_s1 + $0x284] sm:$0xf0]  ;;  %589 = vmatmul.bf16.vlgmr.msra.gmra.mxu1 %v2101_v35  ;;  %v2164_v19 = vor.u32 %v1724_v51, %v1594_v43 }
  0x25   :  { %638 = vmatpush.bf16.msrb.mxu1 %v2076_v15  ;;  %3101 = vst [vmem:[#allocation27_spill] sm:$0xff] %v2128_v49  ;;  %v1659_v60 = vld [vmem:[%s2951_s1 + $0x54] sm:$0xf]  ;;  %v1340_v0 = vld [vmem:[%s2951_s1 + $0x58] sm:$0xf0]  ;;  %602 = vmatmul.bf16.vlgmr.msra.gmra.mxu2 %v2111_v39  ;;  %v2169_v20 = vor.u32 %v1730_v55, %v1618_v52 }
  0x26   :  { %646 = vmatpush.bf16.msrb.mxu2 %v2078_v18  ;;  %3102 = vst [vmem:[#allocation28_spill] sm:$0xff] %v2140_v59  ;;  %v1675_v1 = vld [vmem:[%s2951_s1 + $0xd4] sm:$0xf]  ;;  %v1404_v2 = vld [vmem:[%s2951_s1 + $0xd8] sm:$0xf0]  ;;  %615 = vmatmul.bf16.vlgmr.msra.gmra.mxu3 %v2122_v47  ;;  %v2171_v22 = vor.u32 %v1659_v60, %v1340_v0 }
  0x27   :  { %659 = vmatpush.bf16.msrb.mxu3 %v2090_v26  ;;  %v1695_v4 = vld [vmem:[%s2951_s1 + $0x174] sm:$0xf]  ;;  %v1484_v13 = vld [vmem:[%s2951_s1 + $0x178] sm:$0xf0]  ;;  %3103 = vst [vmem:[#allocation29_spill] sm:$0xff] %v2164_v19  ;;  %v2180_v30 = vor.u32 %v1675_v1, %v1404_v2 }
  0x28   :  { %621 = vmatpush.bf16.msrb.mxu0 %v2117_v42  ;;  %3104 = vst [vmem:[#allocation30_spill] sm:$0xff] %v2169_v20  ;;  %v1586_v27 = vld [vmem:[%s2951_s1 + $0x240] sm:$0xf]  ;;  %v1722_v28 = vld [vmem:[%s2951_s1 + $0x244] sm:$0xf0]  ;;  %v2182_v36 = vor.u32 %v1695_v4, %v1484_v13 }
  0x29   :  { %639 = vmatpush.bf16.msrb.mxu1 %v2126_v48  ;;  %3105 = vst [vmem:[#allocation31_spill] sm:$0xff] %v2171_v22  ;;  %v1657_v37 = vld [vmem:[%s2951_s1 + $0x44] sm:$0xf]  ;;  %v1332_v43 = vld [vmem:[%s2951_s1 + $0x48] sm:$0xf0]  ;;  %v2203_v0 = vor.u32 %v1722_v28, %v1586_v27 }
  0x2a   :  { %647 = vmatpush.bf16.msrb.mxu2 %v2128_v49  ;;  %3106 = vst [vmem:[#allocation32_spill] sm:$0xff] %v2180_v30  ;;  %v1673_v51 = vld [vmem:[%s2951_s1 + $0xc4] sm:$0xf]  ;;  %v1396_v52 = vld [vmem:[%s2951_s1 + $0xc8] sm:$0xf0]  ;;  %v2207_v1 = vor.u32 %v1657_v37, %v1332_v43 }
  0x2b   :  { %660 = vmatpush.bf16.msrb.mxu3 %v2140_v59  ;;  %3107 = vst [vmem:[#allocation33_spill] sm:$0xff] %v2182_v36  ;;  %v1693_v55 = vld [vmem:[%s2951_s1 + $0x164] sm:$0xf]  ;;  %v1476_v60 = vld [vmem:[%s2951_s1 + $0x168] sm:$0xf0]  ;;  %v2217_v13 = vor.u32 %v1673_v51, %v1396_v52 }
  0x2c   :  { %622 = vmatpush.bf16.msrb.mxu0 %v2164_v19  ;;  %3108 = vst [vmem:[#allocation34_spill] sm:$0xff] %v2203_v0  ;;  %v1578_v2 = vld [vmem:[%s2951_s1 + $0x230] sm:$0xf]  ;;  %v1720_v4 = vld [vmem:[%s2951_s1 + $0x234] sm:$0xf0]  ;;  %v2219_v27 = vor.u32 %v1693_v55, %v1476_v60 }
  0x2d   :  { %640 = vmatpush.bf16.msrb.mxu1 %v2169_v20  ;;  %3109 = vst [vmem:[#allocation35_spill] sm:$0xff] %v2207_v1  ;;  %v1655_v28 = vld [vmem:[%s2951_s1 + $0x34] sm:$0xf]  ;;  %v1324_v37 = vld [vmem:[%s2951_s1 + $0x38] sm:$0xf0]  ;;  %v2240_v55 = vor.u32 %v1720_v4, %v1578_v2 }
  0x2e   :  { %648 = vmatpush.bf16.msrb.mxu2 %v2171_v22  ;;  %3110 = vst [vmem:[#allocation36_spill] sm:$0xff] %v2217_v13  ;;  %v1671_v43 = vld [vmem:[%s2951_s1 + $0xb4] sm:$0xf]  ;;  %v1468_v52 = vld [vmem:[%s2951_s1 + $0x158] sm:$0xf0]  ;;  %v2248_v22 = vor.u32 %v1655_v28, %v1324_v37 }
  0x2f   :  { %661 = vmatpush.bf16.msrb.mxu3 %v2180_v30  ;;  %3111 = vst [vmem:[#allocation37_spill] sm:$0xff] %v2219_v27  ;;  %v1388_v30 = vld [vmem:[%s2951_s1 + $0xb8] sm:$0xf0]  ;;  %v1691_v51 = vld [vmem:[%s2951_s1 + $0x154] sm:$0xf] }
  0x30   :  { %623 = vmatpush.bf16.msrb.mxu0 %v2203_v0  ;;  %3112 = vst [vmem:[#allocation38_spill] sm:$0xff] %v2240_v55  ;;  %v2245_v60 = vld [vmem:[%s2952_s0 + $0x10] sm:$0xff]  ;;  %v1570_v59 = vld [vmem:[%s2951_s1 + $0x220] sm:$0xf]  ;;  %v1718_v49 = vld [vmem:[%s2951_s1 + $0x224] sm:$0xf0]  ;;  %v2259_v4 = vor.u32 %v1671_v43, %v1388_v30  ;;  %v2261_v26 = vor.u32 %v1691_v51, %v1468_v52 }
  0x31   :  { %672 = vmatpush.bf16.msra.mxu1 %v2182_v36  ;;  %3113 = vst [vmem:[#allocation39_spill] sm:$0xff] %v2248_v22  ;;  %v117_v2 = vunpack.c.h.b16 %v2245_v60  ;;  %v1653_v28 = vld [vmem:[%s2951_s1 + $0x24] sm:$0xf]  ;;  %v1316_v37 = vld [vmem:[%s2951_s1 + $0x28] sm:$0xf0]  ;;  %v2284_v52 = vor.u32 %v1718_v49, %v1570_v59 }
  0x32   :  { %649 = vmatpush.bf16.msrb.mxu2 %v2207_v1  ;;  %3114 = vst [vmem:[#allocation40_spill] sm:$0xff] %v2259_v4  ;;  %v1669_v1 = vld [vmem:[%s2951_s1 + $0xa4] sm:$0xf]  ;;  %v1460_v43 = vld [vmem:[%s2951_s1 + $0x148] sm:$0xf0]  ;;  %v2287_v10 = vor.u32 %v1653_v28, %v1316_v37 }
  0x33   :  { %662 = vmatpush.bf16.msrb.mxu3 %v2217_v13  ;;  %3115 = vst [vmem:[#allocation41_spill] sm:$0xff] %v2261_v26  ;;  %v1380_v13 = vld [vmem:[%s2951_s1 + $0xa8] sm:$0xf0]  ;;  %v1689_v30 = vld [vmem:[%s2951_s1 + $0x144] sm:$0xf]  ;;  %v2281_v51 = vpack.c.b16 %v117_v2, %v117_v2 }
  0x34   :  { %624 = vmatpush.bf16.msrb.mxu0 %v2240_v55  ;;  %3116 = vst [vmem:[#allocation42_spill] sm:$0xff] %v2284_v52  ;;  %v1562_v18 = vld [vmem:[%s2951_s1 + $0x210] sm:$0xf]  ;;  %v1716_v63 = vld [vmem:[%s2951_s1 + $0x214] sm:$0xf0]  ;;  %v2297_v2 = vor.u32 %v1669_v1, %v1380_v13  ;;  %v2299_v49 = vor.u32 %v1689_v30, %v1460_v43  ;;  %v383_v30 = vunpack.c.h.b16 %v1994_v23 }
  0x35   :  { %673 = vmatpush.bf16.msra.mxu1 %v2219_v27  ;;  %3117 = vst [vmem:[#allocation43_spill] sm:$0xff] %v2287_v10  ;;  %v1651_v59 = vld [vmem:[%s2951_s1 + $0x14] sm:$0xf]  ;;  %v1308_v28 = vld [vmem:[%s2951_s1 + $0x18] sm:$0xf0]  ;;  %v2323_v43 = vor.u32 %v1716_v63, %v1562_v18  ;;  %v116_v27 = vunpack.c.l.b16 %v2245_v60 }
  0x36   :  { %650 = vmatpush.bf16.msrb.mxu2 %v2248_v22  ;;  %3118 = vst [vmem:[#allocation44_spill] sm:$0xff] %v2297_v2  ;;  %v1667_v37 = vld [vmem:[%s2951_s1 + $0x94] sm:$0xf]  ;;  %v1452_v13 = vld [vmem:[%s2951_s1 + $0x138] sm:$0xf0]  ;;  %1632 = vmatmul.msk.bf16.vlgmr.msrb.gmra.mxu1 %vm554_vm2, %v2281_v51 }
  0x37   :  { %663 = vmatpush.bf16.msrb.mxu3 %v2259_v4  ;;  %3119 = vst [vmem:[#allocation45_spill] sm:$0xff] %v2299_v49  ;;  %v1372_v4 = vld [vmem:[%s2951_s1 + $0x98] sm:$0xf0]  ;;  %v1687_v1 = vld [vmem:[%s2951_s1 + $0x134] sm:$0xf] }
  0x38   :  { %625 = vmatpush.bf16.msrb.mxu0 %v2284_v52  ;;  %3120 = vst [vmem:[#allocation46_spill] sm:$0xff] %v2323_v43  ;;  %v1554_v22 = vld [vmem:[%s2951_s1 + $0x200] sm:$0xf]  ;;  %v1714_v55 = vld [vmem:[%s2951_s1 + $0x204] sm:$0xf0]  ;;  %v2342_v18 = vor.u32 %v1667_v37, %v1372_v4 }
  0x39   :  { %674 = vmatpush.bf16.msra.mxu1 %v2261_v26  ;;  %v2329_v26 = vor.u32 %v1651_v59, %v1308_v28  ;;  %v1649_v23 = vld [vmem:[%s2951_s1 + $0x4] sm:$0xf]  ;;  %v1300_v63 = vld [vmem:[%s2951_s1 + $0x8] sm:$0xf0]  ;;  %v2344_v59 = vor.u32 %v1687_v1, %v1452_v13  ;;  %v1548_v52 = vld [vmem:[%s2951_s1 + $0x1f8] sm:$0xf0]  ;;  %v469_v1 = vpack.c.b16 %v383_v30, %v383_v30  ;;  %v2365_v13 = vor.u32 %v1714_v55, %v1554_v22 }
  0x3a   :  { %651 = vmatpush.bf16.msrb.mxu2 %v2287_v10  ;;  %3121 = vst [vmem:[#allocation47_spill] sm:$0xff] %v2342_v18  ;;  %v1665_v28 = vld [vmem:[%s2951_s1 + $0x84] sm:$0xf]  ;;  %v1711_v10 = vld [vmem:[%s2951_s1 + $0x1f4] sm:$0xf]  ;;  %v2375_v32 = vor.u32 %v1649_v23, %v1300_v63 }
  0x3b   :  { %664 = vmatpush.bf16.msrb.mxu3 %v2297_v2  ;;  %3122 = vst [vmem:[#allocation48_spill] sm:$0xff] %v2344_v59  ;;  %v1364_v2 = vld [vmem:[%s2951_s1 + $0x88] sm:$0xf0]  ;;  %v1685_v4 = vld [vmem:[%s2951_s1 + $0x124] sm:$0xf]  ;;  %v2377_v0 = vor.u32 %v1711_v10, %v1548_v52  ;;  %v2394_v10 = vand.u32 %v2050_v54, %v469_v1 }
  0x3c   :  { %v1444_v37 = vld [vmem:[%s2951_s1 + $0x128] sm:$0xf0]  ;;  %626 = vmatpush.bf16.msrb.mxu0 %v2323_v43  ;;  %3123 = vst [vmem:[#allocation49_spill] sm:$0xff] %v2365_v13  ;;  %v1612_v41 = vld [vmem:[%s2951_s1 + $0x278] sm:$0xf0]  ;;  %v2381_v22 = vor.u32 %v1665_v28, %v1364_v2  ;;  %v2406_v28 = vpack.c.b16 %v116_v27, %v116_v27 }
  0x3d   :  { %675 = vmatpush.bf16.msra.mxu1 %v2299_v49  ;;  %v1727_v49 = vld [vmem:[%s2951_s1 + $0x274] sm:$0xf]  ;;  %3124 = vst [vmem:[#allocation50_spill] sm:$0xff] %v2375_v32  ;;  %v2383_v55 = vor.u32 %v1685_v4, %v1444_v37  ;;  %v1709_v30 = vld [vmem:[%s2951_s1 + $0x1e4] sm:$0xf] }
  0x3e   :  { %652 = vmatpush.bf16.msrb.mxu2 %v2329_v26  ;;  %3125 = vst [vmem:[#allocation51_spill] sm:$0xff] %v2377_v0  ;;  %v1540_v60 = vld [vmem:[%s2951_s1 + $0x1e8] sm:$0xf0]  ;;  %v2391_v23 = vor.u32 %v1727_v49, %v1612_v41  ;;  %v1683_v52 = vld [vmem:[%s2951_s1 + $0x114] sm:$0xf] }
  0x3f   :  { %665 = vmatpush.bf16.msrb.mxu3 %v2342_v18  ;;  %3126 = vst [vmem:[#allocation52_spill] sm:$0xff] %v2381_v22  ;;  %v1436_v2 = vld [vmem:[%s2951_s1 + $0x118] sm:$0xf0]  ;;  %v1725_v63 = vld [vmem:[%s2951_s1 + $0x264] sm:$0xf]  ;;  %v2419_v4 = vor.u32 %v1709_v30, %v1540_v60 }
  0x40   :  { %3127 = vst [vmem:[#allocation53_spill] sm:$0xff] %v2383_v55  ;;  %627 = vmatpush.bf16.msrb.mxu0 %v2365_v13  ;;  %v1604_v41 = vld [vmem:[%s2951_s1 + $0x268] sm:$0xf0]  ;;  %v1731_v54 = vld [vmem:[%s2951_s1 + $0x294] sm:$0xf]  ;;  %v2423_v27 = vor.u32 %v1683_v52, %v1436_v2 }
  0x41   :  { %676 = vmatpush.bf16.msra.mxu1 %v2344_v59  ;;  %3128 = vst [vmem:[#allocation54_spill] sm:$0xff] %v2391_v23  ;;  %v1628_v49 = vld [vmem:[%s2951_s1 + $0x298] sm:$0xf0]  ;;  %v1707_v37 = vld [vmem:[%s2951_s1 + $0x1d4] sm:$0xf]  ;;  %v2433_v30 = vor.u32 %v1725_v63, %v1604_v41 }
  0x42   :  { %3129 = vst [vmem:[#allocation55_spill] sm:$0xff] %v2394_v10  ;;  %653 = vmatpush.bf16.msrb.mxu2 %v2375_v32  ;;  %v1532_v1 = vld [vmem:[%s2951_s1 + $0x1d8] sm:$0xf0]  ;;  %v2435_v60 = vor.u32 %v1731_v54, %v1628_v49  ;;  %v1681_v52 = vld [vmem:[%s2951_s1 + $0x104] sm:$0xf] }
  0x43   :  { %3130 = vst [vmem:[#allocation56_spill] sm:$0xff] %v2419_v4  ;;  %666 = vmatpush.bf16.msrb.mxu3 %v2381_v22  ;;  %v1428_v2 = vld [vmem:[%s2951_s1 + $0x108] sm:$0xf0]  ;;  %v1723_v22 = vld [vmem:[%s2951_s1 + $0x254] sm:$0xf]  ;;  %628 = vmatmul.bf16.vlgmr.msrb.gmra.mxu0 %v2406_v28  ;;  %v2458_v49 = vor.u32 %v1707_v37, %v1532_v1 }
  0x44   :  { %685 = vmatpush.bf16.msra.mxu0 %v2377_v0  ;;  %3131 = vst [vmem:[#allocation57_spill] sm:$0xff] %v2423_v27  ;;  %v1596_v63 = vld [vmem:[%s2951_s1 + $0x258] sm:$0xf0]  ;;  %v1729_v41 = vld [vmem:[%s2951_s1 + $0x284] sm:$0xf] }
  0x45   :  { %677 = vmatpush.bf16.msra.mxu1 %v2383_v55  ;;  %3132 = vst [vmem:[#allocation58_spill] sm:$0xff] %v2435_v60  ;;  %v1620_v54 = vld [vmem:[%s2951_s1 + $0x288] sm:$0xf0]  ;;  %654 = vmatmul.bf16.vlgmr.msrb.gmra.mxu2 %v2113_v40  ;;  %v2472_v40 = vor.u32 %v1723_v22, %v1596_v63  ;;  %v1703_v22 = vld [vmem:[%s2951_s1 + $0x1b4] sm:$0xf] }
  0x46   :  { %698 = vmatpush.bf16.msra.mxu2 %v2391_v23  ;;  %3133 = vst [vmem:[#allocation59_spill] sm:$0xff] %v2458_v49  ;;  %667 = vmatmul.bf16.vlgmr.msrb.gmra.mxu3 %v2101_v35  ;;  %v1705_v23 = vld [vmem:[%s2951_s1 + $0x1c4] sm:$0xf]  ;;  %v1524_v32 = vld [vmem:[%s2951_s1 + $0x1c8] sm:$0xf0]  ;;  %v2474_v37 = vor.u32 %v1729_v41, %v1620_v54 }
  0x47   :  { %716 = vmatpush.bf16.msra.mxu3 %v2394_v10  ;;  %v2462_v10 = vor.u32 %v1681_v52, %v1428_v2  ;;  %v1721_v35 = vld [vmem:[%s2951_s1 + $0x244] sm:$0xf]  ;;  %v1588_v1 = vld [vmem:[%s2951_s1 + $0x248] sm:$0xf0]  ;;  %v2483_v52 = vor.u32 %v1705_v23, %v1524_v32  ;;  %v1516_v2 = vld [vmem:[%s2951_s1 + $0x1b8] sm:$0xf0] }
  0x48   :  { %686 = vmatpush.bf16.msra.mxu0 %v2419_v4  ;;  %3135 = vst [vmem:[#allocation61_spill] sm:$0xff] %v2474_v37  ;;  %v2494_v63 = vor.u32 %v1721_v35, %v1588_v1  ;;  %v1719_v32 = vld [vmem:[%s2951_s1 + $0x234] sm:$0xf]  ;;  %v1580_v23 = vld [vmem:[%s2951_s1 + $0x238] sm:$0xf0]  ;;  %v2505_v41 = vor.u32 %v1703_v22, %v1516_v2 }
  0x49   :  { %678 = vmatpush.bf16.msra.mxu1 %v2423_v27  ;;  %3134 = vst [vmem:[#allocation60_spill] sm:$0xff] %v2462_v10  ;;  %v1701_v54 = vld [vmem:[%s2951_s1 + $0x1a4] sm:$0xf]  ;;  %v1508_v35 = vld [vmem:[%s2951_s1 + $0x1a8] sm:$0xf0]  ;;  %v2515_v1 = vor.u32 %v1719_v32, %v1580_v23 }
  0x4a   :  { %699 = vmatpush.bf16.msra.mxu2 %v2433_v30  ;;  %3136 = vst [vmem:[#allocation62_spill] sm:$0xff] %v2483_v52  ;;  %v1572_v22 = vld [vmem:[%s2951_s1 + $0x228] sm:$0xf0]  ;;  %v2526_v2 = vor.u32 %v1701_v54, %v1508_v35  ;;  %v1699_v32 = vld [vmem:[%s2951_s1 + $0x194] sm:$0xf] }
  0x4b   :  { %717 = vmatpush.bf16.msra.mxu3 %v2435_v60  ;;  %3137 = vst [vmem:[#allocation63_spill] sm:$0xff] %v2494_v63  ;;  %v1500_v23 = vld [vmem:[%s2951_s1 + $0x198] sm:$0xf0]  ;;  %v1715_v54 = vld [vmem:[%s2951_s1 + $0x214] sm:$0xf] }
  0x4c   :  { %687 = vmatpush.bf16.msra.mxu0 %v2458_v49  ;;  %3138 = vst [vmem:[#allocation64_spill] sm:$0xff] %v2505_v41  ;;  %v1564_v35 = vld [vmem:[%s2951_s1 + $0x218] sm:$0xf0] }
  0x4d   :  { %679 = vmatpush.bf16.msra.mxu1 %v2462_v10  ;;  %3139 = vst [vmem:[#allocation65_spill] sm:$0xff] %v2526_v2 }
  0x4e   :  { %700 = vmatpush.bf16.msra.mxu2 %v2472_v40 }
  0x4f   :  { %718 = vmatpush.bf16.msra.mxu3 %v2474_v37 }
  0x50   :  { %688 = vmatpush.bf16.msra.mxu0 %v2483_v52  ;;  %680 = vmatmul.bf16.vlgmr.msra.gmra.mxu1 %v2111_v39  ;;  %v1717_v39 = vld [vmem:[%s2951_s1 + $0x224] sm:$0xf] }
  0x51   :  { %753 = vmatpush.bf16.msrb.mxu1 %v1764_v3 }
  0x52   :  { %701 = vmatpush.bf16.msra.mxu2 %v2494_v63  ;;  %v2546_v63 = vor.u32 %v1699_v32, %v1500_v23  ;;  %v1556_v32 = vld [vmem:[%s2951_s1 + $0x208] sm:$0xf0] }
  0x53   :  { %766 = vmatpush.bf16.msrb.mxu3 %v1775_v7 }
  0x54   :  { %689 = vmatpush.bf16.msra.mxu0 %v2505_v41  ;;  %3140 = vst [vmem:[#allocation66_spill] sm:$0xff] %v2546_v63 }
  0x55   :  { %754 = vmatpush.bf16.msrb.mxu1 %v1802_v16 }
  0x56   :  { %702 = vmatpush.bf16.msra.mxu2 %v2515_v1  ;;  %1633 = vmatmul.msk.bf16.vlgmr.msra.gmra.mxu3 %vm554_vm2, %v2281_v51  ;;  %v1713_v51 = vld [vmem:[%s2951_s1 + $0x204] sm:$0xf] }
  0x57   :  { %767 = vmatpush.bf16.msrb.mxu3 %v1804_v17  ;;  %v2535_v17 = vor.u32 %v1717_v39, %v1572_v22  ;;  %v1697_v39 = vld [vmem:[%s2951_s1 + $0x184] sm:$0xf]  ;;  %v1492_v22 = vld [vmem:[%s2951_s1 + $0x188] sm:$0xf0] }
  0x58   :  { %690 = vmatpush.bf16.msra.mxu0 %v2526_v2  ;;  %v2568_v23 = vor.u32 %v1697_v39, %v1492_v22 }
  0x59   :  { %755 = vmatpush.bf16.msrb.mxu1 %v1839_v29 }
  0x5a   :  { %703 = vmatpush.bf16.msra.mxu2 %v2535_v17  ;;  %3141 = vst [vmem:[#allocation67_spill] sm:$0xff] %v2568_v23 }
  0x5b   :  { %768 = vmatpush.bf16.msrb.mxu3 %v1852_v33  ;;  %v2557_v33 = vor.u32 %v1715_v54, %v1564_v35  ;;  %v2571_v54 = vor.u32 %v1713_v51, %v1556_v32  ;;  %v1634_v35 = vld [vmem:[%s2952_s0 + $0x18] sm:$0xff] }
  0x5c   :  { %691 = vmatpush.bf16.msra.mxu0 %v2546_v63  ;;  %v734_v39 = vunpack.c.h.b16 %v1634_v35  ;;  %v733_v22 = vunpack.c.l.b16 %v1634_v35  ;;  %v3142_v35 = vld [vmem:[#allocation34_spill] sm:$0xff] }
  0x5d   :  { %756 = vmatpush.bf16.msrb.mxu1 %v1884_v44 }
  0x5e   :  { %704 = vmatpush.bf16.msra.mxu2 %v2557_v33  ;;  %v2591_v51 = vpack.c.b16 %v734_v39, %v734_v39  ;;  %v2593_v32 = vpack.c.b16 %v733_v22, %v733_v22  ;;  %v1635_v39 = vld [vmem:[%s2952_s0 + $0x20] sm:$0xff] }
  0x5f   :  { %769 = vmatpush.bf16.msrb.mxu3 %v1888_v45  ;;  %v3143_v22 = vld [vmem:[#allocation18_spill] sm:$0xff] }
  0x60   :  { %692 = vmatpush.bf16.msra.mxu0 %v2568_v23 }
  0x61   :  { %757 = vmatpush.bf16.msrb.mxu1 %v1920_v56 }
  0x62   :  { %705 = vmatpush.bf16.msra.mxu2 %v2571_v54 }
  0x63   :  { %770 = vmatpush.bf16.msrb.mxu3 %v1924_v57  ;;  %693 = vmatmul.bf16.vlgmr.msra.gmra.mxu0 %v2122_v47  ;;  %v1636_v47 = vld [vmem:[%s2952_s0 + $0x28] sm:$0xff] }
  0x64   :  { %779 = vmatpush.bf16.msrb.mxu0 %v1777_v8 }
  0x65   :  { %758 = vmatpush.bf16.msrb.mxu1 %v1956_v5  ;;  %706 = vmatmul.bf16.vlgmr.msra.gmra.mxu2 %v2406_v28  ;;  %v738_v28 = vunpack.c.h.b16 %v1636_v47 }
  0x66   :  { %792 = vmatpush.bf16.msrb.mxu2 %v1789_v12 }
  0x67   :  { %771 = vmatpush.bf16.msrb.mxu3 %v1960_v6 }
  0x68   :  { %780 = vmatpush.bf16.msrb.mxu0 %v1816_v21 }
  0x69   :  { %759 = vmatpush.bf16.msrb.mxu1 %v1997_v24 }
  0x6a   :  { %793 = vmatpush.bf16.msrb.mxu2 %v1827_v25 }
  0x6b   :  { %772 = vmatpush.bf16.msrb.mxu3 %v2011_v31  ;;  %v3149_v31 = vld [vmem:[#allocation24_spill] sm:$0xff] }
  0x6c   :  { %781 = vmatpush.bf16.msrb.mxu0 %v1854_v34 }
  0x6d   :  { %760 = vmatpush.bf16.msrb.mxu1 %v2047_v53 }
  0x6e   :  { %794 = vmatpush.bf16.msrb.mxu2 %v1866_v38  ;;  %v3148_v38 = vld [vmem:[#allocation41_spill] sm:$0xff] }
  0x6f   :  { %773 = vmatpush.bf16.msrb.mxu3 %v2060_v61  ;;  %v3147_v61 = vld [vmem:[#allocation21_spill] sm:$0xff] }
  0x70   :  { %782 = vmatpush.bf16.msrb.mxu0 %v1890_v46  ;;  %761 = vmatmul.bf16.vlgmr.msrb.gmra.mxu1 %v2593_v32 }
  0x71   :  { %805 = vmatpush.bf16.msra.mxu1 %v2073_v11 }
  0x72   :  { %774 = vmatmul.bf16.vlgmr.msrb.gmra.mxu3 %v2591_v51  ;;  %795 = vmatpush.bf16.msrb.mxu2 %v1902_v50  ;;  %v736_v50 = vunpack.c.h.b16 %v1635_v39 }
  0x73   :  { %823 = vmatpush.bf16.msra.mxu3 %v2076_v15  ;;  %v3145_v15 = vld [vmem:[#allocation19_spill] sm:$0xff] }
  0x74   :  { %783 = vmatpush.bf16.msrb.mxu0 %v1926_v58  ;;  %v742_v25 = vpack.c.b16 %v736_v50, %v736_v50  ;;  %v3156_v50 = vld [vmem:[#allocation31_spill] sm:$0xff] }
  0x75   :  { %806 = vmatpush.bf16.msra.mxu1 %v2117_v42 }
  0x76   :  { %796 = vmatpush.bf16.msrb.mxu2 %v1938_v62  ;;  %v735_v62 = vunpack.c.l.b16 %v1635_v39  ;;  %v3151_v39 = vld [vmem:[#allocation42_spill] sm:$0xff] }
  0x77   :  { %824 = vmatpush.bf16.msra.mxu3 %v2126_v48  ;;  %v3144_v48 = vld [vmem:[#allocation37_spill] sm:$0xff] }
  0x78   :  { %784 = vmatpush.bf16.msrb.mxu0 %v1962_v9 }
  0x79   :  { %807 = vmatpush.bf16.msra.mxu1 %v2164_v19 }
  0x7a   :  { %797 = vmatpush.bf16.msrb.mxu2 %v1974_v14  ;;  %v741_v14 = vpack.c.b16 %v735_v62, %v735_v62  ;;  %v737_v62 = vunpack.c.l.b16 %v1636_v47  ;;  %v3159_v47 = vld [vmem:[#allocation36_spill] sm:$0xff] }
  0x7b   :  { %825 = vmatpush.bf16.msra.mxu3 %v2169_v20  ;;  %v2622_v20 = vpack.c.b16 %v738_v28, %v738_v28  ;;  %v3152_v28 = vld [vmem:[#allocation25_spill] sm:$0xff] }
  0x7c   :  { %785 = vmatpush.bf16.msrb.mxu0 %v3143_v22  ;;  %v3150_v22 = vld [vmem:[#allocation22_spill] sm:$0xff] }
  0x7d   :  { %808 = vmatpush.bf16.msra.mxu1 %v3142_v35 }
  0x7e   :  { %798 = vmatpush.bf16.msrb.mxu2 %v3145_v15  ;;  %v3153_v15 = vld [vmem:[#allocation45_spill] sm:$0xff] }
  0x7f   :  { %857 = vmatpush.bf16.msrb.mxu3 %v2182_v36  ;;  %v3146_v36 = vld [vmem:[#allocation38_spill] sm:$0xff] }
  0x80   :  { %786 = vmatpush.bf16.msrb.mxu0 %v3147_v61 }
  0x81   :  { %809 = vmatpush.bf16.msra.mxu1 %v3146_v36 }
  0x82   :  { %1637 = vmatmul.msk.bf16.vlgmr.msra.gmra.mxu3 %vm554_vm2, %v2622_v20  ;;  %799 = vmatpush.bf16.msrb.mxu2 %v3150_v22  ;;  %v2640_v22 = vpack.c.b16 %v737_v62, %v737_v62  ;;  %v3160_v62 = vld [vmem:[#allocation39_spill] sm:$0xff] }
  0x83   :  { %858 = vmatpush.bf16.msrb.mxu3 %v3144_v48  ;;  %787 = vmatmul.bf16.vlgmr.msrb.gmra.mxu0 %v741_v14  ;;  %v3154_v48 = vld [vmem:[#allocation27_spill] sm:$0xff] }
  0x84   :  { %831 = vmatpush.bf16.msra.mxu0 %v3149_v31 }
  0x85   :  { %810 = vmatpush.bf16.msra.mxu1 %v3151_v39  ;;  %800 = vmatmul.bf16.vlgmr.msrb.gmra.mxu2 %v742_v25 }
  0x86   :  { %844 = vmatpush.bf16.msra.mxu2 %v3152_v28  ;;  %v3157_v28 = vld [vmem:[#allocation32_spill] sm:$0xff] }
  0x87   :  { %859 = vmatpush.bf16.msrb.mxu3 %v3148_v38  ;;  %v3155_v38 = vld [vmem:[#allocation28_spill] sm:$0xff] }
  0x88   :  { %832 = vmatpush.bf16.msra.mxu0 %v3154_v48 }
  0x89   :  { %811 = vmatpush.bf16.msra.mxu1 %v2323_v43 }
  0x8a   :  { %845 = vmatpush.bf16.msra.mxu2 %v3155_v38 }
  0x8b   :  { %860 = vmatpush.bf16.msrb.mxu3 %v3153_v15  ;;  %v3158_v15 = vld [vmem:[#allocation35_spill] sm:$0xff] }
  0x8c   :  { %833 = vmatpush.bf16.msra.mxu0 %v3156_v50 }
  0x8d   :  { %812 = vmatpush.bf16.msra.mxu1 %v2365_v13 }
  0x8e   :  { %846 = vmatpush.bf16.msra.mxu2 %v3157_v28  ;;  %v3162_v28 = vld [vmem:[#allocation43_spill] sm:$0xff] }
  0x8f   :  { %861 = vmatpush.bf16.msrb.mxu3 %v2344_v59  ;;  %v3161_v59 = vld [vmem:[#allocation40_spill] sm:$0xff] }
  0x90   :  { %834 = vmatpush.bf16.msra.mxu0 %v3158_v15  ;;  %813 = vmatmul.bf16.vlgmr.msra.gmra.mxu1 %v2640_v22 }
  0x91   :  { %870 = vmatpush.bf16.msrb.mxu1 %v2377_v0 }
  0x92   :  { %847 = vmatpush.bf16.msra.mxu2 %v3159_v47 }
  0x93   :  { %862 = vmatpush.bf16.msrb.mxu3 %v2383_v55  ;;  %v3163_v55 = vld [vmem:[#allocation44_spill] sm:$0xff] }
  0x94   :  { %835 = vmatpush.bf16.msra.mxu0 %v3160_v62 }
  0x95   :  { %871 = vmatpush.bf16.msrb.mxu1 %v2419_v4 }
  0x96   :  { %848 = vmatpush.bf16.msra.mxu2 %v3161_v59  ;;  %v3164_v59 = vld [vmem:[#allocation50_spill] sm:$0xff] }
  0x97   :  { %863 = vmatpush.bf16.msrb.mxu3 %v2423_v27 }
  0x98   :  { %836 = vmatpush.bf16.msra.mxu0 %v3162_v28 }
  0x99   :  { %872 = vmatpush.bf16.msrb.mxu1 %v2458_v49 }
  0x9a   :  { %849 = vmatpush.bf16.msra.mxu2 %v3163_v55  ;;  %v3167_v55 = vld [vmem:[#allocation55_spill] sm:$0xff] }
  0x9b   :  { %864 = vmatpush.bf16.msrb.mxu3 %v2462_v10  ;;  %v3165_v10 = vld [vmem:[#allocation54_spill] sm:$0xff] }
  0x9c   :  { %837 = vmatpush.bf16.msra.mxu0 %v2329_v26 }
  0x9d   :  { %873 = vmatpush.bf16.msrb.mxu1 %v2483_v52 }
  0x9e   :  { %865 = vmatmul.bf16.vlgmr.msrb.gmra.mxu3 %v741_v14  ;;  %850 = vmatpush.bf16.msra.mxu2 %v2342_v18  ;;  %v2677_v14 = vld [vmem:[%s2953_s2] sm:$0x3] }
  0x9f   :  { %940 = vmatpush.bf16.msra.mxu3 %v1764_v3  ;;  %v3166_v3 = vld [vmem:[#allocation52_spill] sm:$0xff]  ;;  %v3169_v18 = vld [vmem:[#allocation6_spill] sm:$0xff] }
  0xa0   :  { %838 = vmatpush.bf16.msra.mxu0 %v3164_v59 }
  0xa1   :  { %874 = vmatpush.bf16.msrb.mxu1 %v2505_v41 }
  0xa2   :  { %851 = vmatpush.bf16.msra.mxu2 %v3166_v3  ;;  %v3168_v3 = vld [vmem:[#allocation63_spill] sm:$0xff] }
  0xa3   :  { %941 = vmatpush.bf16.msra.mxu3 %v1802_v16  ;;  %839 = vmatmul.bf16.vlgmr.msra.gmra.mxu0 %v2593_v32  ;;  %v2683_v32 = vperm.slane %v2677_v14, 0 }
  0xa4   :  { %883 = vmatpush.bf16.msrb.mxu0 %v3165_v10 }
  0xa5   :  { %875 = vmatpush.bf16.msrb.mxu1 %v2526_v2  ;;  %852 = vmatmul.bf16.vlgmr.msra.gmra.mxu2 %v2591_v51  ;;  %v590_v51 = vpop.f32.mrf.mxu1 }
  0xa6   :  { %901 = vmatpush.bf16.msrb.mxu2 %v3167_v55 }
  0xa7   :  { %942 = vmatpush.bf16.msra.mxu3 %v1839_v29 }
  0xa8   :  { %884 = vmatpush.bf16.msrb.mxu0 %v2433_v30 }
  0xa9   :  { %876 = vmatpush.bf16.msrb.mxu1 %v2546_v63  ;;  %v616_v55 = vpop.f32.mrf.mxu3 }
  0xaa   :  { %902 = vmatpush.bf16.msrb.mxu2 %v2435_v60 }
  0xab   :  { %943 = vmatpush.bf16.msra.mxu3 %v1884_v44  ;;  %v577_v44 = vpop.f32.mrf.mxu0 }
  0xac   :  { %885 = vmatpush.bf16.msrb.mxu0 %v2472_v40  ;;  %v578_v29 = vadd.f32 %v577_v44, %v2683_v32 }
  0xad   :  { %877 = vmatpush.bf16.msrb.mxu1 %v2568_v23 }
  0xae   :  { %903 = vmatpush.bf16.msrb.mxu2 %v2474_v37  ;;  %v591_v37 = vadd.f32 %v590_v51, %v578_v29  ;;  %v3173_v51 = vld [vmem:[#allocation18_spill] sm:$0xff] }
  0xaf   :  { %944 = vmatpush.bf16.msra.mxu3 %v1920_v56  ;;  %v1639_v56 = vld [vmem:[%s2952_s0 + $0x30] sm:$0xff] }
  0xb0   :  { %886 = vmatpush.bf16.msrb.mxu0 %v3168_v3  ;;  %878 = vmatmul.bf16.vlgmr.msrb.gmra.mxu1 %v742_v25  ;;  %v920_v16 = vunpack.c.l.b16 %v1639_v56 }
  0xb1   :  { %953 = vmatpush.bf16.msra.mxu1 %v1775_v7  ;;  %v592_v7 = vpop.f32.mrf.mxu1 }
  0xb2   :  { %966 = vmatpush.bf16.msra.mxu2 %v1777_v8  ;;  %v3170_v8 = vld [vmem:[#allocation9_spill] sm:$0xff]  ;;  %v2700_v3 = vpack.c.b16 %v920_v16, %v920_v16  ;;  %v618_v16 = vpop.f32.mrf.mxu3 }
  0xb3   :  { %945 = vmatpush.bf16.msra.mxu3 %v1956_v5  ;;  %v603_v5 = vpop.f32.mrf.mxu2  ;;  %v579_v25 = vpop.f32.mrf.mxu0  ;;  %v3175_v16 = vld [vmem:[#allocation20_spill] sm:$0xff] }
  0xb4   :  { %887 = vmatpush.bf16.msrb.mxu0 %v2515_v1  ;;  %v604_v60 = vadd.f32 %v603_v5, %v591_v37  ;;  %v1640_v5 = vld [vmem:[%s2952_s0 + $0x38] sm:$0xff] }
  0xb5   :  { %954 = vmatpush.bf16.msra.mxu1 %v3169_v18  ;;  %1638 = vmatmul.msk.bf16.vlgmr.msrb.gmra.mxu2 %vm554_vm2, %v2622_v20  ;;  %v3171_v20 = vld [vmem:[#allocation7_spill] sm:$0xff]  ;;  %v922_v37 = vunpack.c.l.b16 %v1640_v5 }
  0xb6   :  { %967 = vmatpush.bf16.msra.mxu2 %v1816_v21  ;;  %v617_v29 = vadd.f32 %v616_v55, %v604_v60  ;;  %v921_v55 = vunpack.c.h.b16 %v1639_v56  ;;  %v3172_v60 = vld [vmem:[#allocation17_spill] sm:$0xff] }
  0xb7   :  { %946 = vmatpush.bf16.msra.mxu3 %v1997_v24 }
  0xb8   :  { %888 = vmatpush.bf16.msrb.mxu0 %v2535_v17 }
  0xb9   :  { %955 = vmatpush.bf16.msra.mxu1 %v3170_v8  ;;  %v642_v44 = vpop.f32.mrf.mxu1 }
  0xba   :  { %968 = vmatpush.bf16.msra.mxu2 %v1854_v34 }
  0xbb   :  { %947 = vmatpush.bf16.msra.mxu3 %v2047_v53  ;;  %v605_v7 = vpop.f32.mrf.mxu2 }
  0xbc   :  { %889 = vmatpush.bf16.msrb.mxu0 %v2557_v33  ;;  %v3174_v7 = vld [vmem:[#allocation10_spill] sm:$0xff] }
  0xbd   :  { %956 = vmatpush.bf16.msra.mxu1 %v1888_v45 }
  0xbe   :  { %948 = vmatmul.bf16.vlgmr.msra.gmra.mxu3 %v2700_v3  ;;  %969 = vmatpush.bf16.msra.mxu2 %v1890_v46 }
  0xbf   :  { %992 = vmatpush.bf16.msrb.mxu3 %v2073_v11 }
  0xc0   :  { %890 = vmatpush.bf16.msrb.mxu0 %v2571_v54  ;;  %v629_v56 = vpop.f32.mrf.mxu0 }
  0xc1   :  { %957 = vmatpush.bf16.msra.mxu1 %v1924_v57  ;;  %v644_v25 = vpop.f32.mrf.mxu1 }
  0xc2   :  { %970 = vmatpush.bf16.msra.mxu2 %v1926_v58  ;;  %v1641_v25 = vld [vmem:[%s2952_s0 + $0x40] sm:$0xff] }
  0xc3   :  { %993 = vmatpush.bf16.msrb.mxu3 %v2117_v42  ;;  %891 = vmatmul.bf16.vlgmr.msrb.gmra.mxu0 %v2640_v22  ;;  %v2730_v22 = vpack.c.b16 %v921_v55, %v921_v55  ;;  %v3177_v55 = vld [vmem:[#allocation12_spill] sm:$0xff] }
  0xc4   :  { %979 = vmatpush.bf16.msra.mxu0 %v1789_v12 }
  0xc5   :  { %958 = vmatpush.bf16.msra.mxu1 %v1960_v6 }
  0xc6   :  { %971 = vmatpush.bf16.msra.mxu2 %v1962_v9 }
  0xc7   :  { %994 = vmatpush.bf16.msrb.mxu3 %v2164_v19  ;;  %v2733_v19 = vpack.c.b16 %v922_v37, %v922_v37 }
  0xc8   :  { %980 = vmatpush.bf16.msra.mxu0 %v3171_v20 }
  0xc9   :  { %959 = vmatpush.bf16.msra.mxu1 %v3172_v60 }
  0xca   :  { %972 = vmatpush.bf16.msra.mxu2 %v3173_v51  ;;  %v668_v51 = vpop.f32.mrf.mxu3 }
  0xcb   :  { %995 = vmatpush.bf16.msrb.mxu3 %v3142_v35  ;;  %v3176_v35 = vld [vmem:[#allocation23_spill] sm:$0xff] }
  0xcc   :  { %981 = vmatpush.bf16.msra.mxu0 %v3174_v7 }
  0xcd   :  { %960 = vmatpush.bf16.msra.mxu1 %v3175_v16 }
  0xce   :  { %973 = vmatpush.bf16.msra.mxu2 %v3147_v61  ;;  %v3178_v61 = vld [vmem:[#allocation26_spill] sm:$0xff] }
  0xcf   :  { %996 = vmatpush.bf16.msrb.mxu3 %v3146_v36  ;;  %v630_v36 = vadd.f32 %v629_v56, %v617_v29  ;;  %v655_v29 = vpop.f32.mrf.mxu2  ;;  %v3181_v56 = vld [vmem:[#allocation30_spill] sm:$0xff] }
  0xd0   :  { %982 = vmatpush.bf16.msra.mxu0 %v3177_v55  ;;  %961 = vmatmul.bf16.vlgmr.msra.gmra.mxu1 %v2730_v22 }
  0xd1   :  { %1010 = vmatpush.bf16.msrb.mxu1 %v3176_v35  ;;  %974 = vmatmul.bf16.vlgmr.msra.gmra.mxu2 %v2733_v19  ;;  %v2745_v37 = vadd.f32 %v642_v44, %v630_v36  ;;  %v924_v35 = vunpack.c.l.b16 %v1641_v25  ;;  %v3182_v44 = vld [vmem:[#allocation33_spill] sm:$0xff] }
  0xd2   :  { %1018 = vmatpush.bf16.msrb.mxu2 %v3149_v31  ;;  %v3180_v31 = vld [vmem:[#allocation14_spill] sm:$0xff] }
  0xd3   :  { %997 = vmatpush.bf16.msrb.mxu3 %v3151_v39  ;;  %v2749_v39 = vperm.slane %v2677_v14, 1  ;;  %v2755_v16 = vpack.c.b16 %v924_v35, %v924_v35  ;;  %v631_v14 = vpop.f32.mrf.mxu0 }
  0xd4   :  { %983 = vmatpush.bf16.msra.mxu0 %v3180_v31  ;;  %v925_v31 = vunpack.c.h.b16 %v1641_v25 }
  0xd5   :  { %1011 = vmatpush.bf16.msrb.mxu1 %v3178_v61  ;;  %3179 = vst [vmem:[#allocation28_spill] sm:$0xff] %v2749_v39  ;;  %v656_v36 = vadd.f32 %v655_v29, %v2749_v39  ;;  %v3183_v61 = vld [vmem:[#allocation16_spill] sm:$0xff]  ;;  %v3184_v29 = vld [vmem:[#allocation37_spill] sm:$0xff]  ;;  %v923_v39 = vunpack.c.h.b16 %v1640_v5 }
  0xd6   :  { %1019 = vmatpush.bf16.msrb.mxu2 %v3154_v48  ;;  %v681_v48 = vpop.f32.mrf.mxu1  ;;  %v2768_v14 = vpack.c.b16 %v925_v31, %v925_v31  ;;  %v3189_v31 = vld [vmem:[#allocation45_spill] sm:$0xff]  ;;  %v3190_v5 = vld [vmem:[#allocation48_spill] sm:$0xff] }
  0xd7   :  { %998 = vmatpush.bf16.msrb.mxu3 %v2323_v43  ;;  %v669_v43 = vadd.f32 %v668_v51, %v656_v36  ;;  %v670_v51 = vpop.f32.mrf.mxu3  ;;  %v3186_v36 = vld [vmem:[#allocation41_spill] sm:$0xff]  ;;  %v929_v25 = vpack.c.b16 %v923_v39, %v923_v39  ;;  %v3191_v39 = vld [vmem:[#allocation32_spill] sm:$0xff] }
  0xd8   :  { %984 = vmatpush.bf16.msra.mxu0 %v3183_v61  ;;  %v3192_v51 = vld [vmem:[#allocation53_spill] sm:$0xff] }
  0xd9   :  { %1012 = vmatpush.bf16.msrb.mxu1 %v3181_v56  ;;  %v682_v35 = vadd.f32 %v681_v48, %v669_v43  ;;  %v3187_v43 = vld [vmem:[#allocation22_spill] sm:$0xff] }
  0xda   :  { %1020 = vmatpush.bf16.msrb.mxu2 %v3156_v50 }
  0xdb   :  { %999 = vmatpush.bf16.msrb.mxu3 %v2365_v13  ;;  %v3185_v13 = vld [vmem:[#allocation19_spill] sm:$0xff] }
  0xdc   :  { %985 = vmatpush.bf16.msra.mxu0 %v3185_v13 }
  0xdd   :  { %1044 = vmatpush.bf16.msra.mxu1 %v3182_v44 }
  0xde   :  { %1000 = vmatmul.bf16.vlgmr.msrb.gmra.mxu3 %v2755_v16  ;;  %1021 = vmatpush.bf16.msrb.mxu2 %v3158_v15  ;;  %v683_v48 = vpop.f32.mrf.mxu1 }
  0xdf   :  { %1057 = vmatpush.bf16.msra.mxu3 %v2377_v0  ;;  %v657_v0 = vpop.f32.mrf.mxu2 }
  0xe0   :  { %986 = vmatpush.bf16.msra.mxu0 %v3187_v43  ;;  %1642 = vmatmul.msk.bf16.vlgmr.msrb.gmra.mxu1 %vm554_vm2, %v2768_v14  ;;  %v720_v0 = vpop.f32.mrf.mxu3  ;;  %v694_v48 = vpop.f32.mrf.mxu0 }
  0xe1   :  { %1045 = vmatpush.bf16.msra.mxu1 %v3184_v29 }
  0xe2   :  { %1022 = vmatpush.bf16.msrb.mxu2 %v3160_v62 }
  0xe3   :  { %1058 = vmatpush.bf16.msra.mxu3 %v2419_v4  ;;  %v3188_v4 = vld [vmem:[#allocation25_spill] sm:$0xff]  ;;  %987 = vmatmul.bf16.vlgmr.msra.gmra.mxu0 %v929_v25 }
  0xe4   :  { %1031 = vmatpush.bf16.msrb.mxu0 %v3188_v4 }
  0xe5   :  { %1046 = vmatpush.bf16.msra.mxu1 %v3186_v36 }
  0xe6   :  { %1023 = vmatpush.bf16.msrb.mxu2 %v3162_v28 }
  0xe7   :  { %1059 = vmatpush.bf16.msra.mxu3 %v2458_v49 }
  0xe8   :  { %1032 = vmatpush.bf16.msrb.mxu0 %v3155_v38  ;;  %v722_v49 = vpop.f32.mrf.mxu3 }
  0xe9   :  { %1047 = vmatpush.bf16.msra.mxu1 %v3189_v31 }
  0xea   :  { %1024 = vmatpush.bf16.msrb.mxu2 %v2329_v26 }
  0xeb   :  { %1060 = vmatpush.bf16.msra.mxu3 %v2483_v52  ;;  %v695_v52 = vadd.f32 %v694_v48, %v682_v35  ;;  %v696_v35 = vpop.f32.mrf.mxu0  ;;  %v3195_v48 = vld [vmem:[#allocation55_spill] sm:$0xff] }
  0xec   :  { %1033 = vmatpush.bf16.msrb.mxu0 %v3191_v39 }
  0xed   :  { %1048 = vmatpush.bf16.msra.mxu1 %v3190_v5 }
  0xee   :  { %1025 = vmatpush.bf16.msrb.mxu2 %v3164_v59 }
  0xef   :  { %1061 = vmatpush.bf16.msra.mxu3 %v2505_v41  ;;  %v3193_v41 = vld [vmem:[#allocation40_spill] sm:$0xff] }
  0xf0   :  { %1034 = vmatpush.bf16.msrb.mxu0 %v3159_v47 }
  0xf1   :  { %1049 = vmatpush.bf16.msra.mxu1 %v3192_v51  ;;  %1026 = vmatmul.bf16.vlgmr.msrb.gmra.mxu2 %v2700_v3  ;;  %v707_v51 = vpop.f32.mrf.mxu2  ;;  %v3196_v3 = vld [vmem:[#allocation2_spill] sm:$0xff] }
  0xf2   :  { %1070 = vmatpush.bf16.msra.mxu2 %v3165_v10  ;;  %v708_v59 = vadd.f32 %v707_v51, %v695_v52  ;;  %v3199_v52 = vld [vmem:[#allocation63_spill] sm:$0xff]  ;;  %v3200_v51 = vld [vmem:[#allocation58_spill] sm:$0xff] }
  0xf3   :  { %1062 = vmatpush.bf16.msra.mxu3 %v2526_v2  ;;  %v3194_v2 = vld [vmem:[#allocation60_spill] sm:$0xff] }
  0xf4   :  { %1035 = vmatpush.bf16.msrb.mxu0 %v3193_v41  ;;  %v2800_v49 = vadd.f32 %v720_v0, %v708_v59  ;;  %v3203_v59 = vld [vmem:[#allocation61_spill] sm:$0xff] }
  0xf5   :  { %1050 = vmatpush.bf16.msra.mxu1 %v2423_v27  ;;  %v762_v27 = vpop.f32.mrf.mxu1 }
  0xf6   :  { %1071 = vmatpush.bf16.msra.mxu2 %v2433_v30  ;;  %3197 = vst [vmem:[#allocation31_spill] sm:$0xff] %v2800_v49  ;;  %v763_v35 = vadd.f32 %v762_v27, %v2683_v32  ;;  %v3208_v27 = vld [vmem:[#allocation11_spill] sm:$0xff] }
  0xf7   :  { %1063 = vmatpush.bf16.msra.mxu3 %v2546_v63  ;;  %v3198_v63 = vld [vmem:[#allocation44_spill] sm:$0xff] }
  0xf8   :  { %1036 = vmatpush.bf16.msrb.mxu0 %v3198_v63 }
  0xf9   :  { %1051 = vmatpush.bf16.msra.mxu1 %v3194_v2  ;;  %v3202_v2 = vld [vmem:[#allocation47_spill] sm:$0xff] }
  0xfa   :  { %1072 = vmatpush.bf16.msra.mxu2 %v2472_v40 }
  0xfb   :  { %1064 = vmatpush.bf16.msra.mxu3 %v2568_v23  ;;  %v3201_v23 = vld [vmem:[#allocation5_spill] sm:$0xff] }
  0xfc   :  { %1052 = vmatmul.bf16.vlgmr.msra.gmra.mxu1 %v2733_v19  ;;  %1037 = vmatpush.bf16.msrb.mxu0 %v3202_v2  ;;  %v3205_v19 = vld [vmem:[#allocation3_spill] sm:$0xff] }
  0xfd   :  { %1127 = vmatpush.bf16.msrb.mxu1 %v3196_v3  ;;  %v775_v3 = vpop.f32.mrf.mxu3  ;;  %v764_v49 = vpop.f32.mrf.mxu1 }
  0xfe   :  { %1065 = vmatmul.bf16.vlgmr.msra.gmra.mxu3 %v929_v25  ;;  %1073 = vmatpush.bf16.msra.mxu2 %v3199_v52  ;;  %v776_v0 = vadd.f32 %v775_v3, %v763_v35  ;;  %v3204_v25 = vld [vmem:[#allocation8_spill] sm:$0xff] }
  0xff   :  { %1088 = vmatpush.bf16.msrb.mxu3 %v3195_v48  ;;  %v709_v48 = vpop.f32.mrf.mxu2  ;;  %v3206_v52 = vld [vmem:[#allocation52_spill] sm:$0xff] }
 0x100   :  { %1038 = vmatpush.bf16.msrb.mxu0 %v3206_v52  ;;  %v3209_v48 = vld [vmem:[#allocation13_spill] sm:$0xff]  ;;  %v788_v49 = vpop.f32.mrf.mxu0 }
 0x101   :  { %1128 = vmatpush.bf16.msrb.mxu1 %v3201_v23 }
 0x102   :  { %1074 = vmatpush.bf16.msra.mxu2 %v2515_v1 }
 0x103   :  { %1089 = vmatpush.bf16.msrb.mxu3 %v3200_v51  ;;  %v3207_v51 = vld [vmem:[#allocation4_spill] sm:$0xff]  ;;  %1039 = vmatmul.bf16.vlgmr.msrb.gmra.mxu0 %v2730_v22 }
 0x104   :  { %1153 = vmatpush.bf16.msra.mxu0 %v3207_v51 }
 0x105   :  { %1129 = vmatpush.bf16.msrb.mxu1 %v3204_v25  ;;  %v777_v23 = vpop.f32.mrf.mxu3  ;;  %v3214_v25 = vld [vmem:[#allocation29_spill] sm:$0xff] }
 0x106   :  { %1075 = vmatpush.bf16.msra.mxu2 %v2535_v17  ;;  %v3218_v23 = vld [vmem:[#allocation34_spill] sm:$0xff] }
 0x107   :  { %1090 = vmatpush.bf16.msrb.mxu3 %v3203_v59 }
 0x108   :  { %1154 = vmatpush.bf16.msra.mxu0 %v1816_v21  ;;  %v789_v21 = vadd.f32 %v788_v49, %v776_v0  ;;  %v3213_v0 = vld [vmem:[#allocation20_spill] sm:$0xff]  ;;  %v3220_v49 = vld [vmem:[#allocation27_spill] sm:$0xff] }
 0x109   :  { %1130 = vmatpush.bf16.msrb.mxu1 %v3208_v27  ;;  %v3217_v27 = vld [vmem:[#allocation24_spill] sm:$0xff] }
 0x10a   :  { %1076 = vmatpush.bf16.msra.mxu2 %v2557_v33 }
 0x10b   :  { %1140 = vmatpush.bf16.msra.mxu3 %v3205_v19  ;;  %v3215_v19 = vld [vmem:[#allocation21_spill] sm:$0xff] }
 0x10c   :  { %1155 = vmatpush.bf16.msra.mxu0 %v1854_v34 }
 0x10d   :  { %1131 = vmatpush.bf16.msrb.mxu1 %v3209_v48  ;;  %v827_v22 = vpop.f32.mrf.mxu3  ;;  %v3219_v48 = vld [vmem:[#allocation26_spill] sm:$0xff] }
 0x10e   :  { %1643 = vmatmul.msk.bf16.vlgmr.msrb.gmra.mxu3 %vm554_vm2, %v2768_v14  ;;  %1077 = vmatpush.bf16.msra.mxu2 %v2571_v54 }
 0x10f   :  { %1141 = vmatpush.bf16.msra.mxu3 %v3169_v18  ;;  %v3210_v18 = vld [vmem:[#allocation15_spill] sm:$0xff] }
 0x110   :  { %1156 = vmatpush.bf16.msra.mxu0 %v1890_v46 }
 0x111   :  { %1132 = vmatpush.bf16.msrb.mxu1 %v3210_v18  ;;  %1078 = vmatmul.bf16.vlgmr.msra.gmra.mxu2 %v2755_v16  ;;  %v790_v16 = vpop.f32.mrf.mxu0 }
 0x112   :  { %1166 = vmatpush.bf16.msrb.mxu2 %v1789_v12  ;;  %v801_v12 = vpop.f32.mrf.mxu2 }
 0x113   :  { %1142 = vmatpush.bf16.msra.mxu3 %v3170_v8  ;;  %v1644_v8 = vld [vmem:[%s2952_s0 + $0x48] sm:$0xff]  ;;  %v802_v46 = vadd.f32 %v801_v12, %v789_v21  ;;  %v3221_v21 = vld [vmem:[#allocation38_spill] sm:$0xff] }
 0x114   :  { %v1107_v34 = vunpack.c.l.b16 %v1644_v8  ;;  %1157 = vmatpush.bf16.msra.mxu0 %v1926_v58 }
 0x115   :  { %1133 = vmatpush.bf16.msrb.mxu1 %v1997_v24  ;;  %v814_v24 = vpop.f32.mrf.mxu1 }
 0x116   :  { %1167 = vmatpush.bf16.msrb.mxu2 %v3171_v20  ;;  %v815_v14 = vadd.f32 %v814_v24, %v802_v46  ;;  %v1108_v20 = vunpack.c.h.b16 %v1644_v8  ;;  %v1646_v8 = vld [vmem:[%s2952_s0 + $0x58] sm:$0xff] }
 0x117   :  { %1143 = vmatpush.bf16.msra.mxu3 %v1888_v45  ;;  %v2839_v45 = vpack.c.b16 %v1107_v34, %v1107_v34  ;;  %v1112_v34 = vunpack.c.h.b16 %v1646_v8 }
 0x118   :  { %1158 = vmatpush.bf16.msra.mxu0 %v1962_v9  ;;  %v828_v58 = vadd.f32 %v827_v22, %v815_v14  ;;  %v3211_v9 = vld [vmem:[#allocation18_spill] sm:$0xff]  ;;  %v2858_v3 = vpack.c.b16 %v1108_v20, %v1108_v20  ;;  %v3227_v20 = vld [vmem:[#allocation56_spill] sm:$0xff] }
 0x119   :  { %1134 = vmatpush.bf16.msrb.mxu1 %v2047_v53  ;;  %v1645_v53 = vld [vmem:[%s2952_s0 + $0x50] sm:$0xff] }
 0x11a   :  { %1168 = vmatpush.bf16.msrb.mxu2 %v3174_v7  ;;  %v909_v7 = vmax.f32 %v828_v58, 0.0  ;;  %v803_v51 = vpop.f32.mrf.mxu2  ;;  %v1110_v18 = vunpack.c.h.b16 %v1645_v53 }
 0x11b   :  { %1144 = vmatpush.bf16.msra.mxu3 %v1924_v57  ;;  %v829_v57 = vpop.f32.mrf.mxu3  ;;  %v3238_v51 = vld [vmem:[#allocation31_spill] sm:$0xff] }
 0x11c   :  { %1135 = vmatmul.bf16.vlgmr.msrb.gmra.mxu1 %v2839_v45  ;;  %1159 = vmatpush.bf16.msra.mxu0 %v3211_v9  ;;  %v2881_v22 = vpack.c.b16 %v1110_v18, %v1110_v18 }
 0x11d   :  { %1179 = vmatpush.bf16.msra.mxu1 %v2073_v11  ;;  %v724_v11 = vmax.f32 %v2745_v37, 0.0  ;;  %v3216_v37 = vld [vmem:[#allocation23_spill] sm:$0xff] }
 0x11e   :  { %1169 = vmatpush.bf16.msrb.mxu2 %v3177_v55  ;;  %v3212_v55 = vld [vmem:[#allocation14_spill] sm:$0xff] }
 0x11f   :  { %1145 = vmatpush.bf16.msra.mxu3 %v1960_v6  ;;  %v1109_v6 = vunpack.c.l.b16 %v1645_v53  ;;  %v2855_v35 = vmax.f32 %v724_v11, %v909_v7  ;;  %v3229_v53 = vld [vmem:[#allocation50_spill] sm:$0xff]  ;;  %v3235_v11 = vld [vmem:[#allocation65_spill] sm:$0xff]  ;;  %v3236_v7 = vld [vmem:[#allocation55_spill] sm:$0xff] }
 0x120   :  { %1160 = vmatpush.bf16.msra.mxu0 %v3215_v19  ;;  %v840_v12 = vpop.f32.mrf.mxu0 }
 0x121   :  { %1180 = vmatpush.bf16.msra.mxu1 %v2117_v42  ;;  %v816_v42 = vpop.f32.mrf.mxu1 }
 0x122   :  { %1170 = vmatpush.bf16.msrb.mxu2 %v3212_v55 }
 0x123   :  { %1146 = vmatpush.bf16.msra.mxu3 %v3172_v60  ;;  %v2862_v60 = vpack.c.b16 %v1109_v6, %v1109_v6 }
 0x124   :  { %1205 = vmatpush.bf16.msrb.mxu0 %v3217_v27 }
 0x125   :  { %1181 = vmatpush.bf16.msra.mxu1 %v3214_v25  ;;  %1161 = vmatmul.bf16.vlgmr.msra.gmra.mxu0 %v2862_v60  ;;  %v3240_v25 = vld [vmem:[#allocation58_spill] sm:$0xff] }
 0x126   :  { %1171 = vmatpush.bf16.msrb.mxu2 %v3183_v61  ;;  %v866_v61 = vpop.f32.mrf.mxu3 }
 0x127   :  { %1147 = vmatpush.bf16.msra.mxu3 %v3213_v0 }
 0x128   :  { %1206 = vmatpush.bf16.msrb.mxu0 %v3220_v49 }
 0x129   :  { %1182 = vmatpush.bf16.msra.mxu1 %v3218_v23 }
 0x12a   :  { %1148 = vmatmul.bf16.vlgmr.msra.gmra.mxu3 %v2858_v3  ;;  %1172 = vmatpush.bf16.msrb.mxu2 %v3185_v13  ;;  %v3222_v13 = vld [vmem:[#allocation42_spill] sm:$0xff] }
 0x12b   :  { %1197 = vmatpush.bf16.msrb.mxu3 %v3216_v37  ;;  %v3241_v37 = vld [vmem:[#allocation67_spill] sm:$0xff] }
 0x12c   :  { %1207 = vmatpush.bf16.msrb.mxu0 %v3156_v50  ;;  %v1111_v50 = vunpack.c.l.b16 %v1646_v8 }
 0x12d   :  { %1183 = vmatpush.bf16.msra.mxu1 %v3221_v21  ;;  %v879_v57 = vpop.f32.mrf.mxu1 }
 0x12e   :  { %1173 = vmatpush.bf16.msrb.mxu2 %v3187_v43  ;;  %v3224_v43 = vld [vmem:[#allocation28_spill] sm:$0xff]  ;;  %v868_v46 = vpop.f32.mrf.mxu3  ;;  %v2897_v24 = vpack.c.b16 %v1111_v50, %v1111_v50 }
 0x12f   :  { %1198 = vmatpush.bf16.msrb.mxu3 %v3219_v48  ;;  %v841_v16 = vadd.f32 %v840_v12, %v3224_v43 }
 0x130   :  { %1208 = vmatpush.bf16.msrb.mxu0 %v3158_v15  ;;  %v842_v15 = vpop.f32.mrf.mxu0 }
 0x131   :  { %1184 = vmatpush.bf16.msra.mxu1 %v3222_v13  ;;  %1174 = vmatmul.bf16.vlgmr.msrb.gmra.mxu2 %v2881_v22 }
 0x132   :  { %1218 = vmatpush.bf16.msra.mxu2 %v3188_v4  ;;  %v853_v4 = vpop.f32.mrf.mxu2 }
 0x133   :  { %1199 = vmatpush.bf16.msrb.mxu3 %v3181_v56  ;;  %v2889_v56 = vpack.c.b16 %v1112_v34, %v1112_v34  ;;  %v854_v14 = vadd.f32 %v853_v4, %v841_v16 }
 0x134   :  { %1209 = vmatpush.bf16.msrb.mxu0 %v3160_v62 }
 0x135   :  { %v867_v62 = vadd.f32 %v866_v61, %v854_v14 }
 0x136   :  { %1219 = vmatpush.bf16.msra.mxu2 %v3155_v38  ;;  %v3226_v38 = vld [vmem:[#allocation51_spill] sm:$0xff] }
 0x137   :  { %1231 = vmatpush.bf16.msra.mxu3 %v3182_v44  ;;  %v3223_v44 = vld [vmem:[#allocation46_spill] sm:$0xff]  ;;  %v880_v58 = vadd.f32 %v879_v57, %v867_v62 }
 0x138   :  { %1185 = vmatpush.bf16.msra.mxu1 %v3223_v44  ;;  %1210 = vmatpush.bf16.msrb.mxu0 %v3162_v28  ;;  %v881_v28 = vpop.f32.mrf.mxu1 }
 0x13a   :  { %1647 = vmatmul.msk.bf16.vlgmr.msrb.gmra.mxu3 %vm554_vm2, %v2889_v56  ;;  %1220 = vmatpush.bf16.msra.mxu2 %v3191_v39  ;;  %v855_v39 = vpop.f32.mrf.mxu2 }
 0x13b   :  { %1232 = vmatpush.bf16.msra.mxu3 %v3184_v29  ;;  %v3225_v29 = vld [vmem:[#allocation49_spill] sm:$0xff] }
 0x13c   :  { %1186 = vmatpush.bf16.msra.mxu1 %v3225_v29  ;;  %1211 = vmatpush.bf16.msrb.mxu0 %v2329_v26 }
 0x13e   :  { %1221 = vmatpush.bf16.msra.mxu2 %v3159_v47  ;;  %v3230_v47 = vld [vmem:[#allocation53_spill] sm:$0xff] }
 0x13f   :  { %1233 = vmatpush.bf16.msra.mxu3 %v3186_v36  ;;  %1187 = vmatmul.bf16.vlgmr.msra.gmra.mxu1 %v2897_v24  ;;  %v3228_v36 = vld [vmem:[#allocation59_spill] sm:$0xff] }
 0x140   :  { %1244 = vmatpush.bf16.msrb.mxu1 %v3226_v38  ;;  %1212 = vmatpush.bf16.msrb.mxu0 %v3229_v53 }
 0x141   :  { %v949_v6 = vpop.f32.mrf.mxu3 }
 0x142   :  { %1222 = vmatpush.bf16.msra.mxu2 %v3193_v41  ;;  %v905_v26 = vpop.f32.mrf.mxu2  ;;  %v3232_v41 = vld [vmem:[#allocation57_spill] sm:$0xff]  ;;  %v950_v19 = vadd.f32 %v949_v6, %v2683_v32 }
 0x143   :  { %1234 = vmatpush.bf16.msra.mxu3 %v3189_v31  ;;  %v3231_v31 = vld [vmem:[#allocation62_spill] sm:$0xff]  ;;  %1213 = vmatmul.bf16.vlgmr.msrb.gmra.mxu0 %v2839_v45 }
 0x144   :  { %1245 = vmatpush.bf16.msrb.mxu1 %v3227_v20  ;;  %1257 = vmatpush.bf16.msra.mxu0 %v3165_v10  ;;  %v892_v10 = vpop.f32.mrf.mxu0 }
 0x145   :  { %v893_v45 = vadd.f32 %v892_v10, %v880_v58 }
 0x146   :  { %1223 = vmatpush.bf16.msra.mxu2 %v3198_v63  ;;  %v3234_v63 = vld [vmem:[#allocation60_spill] sm:$0xff] }
 0x147   :  { %1235 = vmatpush.bf16.msra.mxu3 %v3190_v5  ;;  %v3233_v5 = vld [vmem:[#allocation64_spill] sm:$0xff] }
 0x148   :  { %1246 = vmatpush.bf16.msrb.mxu1 %v3228_v36  ;;  %1258 = vmatpush.bf16.msra.mxu0 %v2433_v30  ;;  %v3237_v30 = vld [vmem:[#allocation63_spill] sm:$0xff] }
 0x149   :  { %v951_v0 = vpop.f32.mrf.mxu3 }
 0x14a   :  { %1224 = vmatpush.bf16.msra.mxu2 %v3202_v2  ;;  %v906_v2 = vadd.f32 %v905_v26, %v893_v45  ;;  %v907_v9 = vpop.f32.mrf.mxu2 }
 0x14b   :  { %1236 = vmatpush.bf16.msra.mxu3 %v3230_v47 }
 0x14c   :  { %1247 = vmatpush.bf16.msrb.mxu1 %v3231_v31  ;;  %1259 = vmatpush.bf16.msra.mxu0 %v2472_v40  ;;  %v725_v40 = vmax.f32 %v3238_v51, 0.0  ;;  %v910_v55 = vmax.f32 %v906_v2, 0.0 }
 0x14e   :  { %1225 = vmatpush.bf16.msra.mxu2 %v3206_v52  ;;  %v3239_v52 = vld [vmem:[#allocation66_spill] sm:$0xff]  ;;  %v912_v42 = vmax.f32 %v725_v40, %v910_v55 }
 0x14f   :  { %1237 = vmatpush.bf16.msra.mxu3 %v3232_v41 }
 0x150   :  { %1248 = vmatpush.bf16.msrb.mxu1 %v3233_v5  ;;  %1260 = vmatpush.bf16.msra.mxu0 %v3237_v30 }
 0x151   :  { %1226 = vmatmul.bf16.vlgmr.msra.gmra.mxu2 %v2858_v3  ;;  %v894_v3 = vpop.f32.mrf.mxu0 }
 0x152   :  { %1275 = vmatpush.bf16.msrb.mxu2 %v3236_v7 }
 0x153   :  { %1238 = vmatpush.bf16.msra.mxu3 %v3234_v63 }
 0x154   :  { %1249 = vmatpush.bf16.msrb.mxu1 %v3235_v11  ;;  %1261 = vmatpush.bf16.msra.mxu0 %v2515_v1  ;;  %v975_v23 = vpop.f32.mrf.mxu2 }
 0x156   :  { %1239 = vmatmul.bf16.vlgmr.msra.gmra.mxu3 %v2862_v60  ;;  %1276 = vmatpush.bf16.msrb.mxu2 %v3240_v25  ;;  %v962_v60 = vpop.f32.mrf.mxu1 }
 0x157   :  { %v963_v27 = vadd.f32 %v962_v60, %v950_v19 }
 0x158   :  { %1250 = vmatpush.bf16.msrb.mxu1 %v3239_v52  ;;  %1262 = vmatpush.bf16.msra.mxu0 %v2535_v17 }
 0x159   :  { %v976_v49 = vadd.f32 %v975_v23, %v963_v27 }
 0x15a   :  { %1277 = vmatpush.bf16.msrb.mxu2 %v3203_v59 }
 0x15c   :  { %1251 = vmatpush.bf16.msrb.mxu1 %v3241_v37  ;;  %1263 = vmatpush.bf16.msra.mxu0 %v2557_v33  ;;  %v977_v1 = vpop.f32.mrf.mxu2 }
 0x15e   :  { %v964_v48 = vpop.f32.mrf.mxu1 }
 0x15f   :  { %1252 = vmatmul.bf16.vlgmr.msrb.gmra.mxu1 %v2881_v22 }
 0x160   :  { %1264 = vmatpush.bf16.msra.mxu0 %v2571_v54  ;;  %v988_v21 = vpop.f32.mrf.mxu0 }
 0x161   :  { %1648 = vmatmul.msk.bf16.vlgmr.msrb.gmra.mxu2 %vm554_vm2, %v2889_v56  ;;  %v1001_v59 = vpop.f32.mrf.mxu3  ;;  %v989_v17 = vadd.f32 %v988_v21, %v976_v49 }
 0x163   :  { %1265 = vmatmul.bf16.vlgmr.msra.gmra.mxu0 %v2897_v24  ;;  %v1002_v8 = vadd.f32 %v1001_v59, %v989_v17 }
 0x166   :  { %v1014_v18 = vpop.f32.mrf.mxu1 }
 0x167   :  { %v1015_v34 = vadd.f32 %v1014_v18, %v1002_v8 }
 0x168   :  { %v990_v12 = vpop.f32.mrf.mxu0 }
 0x169   :  { %v1003_v61 = vpop.f32.mrf.mxu3  ;;  %v1096_v33 = vmax.f32 %v1015_v34, 0.0 }
 0x16b   :  { %v1098_v13 = vmax.f32 %v2855_v35, %v1096_v33 }
 0x16e   :  { %v1016_v22 = vpop.f32.mrf.mxu1 }
 0x174   :  { %v1027_v50 = vpop.f32.mrf.mxu2 }
 0x175   :  { %v1028_v46 = vadd.f32 %v1027_v50, %v3224_v43 }
 0x179   :  { %v1053_v44 = vpop.f32.mrf.mxu1 }
 0x17c   :  { %v1029_v56 = vpop.f32.mrf.mxu2 }
 0x180   :  { %v1040_v4 = vpop.f32.mrf.mxu0 }
 0x181   :  { %v1066_v16 = vpop.f32.mrf.mxu3  ;;  %v1055_v54 = vpop.f32.mrf.mxu1  ;;  %v1041_v24 = vadd.f32 %v1040_v4, %v1028_v46 }
 0x183   :  { %v1054_v29 = vadd.f32 %v1053_v44, %v1041_v24 }
 0x185   :  { %v1067_v14 = vadd.f32 %v1066_v16, %v1054_v29 }
 0x188   :  { %v1042_v38 = vpop.f32.mrf.mxu0 }
 0x189   :  { %v1068_v15 = vpop.f32.mrf.mxu3 }
 0x191   :  { %v1092_v57 = vpop.f32.mrf.mxu3 }
 0x194   :  { %v1079_v62 = vpop.f32.mrf.mxu2 }
 0x195   :  { %v1080_v58 = vadd.f32 %v1079_v62, %v1067_v14 }
 0x197   :  { %v1093_v20 = vadd.f32 %v1092_v57, %v1080_v58 }
 0x199   :  { %v1094_v39 = vpop.f32.mrf.mxu3  ;;  %v1136_v36 = vpop.f32.mrf.mxu1  ;;  %v1097_v35 = vmax.f32 %v1093_v20, 0.0 }
 0x19a   :  { %v1137_v2 = vadd.f32 %v1136_v36, %v2683_v32 }
 0x19b   :  { %v1099_v28 = vmax.f32 %v912_v42, %v1097_v35 }
 0x19c   :  { %v1081_v53 = vpop.f32.mrf.mxu2 }
 0x1a1   :  { %v1138_v47 = vpop.f32.mrf.mxu1 }
 0x1a2   :  { %v1162_v31 = vpop.f32.mrf.mxu0 }
 0x1aa   :  { %v1164_v41 = vpop.f32.mrf.mxu0 }
 0x1ad   :  { %v1149_v26 = vpop.f32.mrf.mxu3 }
 0x1ae   :  { %v1150_v51 = vadd.f32 %v1149_v26, %v1137_v2 }
 0x1b0   :  { %v1163_v52 = vadd.f32 %v1162_v31, %v1150_v51 }
 0x1b4   :  { %v1175_v6 = vpop.f32.mrf.mxu2 }
 0x1b5   :  { %v1151_v5 = vpop.f32.mrf.mxu3  ;;  %v1176_v19 = vadd.f32 %v1175_v6, %v1163_v52 }
 0x1bc   :  { %v1188_v10 = vpop.f32.mrf.mxu1  ;;  %v1177_v11 = vpop.f32.mrf.mxu2 }
 0x1bd   :  { %v1201_v63 = vpop.f32.mrf.mxu3  ;;  %v1189_v60 = vadd.f32 %v1188_v10, %v1176_v19 }
 0x1bf   :  { %v1202_v49 = vadd.f32 %v1201_v63, %v1189_v60 }
 0x1c0   :  { %v1214_v30 = vpop.f32.mrf.mxu0 }
 0x1c1   :  { %v1215_v40 = vadd.f32 %v1214_v30, %v3224_v43  ;;  %v1283_v18 = vmax.f32 %v1202_v49, 0.0 }
 0x1c3   :  { %v1285_v43 = vmax.f32 %v1098_v13, %v1283_v18 }
 0x1c4   :  { %v1190_v45 = vpop.f32.mrf.mxu1 }
 0x1c5   :  { %v1203_v7 = vpop.f32.mrf.mxu3 }
 0x1c8   :  { %v1216_v9 = vpop.f32.mrf.mxu0 }
 0x1d4   :  { %v1227_v55 = vpop.f32.mrf.mxu2 }
 0x1d5   :  { %v1228_v42 = vadd.f32 %v1227_v55, %v1215_v40 }
 0x1d9   :  { %v1240_v0 = vpop.f32.mrf.mxu3 }
 0x1da   :  { %v1241_v3 = vadd.f32 %v1240_v0, %v1228_v42 }
 0x1dc   :  { %v1253_v25 = vpop.f32.mrf.mxu1  ;;  %v1229_v37 = vpop.f32.mrf.mxu2 }
 0x1dd   :  { %v1254_v48 = vadd.f32 %v1253_v25, %v1241_v3 }
 0x1e0   :  { %v1266_v1 = vpop.f32.mrf.mxu0 }
 0x1e1   :  { %v1242_v27 = vpop.f32.mrf.mxu3  ;;  %v1267_v59 = vadd.f32 %v1266_v1, %v1254_v48 }
 0x1e4   :  { %v1255_v23 = vpop.f32.mrf.mxu1  ;;  %v1279_v32 = vpop.f32.mrf.mxu2 }
 0x1e5   :  { %v1280_v21 = vadd.f32 %v1279_v32, %v1267_v59 }
 0x1e7   :  { %v1284_v17 = vmax.f32 %v1280_v21, 0.0 }
 0x1e8   :  { %v1268_v61 = vpop.f32.mrf.mxu0 }
 0x1e9   :  { %v1286_v8 = vmax.f32 %v1099_v28, %v1284_v17 }
 0x1eb   :  { %v1287_v22 = vpack.c.bf16 %v1286_v8, %v1285_v43 }
 0x1ec   :  { %v1281_v34 = vpop.f32.mrf.mxu2 }
 0x1ed   :  { %1291 = vst.msk [vmem:[%s2954_s3] sm:$0xff] %vm1290_vm5, %v1287_v22 }

// kernel: forward.7
= control target key start
LH: loop header
LB: loop body
LE: loop exit
PB: predicated region body
PF: predicated region fallthrough
CT: control target
= control target key end

     0   :  { %vm583_vm0 = vcmask 1045504   ;;  %vm580_vm1 = vcmask 490496   ;;  %s2444_s0 = inlined_call_operand.vmem [shape: bf16[2,700], index: 0, kind: input, shape index: {}]   ;;  %s2445_s1 = inlined_call_operand.vmem [shape: bf16[700,256], index: 1, kind: input, shape index: {}]   ;;  %s2446_s2 = inlined_call_operand.vmem [shape: f32[1,256], index: 2, kind: input, shape index: {}]   ;;  %s2447_s3 = inlined_call_operand.vmem [shape: bf16[256,128], index: 3, kind: input, shape index: {}]   ;;  %s2448_s4 = inlined_call_operand.vmem [shape: f32[1,128], index: 4, kind: input, shape index: {}]   ;;  %s2449_s5 = inlined_call_operand.vmem [shape: bf16[128,128], index: 5, kind: input, shape index: {}]   ;;  %s2450_s6 = inlined_call_operand.vmem [shape: f32[1,128], index: 6, kind: input, shape index: {}]   ;;  %s2451_s7 = inlined_call_operand.vmem [shape: bf16[128,128], index: 7, kind: input, shape index: {}]   ;;  %s2452_s8 = inlined_call_operand.vmem [shape: f32[1,128], index: 8, kind: input, shape index: {}]   ;;  %s2453_s9 = inlined_call_operand.hbm [shape: f32[2,128], index: 9, kind: output, shape index: {}]  }
   0x1   :  { %v1149_v0 = vld [vmem:[%s2445_s1 + $0x70] sm:$0xf]  ;;  %v1588_v1 = vld [vmem:[%s2445_s1 + $0x74] sm:$0xf0]  ;;  %v1141_v5 = vld [vmem:[%s2445_s1 + $0x60] sm:$0xf] }
   0x2   :  { %v1277_v2 = vld [vmem:[%s2445_s1 + $0x170] sm:$0xf]  ;;  %v1150_v3 = vor.u32 %v1588_v1, %v1149_v0  ;;  %v1620_v4 = vld [vmem:[%s2445_s1 + $0x174] sm:$0xf0]  ;;  %v1586_v6 = vld [vmem:[%s2445_s1 + $0x64] sm:$0xf0] }
   0x3   :  { %v1278_v7 = vor.u32 %v1620_v4, %v1277_v2  ;;  %v1269_v8 = vld [vmem:[%s2445_s1 + $0x160] sm:$0xf]  ;;  %v1618_v9 = vld [vmem:[%s2445_s1 + $0x164] sm:$0xf0]  ;;  %v1341_v10 = vld [vmem:[%s2445_s1 + $0x1f0] sm:$0xf]  ;;  %v1142_v11 = vor.u32 %v1586_v6, %v1141_v5 }
   0x4   :  { %590 = vmatpush.bf16.msra.mxu0 %v1150_v3  ;;  %v1636_v12 = vld [vmem:[%s2445_s1 + $0x1f4] sm:$0xf0]  ;;  %v1133_v13 = vld [vmem:[%s2445_s1 + $0x50] sm:$0xf]  ;;  %v1270_v15 = vor.u32 %v1618_v9, %v1269_v8  ;;  %v1333_v21 = vld [vmem:[%s2445_s1 + $0x1e0] sm:$0xf] }
   0x5   :  { %v1584_v14 = vld [vmem:[%s2445_s1 + $0x54] sm:$0xf0]  ;;  %616 = vmatpush.bf16.msra.mxu2 %v1278_v7  ;;  %v1342_v16 = vor.u32 %v1636_v12, %v1341_v10  ;;  %v1261_v17 = vld [vmem:[%s2445_s1 + $0x150] sm:$0xf]  ;;  %v1634_v22 = vld [vmem:[%s2445_s1 + $0x1e4] sm:$0xf0] }
   0x6   :  { %v1616_v18 = vld [vmem:[%s2445_s1 + $0x154] sm:$0xf0]  ;;  %v1213_v19 = vld [vmem:[%s2445_s1 + $0xf0] sm:$0xf]  ;;  %v1334_v24 = vor.u32 %v1634_v22, %v1333_v21  ;;  %v1134_v25 = vor.u32 %v1584_v14, %v1133_v13  ;;  %v1125_v26 = vld [vmem:[%s2445_s1 + $0x40] sm:$0xf] }
   0x7   :  { %v1604_v20 = vld [vmem:[%s2445_s1 + $0xf4] sm:$0xf0]  ;;  %629 = vmatpush.bf16.msra.mxu3 %v1342_v16  ;;  %v1205_v27 = vld [vmem:[%s2445_s1 + $0xe0] sm:$0xf]  ;;  %v1602_v28 = vld [vmem:[%s2445_s1 + $0xe4] sm:$0xf0]  ;;  %v1262_v29 = vor.u32 %v1616_v18, %v1261_v17 }
   0x8   :  { %v1214_v23 = vor.u32 %v1604_v20, %v1213_v19  ;;  %591 = vmatpush.bf16.msra.mxu0 %v1142_v11  ;;  %v1582_v30 = vld [vmem:[%s2445_s1 + $0x44] sm:$0xf0]  ;;  %v1206_v31 = vor.u32 %v1602_v28, %v1205_v27  ;;  %v1325_v32 = vld [vmem:[%s2445_s1 + $0x1d0] sm:$0xf]  ;;  %v1632_v33 = vld [vmem:[%s2445_s1 + $0x1d4] sm:$0xf0] }
   0x9   :  { %617 = vmatpush.bf16.msra.mxu2 %v1270_v15  ;;  %v1253_v34 = vld [vmem:[%s2445_s1 + $0x140] sm:$0xf]  ;;  %v1614_v35 = vld [vmem:[%s2445_s1 + $0x144] sm:$0xf0]  ;;  %v1326_v36 = vor.u32 %v1632_v33, %v1325_v32  ;;  %v1197_v37 = vld [vmem:[%s2445_s1 + $0xd0] sm:$0xf]  ;;  %v1126_v39 = vor.u32 %v1582_v30, %v1125_v26 }
   0xa   :  { %603 = vmatpush.bf16.msra.mxu1 %v1214_v23  ;;  %v1600_v38 = vld [vmem:[%s2445_s1 + $0xd4] sm:$0xf0]  ;;  %v1317_v40 = vld [vmem:[%s2445_s1 + $0x1c0] sm:$0xf]  ;;  %v1630_v41 = vld [vmem:[%s2445_s1 + $0x1c4] sm:$0xf0]  ;;  %v1254_v42 = vor.u32 %v1614_v35, %v1253_v34 }
   0xb   :  { %630 = vmatpush.bf16.msra.mxu3 %v1334_v24  ;;  %v1117_v43 = vld [vmem:[%s2445_s1 + $0x30] sm:$0xf]  ;;  %v1580_v44 = vld [vmem:[%s2445_s1 + $0x34] sm:$0xf0]  ;;  %v1198_v46 = vor.u32 %v1600_v38, %v1197_v37  ;;  %v1189_v48 = vld [vmem:[%s2445_s1 + $0xc0] sm:$0xf]  ;;  %v1318_v50 = vor.u32 %v1630_v41, %v1317_v40 }
   0xc   :  { %592 = vmatpush.bf16.msra.mxu0 %v1134_v25  ;;  %v1245_v45 = vld [vmem:[%s2445_s1 + $0x130] sm:$0xf]  ;;  %v1612_v47 = vld [vmem:[%s2445_s1 + $0x134] sm:$0xf0]  ;;  %v1598_v49 = vld [vmem:[%s2445_s1 + $0xc4] sm:$0xf0]  ;;  %v1118_v51 = vor.u32 %v1580_v44, %v1117_v43 }
   0xd   :  { %618 = vmatpush.bf16.msra.mxu2 %v1262_v29  ;;  %v1309_v52 = vld [vmem:[%s2445_s1 + $0x1b0] sm:$0xf]  ;;  %v1628_v53 = vld [vmem:[%s2445_s1 + $0x1b4] sm:$0xf0]  ;;  %v1246_v54 = vor.u32 %v1612_v47, %v1245_v45  ;;  %v1109_v55 = vld [vmem:[%s2445_s1 + $0x20] sm:$0xf]  ;;  %v1190_v58 = vor.u32 %v1598_v49, %v1189_v48 }
   0xe   :  { %604 = vmatpush.bf16.msra.mxu1 %v1206_v31  ;;  %v1578_v56 = vld [vmem:[%s2445_s1 + $0x24] sm:$0xf0]  ;;  %v1237_v57 = vld [vmem:[%s2445_s1 + $0x120] sm:$0xf]  ;;  %v1181_v60 = vld [vmem:[%s2445_s1 + $0xb0] sm:$0xf]  ;;  %v1310_v62 = vor.u32 %v1628_v53, %v1309_v52 }
   0xf   :  { %631 = vmatpush.bf16.msra.mxu3 %v1326_v36  ;;  %v1610_v59 = vld [vmem:[%s2445_s1 + $0x124] sm:$0xf0]  ;;  %v1596_v61 = vld [vmem:[%s2445_s1 + $0xb4] sm:$0xf0]  ;;  %v1110_v63 = vor.u32 %v1578_v56, %v1109_v55  ;;  %v1301_v0 = vld [vmem:[%s2445_s1 + $0x1a0] sm:$0xf] }
  0x10   :  { %593 = vmatpush.bf16.msra.mxu0 %v1126_v39  ;;  %v1626_v1 = vld [vmem:[%s2445_s1 + $0x1a4] sm:$0xf0]  ;;  %v1238_v2 = vor.u32 %v1610_v59, %v1237_v57  ;;  %v1101_v3 = vld [vmem:[%s2445_s1 + $0x10] sm:$0xf]  ;;  %v1576_v4 = vld [vmem:[%s2445_s1 + $0x14] sm:$0xf0]  ;;  %v1182_v6 = vor.u32 %v1596_v61, %v1181_v60 }
  0x11   :  { %619 = vmatpush.bf16.msra.mxu2 %v1254_v42  ;;  %v1229_v5 = vld [vmem:[%s2445_s1 + $0x110] sm:$0xf]  ;;  %v1608_v7 = vld [vmem:[%s2445_s1 + $0x114] sm:$0xf0]  ;;  %v1173_v8 = vld [vmem:[%s2445_s1 + $0xa0] sm:$0xf]  ;;  %v1302_v10 = vor.u32 %v1626_v1, %v1301_v0  ;;  %v1102_v11 = vor.u32 %v1576_v4, %v1101_v3 }
  0x12   :  { %605 = vmatpush.bf16.msra.mxu1 %v1198_v46  ;;  %v1594_v9 = vld [vmem:[%s2445_s1 + $0xa4] sm:$0xf0]  ;;  %v1093_v12 = vld [vmem:[%s2445_s1] sm:$0xf]  ;;  %v1293_v13 = vld [vmem:[%s2445_s1 + $0x190] sm:$0xf]  ;;  %v1230_v15 = vor.u32 %v1608_v7, %v1229_v5 }
  0x13   :  { %632 = vmatpush.bf16.msra.mxu3 %v1318_v50  ;;  %v1624_v14 = vld [vmem:[%s2445_s1 + $0x194] sm:$0xf0]  ;;  %v1574_v16 = vld [vmem:[%s2445_s1 + $0x4] sm:$0xf0]  ;;  %v1221_v17 = vld [vmem:[%s2445_s1 + $0x100] sm:$0xf]  ;;  %v1174_v19 = vor.u32 %v1594_v9, %v1173_v8 }
  0x14   :  { %594 = vmatpush.bf16.msra.mxu0 %v1118_v51  ;;  %v1606_v18 = vld [vmem:[%s2445_s1 + $0x104] sm:$0xf0]  ;;  %v1405_v20 = vld [vmem:[%s2445_s1 + $0x270] sm:$0xf]  ;;  %v1652_v21 = vld [vmem:[%s2445_s1 + $0x274] sm:$0xf0]  ;;  %v1294_v24 = vor.u32 %v1624_v14, %v1293_v13  ;;  %v1094_v27 = vor.u32 %v1574_v16, %v1093_v12 }
  0x15   :  { %620 = vmatpush.bf16.msra.mxu2 %v1246_v54  ;;  %v1587_v22 = vld [vmem:[%s2445_s1 + $0x74] sm:$0xf]  ;;  %v1151_v23 = vld [vmem:[%s2445_s1 + $0x78] sm:$0xf0]  ;;  %v1165_v25 = vld [vmem:[%s2445_s1 + $0x90] sm:$0xf]  ;;  %v1222_v31 = vor.u32 %v1606_v18, %v1221_v17  ;;  %v1406_v32 = vor.u32 %v1652_v21, %v1405_v20 }
  0x16   :  { %606 = vmatpush.bf16.msra.mxu1 %v1190_v58  ;;  %v1592_v26 = vld [vmem:[%s2445_s1 + $0x94] sm:$0xf0]  ;;  %v1285_v28 = vld [vmem:[%s2445_s1 + $0x180] sm:$0xf]  ;;  %v1622_v29 = vld [vmem:[%s2445_s1 + $0x184] sm:$0xf0]  ;;  %v1154_v36 = vor.u32 %v1587_v22, %v1151_v23 }
  0x17   :  { %633 = vmatpush.bf16.msra.mxu3 %v1310_v62  ;;  %v1603_v30 = vld [vmem:[%s2445_s1 + $0xf4] sm:$0xf]  ;;  %v1215_v33 = vld [vmem:[%s2445_s1 + $0xf8] sm:$0xf0]  ;;  %v1437_v34 = vld [vmem:[%s2445_s1 + $0x2b0] sm:$0xf]  ;;  %v1166_v40 = vor.u32 %v1592_v26, %v1165_v25  ;;  %v1286_v42 = vor.u32 %v1622_v29, %v1285_v28 }
  0x18   :  { %595 = vmatpush.bf16.msra.mxu0 %v1110_v63  ;;  %v1660_v35 = vld [vmem:[%s2445_s1 + $0x2b4] sm:$0x30]  ;;  %v1397_v37 = vld [vmem:[%s2445_s1 + $0x260] sm:$0xf]  ;;  %v1650_v38 = vld [vmem:[%s2445_s1 + $0x264] sm:$0xf0]  ;;  %v1218_v45 = vor.u32 %v1603_v30, %v1215_v33 }
  0x19   :  { %621 = vmatpush.bf16.msra.mxu2 %v1238_v2  ;;  %v1585_v39 = vld [vmem:[%s2445_s1 + $0x64] sm:$0xf]  ;;  %v1143_v41 = vld [vmem:[%s2445_s1 + $0x68] sm:$0xf0]  ;;  %v1157_v43 = vld [vmem:[%s2445_s1 + $0x80] sm:$0xf]  ;;  %v1438_v46 = vor.u32 %v1660_v35, %v1437_v34  ;;  %v1398_v48 = vor.u32 %v1650_v38, %v1397_v37 }
  0x1a   :  { %607 = vmatpush.bf16.msra.mxu1 %v1182_v6  ;;  %v1590_v44 = vld [vmem:[%s2445_s1 + $0x84] sm:$0xf0]  ;;  %v34_v47 = vld [vmem:[%s2444_s0] sm:$0x3f]  ;;  %v1207_v50 = vld [vmem:[%s2445_s1 + $0xe8] sm:$0xf0]  ;;  %v1146_v51 = vor.u32 %v1585_v39, %v1143_v41 }
  0x1b   :  { %634 = vmatpush.bf16.msra.mxu3 %v1302_v10  ;;  %v1601_v49 = vld [vmem:[%s2445_s1 + $0xe4] sm:$0xf]  ;;  %130 = vst [vmem:[#allocation1] ss:$9 sm:$0xff] %v34_v47  ;;  %v1389_v52 = vld [vmem:[%s2445_s1 + $0x250] sm:$0xf]  ;;  %v1158_v54 = vor.u32 %v1590_v44, %v1157_v43 }
  0x1c   :  { %596 = vmatpush.bf16.msra.mxu0 %v1102_v11  ;;  %v1648_v53 = vld [vmem:[%s2445_s1 + $0x254] sm:$0xf0]  ;;  %v1583_v55 = vld [vmem:[%s2445_s1 + $0x54] sm:$0xf]  ;;  %v1135_v56 = vld [vmem:[%s2445_s1 + $0x58] sm:$0xf0]  ;;  %v1210_v58 = vor.u32 %v1601_v49, %v1207_v50 }
  0x1d   :  { %622 = vmatpush.bf16.msra.mxu2 %v1230_v15  ;;  %v585_v57 = vsel %vm583_vm0, %v1438_v46, 0  ;;  %v1429_v59 = vld [vmem:[%s2445_s1 + $0x2a0] sm:$0xf]  ;;  %v1658_v60 = vld [vmem:[%s2445_s1 + $0x2a4] sm:$0xf0]  ;;  %v1390_v61 = vor.u32 %v1648_v53, %v1389_v52  ;;  %v1138_v0 = vor.u32 %v1583_v55, %v1135_v56 }
  0x1e   :  { %608 = vmatpush.bf16.msra.mxu1 %v1174_v19  ;;  %v1599_v62 = vld [vmem:[%s2445_s1 + $0xd4] sm:$0xf]  ;;  %v1199_v63 = vld [vmem:[%s2445_s1 + $0xd8] sm:$0xf0]  ;;  %v1381_v1 = vld [vmem:[%s2445_s1 + $0x240] sm:$0xf]  ;;  %v1430_v5 = vor.u32 %v1658_v60, %v1429_v59 }
  0x1f   :  { %635 = vmatpush.bf16.msra.mxu3 %v1294_v24  ;;  %v1646_v2 = vld [vmem:[%s2445_s1 + $0x244] sm:$0xf0]  ;;  %v1581_v3 = vld [vmem:[%s2445_s1 + $0x44] sm:$0xf]  ;;  %v1127_v4 = vld [vmem:[%s2445_s1 + $0x48] sm:$0xf0]  ;;  %v1202_v9 = vor.u32 %v1599_v62, %v1199_v63 }
  0x20   :  { %597 = vmatpush.bf16.msra.mxu0 %v1094_v27  ;;  %v1421_v6 = vld [vmem:[%s2445_s1 + $0x290] sm:$0xf]  ;;  %v1656_v7 = vld [vmem:[%s2445_s1 + $0x294] sm:$0xf0]  ;;  %v1382_v12 = vor.u32 %v1646_v2, %v1381_v1  ;;  %v1597_v13 = vld [vmem:[%s2445_s1 + $0xc4] sm:$0xf]  ;;  %v1130_v15 = vor.u32 %v1581_v3, %v1127_v4 }
  0x21   :  { %623 = vmatpush.bf16.msra.mxu2 %v1222_v31  ;;  %v1191_v14 = vld [vmem:[%s2445_s1 + $0xc8] sm:$0xf0]  ;;  %v1373_v16 = vld [vmem:[%s2445_s1 + $0x230] sm:$0xf]  ;;  %v1644_v17 = vld [vmem:[%s2445_s1 + $0x234] sm:$0xf0]  ;;  %v1422_v21 = vor.u32 %v1656_v7, %v1421_v6 }
  0x22   :  { %609 = vmatpush.bf16.msra.mxu1 %v1166_v40  ;;  %v2054_v8 = vld [vmem:[#allocation1] sm:$0xff]  ;;  %v2056_v10 = vld [vmem:[#allocation1 + $0x9] sm:$0xff]  ;;  %v2058_v11 = vld [vmem:[#allocation1 + $0x12] sm:$0xff]  ;;  %v1194_v22 = vor.u32 %v1597_v13, %v1191_v14  ;;  %v1374_v26 = vor.u32 %v1644_v17, %v1373_v16 }
  0x23   :  { %636 = vmatpush.bf16.msra.mxu3 %v1286_v42  ;;  %598 = vmatmul.bf16.vlgmr.msra.gmra.mxu0 %v2054_v8  ;;  %v2074_v18 = vld [vmem:[#allocation1 + $0x1b] sm:$0xff]  ;;  %v1579_v19 = vld [vmem:[%s2445_s1 + $0x34] sm:$0xf]  ;;  %v1654_v24 = vld [vmem:[%s2445_s1 + $0x284] sm:$0xf0] }
  0x24   :  { %642 = vmatpush.bf16.msrb.mxu0 %v1406_v32  ;;  %v1119_v20 = vld [vmem:[%s2445_s1 + $0x38] sm:$0xf0]  ;;  %624 = vmatmul.bf16.vlgmr.msra.gmra.mxu2 %v2058_v11  ;;  %v1413_v23 = vld [vmem:[%s2445_s1 + $0x280] sm:$0xf]  ;;  %v1595_v25 = vld [vmem:[%s2445_s1 + $0xb4] sm:$0xf] }
  0x25   :  { %668 = vmatpush.bf16.msrb.mxu2 %v1154_v36  ;;  %v1183_v27 = vld [vmem:[%s2445_s1 + $0xb8] sm:$0xf0]  ;;  %v1619_v28 = vld [vmem:[%s2445_s1 + $0x174] sm:$0xf]  ;;  %v1122_v30 = vor.u32 %v1579_v19, %v1119_v20  ;;  %v1365_v31 = vld [vmem:[%s2445_s1 + $0x220] sm:$0xf]  ;;  %v1414_v35 = vor.u32 %v1654_v24, %v1413_v23 }
  0x26   :  { %610 = vmatpush.bf16.msra.mxu1 %v1158_v54  ;;  %637 = vmatmul.bf16.vlgmr.msra.gmra.mxu3 %v2074_v18  ;;  %v1279_v29 = vld [vmem:[%s2445_s1 + $0x178] sm:$0xf0]  ;;  %v1642_v32 = vld [vmem:[%s2445_s1 + $0x224] sm:$0xf0]  ;;  %v1577_v33 = vld [vmem:[%s2445_s1 + $0x24] sm:$0xf]  ;;  %v1186_v36 = vor.u32 %v1595_v25, %v1183_v27 }
  0x27   :  { %681 = vmatpush.bf16.msrb.mxu3 %v1218_v45  ;;  %v1111_v34 = vld [vmem:[%s2445_s1 + $0x28] sm:$0xf0]  ;;  %v1282_v37 = vor.u32 %v1619_v28, %v1279_v29  ;;  %v1593_v38 = vld [vmem:[%s2445_s1 + $0xa4] sm:$0xf]  ;;  %v1366_v39 = vor.u32 %v1642_v32, %v1365_v31  ;;  %v1357_v44 = vld [vmem:[%s2445_s1 + $0x210] sm:$0xf] }
  0x28   :  { %643 = vmatpush.bf16.msrb.mxu0 %v1398_v48  ;;  %v1175_v40 = vld [vmem:[%s2445_s1 + $0xa8] sm:$0xf0]  ;;  %v1617_v41 = vld [vmem:[%s2445_s1 + $0x164] sm:$0xf]  ;;  %v1114_v43 = vor.u32 %v1577_v33, %v1111_v34  ;;  %v1640_v45 = vld [vmem:[%s2445_s1 + $0x214] sm:$0xf0] }
  0x29   :  { %669 = vmatpush.bf16.msrb.mxu2 %v1146_v51  ;;  %611 = vmatmul.bf16.vlgmr.msra.gmra.mxu1 %v2056_v10  ;;  %v1271_v42 = vld [vmem:[%s2445_s1 + $0x168] sm:$0xf0]  ;;  %v1575_v46 = vld [vmem:[%s2445_s1 + $0x14] sm:$0xf]  ;;  %v1103_v47 = vld [vmem:[%s2445_s1 + $0x18] sm:$0xf0]  ;;  %v1178_v50 = vor.u32 %v1593_v38, %v1175_v40  ;;  %v1358_v54 = vor.u32 %v1640_v45, %v1357_v44 }
  0x2a   :  { %659 = vmatpush.bf16.msrb.mxu1 %v585_v57  ;;  %v1659_v48 = vld [vmem:[%s2445_s1 + $0x2b4] sm:$0xf]  ;;  %v1439_v49 = vld [vmem:[%s2445_s1 + $0x2b8] sm:$0x30]  ;;  %v1274_v51 = vor.u32 %v1617_v41, %v1271_v42  ;;  %v1349_v52 = vld [vmem:[%s2445_s1 + $0x200] sm:$0xf] }
  0x2b   :  { %682 = vmatpush.bf16.msrb.mxu3 %v1210_v58  ;;  %v1591_v53 = vld [vmem:[%s2445_s1 + $0x94] sm:$0xf]  ;;  %v1167_v55 = vld [vmem:[%s2445_s1 + $0x98] sm:$0xf0]  ;;  %v1106_v58 = vor.u32 %v1575_v46, %v1103_v47  ;;  %v1638_v59 = vld [vmem:[%s2445_s1 + $0x204] sm:$0xf0] }
  0x2c   :  { %644 = vmatpush.bf16.msrb.mxu0 %v1390_v61  ;;  %v1615_v56 = vld [vmem:[%s2445_s1 + $0x154] sm:$0xf]  ;;  %v1263_v57 = vld [vmem:[%s2445_s1 + $0x158] sm:$0xf0]  ;;  %v1573_v60 = vld [vmem:[%s2445_s1 + $0x4] sm:$0xf]  ;;  %v1170_v3 = vor.u32 %v1591_v53, %v1167_v55  ;;  %v1350_v6 = vor.u32 %v1638_v59, %v1349_v52 }
  0x2d   :  { %670 = vmatpush.bf16.msrb.mxu2 %v1138_v0  ;;  %v2165_v61 = vld [vmem:[#allocation1 + $0x2d] sm:$0xff]  ;;  %v1343_v0 = vld [vmem:[%s2445_s1 + $0x1f8] sm:$0xf0]  ;;  %v1266_v4 = vor.u32 %v1615_v56, %v1263_v57  ;;  %v1589_v7 = vld [vmem:[%s2445_s1 + $0x84] sm:$0xf] }
  0x2e   :  { %660 = vmatpush.bf16.msrb.mxu1 %v1430_v5  ;;  %v1095_v62 = vld [vmem:[%s2445_s1 + $0x8] sm:$0xf0]  ;;  %v1635_v63 = vld [vmem:[%s2445_s1 + $0x1f4] sm:$0xf]  ;;  %v1407_v2 = vld [vmem:[%s2445_s1 + $0x278] sm:$0xf0]  ;;  %v1442_v5 = vor.u32 %v1659_v48, %v1439_v49 }
  0x2f   :  { %683 = vmatpush.bf16.msrb.mxu3 %v1202_v9  ;;  %v1651_v1 = vld [vmem:[%s2445_s1 + $0x274] sm:$0xf]  ;;  %v1159_v9 = vld [vmem:[%s2445_s1 + $0x88] sm:$0xf0]  ;;  %v1346_v13 = vor.u32 %v1635_v63, %v1343_v0  ;;  %v1613_v14 = vld [vmem:[%s2445_s1 + $0x144] sm:$0xf] }
  0x30   :  { %645 = vmatpush.bf16.msrb.mxu0 %v1382_v12  ;;  %v1098_v12 = vor.u32 %v1573_v60, %v1095_v62  ;;  %v1410_v16 = vor.u32 %v1651_v1, %v1407_v2  ;;  %v1633_v17 = vld [vmem:[%s2445_s1 + $0x1e4] sm:$0xf]  ;;  %v1335_v19 = vld [vmem:[%s2445_s1 + $0x1e8] sm:$0xf0]  ;;  %v588_v23 = vsel %vm583_vm0, %v1442_v5, 0 }
  0x31   :  { %671 = vmatpush.bf16.msrb.mxu2 %v1130_v15  ;;  %v1255_v15 = vld [vmem:[%s2445_s1 + $0x148] sm:$0xf0]  ;;  %v1649_v20 = vld [vmem:[%s2445_s1 + $0x264] sm:$0xf]  ;;  %v1338_v27 = vor.u32 %v1633_v17, %v1335_v19  ;;  %v1327_v28 = vld [vmem:[%s2445_s1 + $0x1d8] sm:$0xf0] }
  0x32   :  { %661 = vmatpush.bf16.msrb.mxu1 %v1422_v21  ;;  %v1399_v21 = vld [vmem:[%s2445_s1 + $0x268] sm:$0xf0]  ;;  %v2209_v24 = vld [vmem:[#allocation1 + $0x24] sm:$0xff]  ;;  %v1258_v25 = vor.u32 %v1613_v14, %v1255_v15  ;;  %v1611_v29 = vld [vmem:[%s2445_s1 + $0x134] sm:$0xf] }
  0x33   :  { %684 = vmatpush.bf16.msrb.mxu3 %v1194_v22  ;;  %v1162_v22 = vor.u32 %v1589_v7, %v1159_v9  ;;  %v1402_v31 = vor.u32 %v1649_v20, %v1399_v21  ;;  %v1647_v32 = vld [vmem:[%s2445_s1 + $0x254] sm:$0xf]  ;;  %v1657_v33 = vld [vmem:[%s2445_s1 + $0x2a4] sm:$0xf]  ;;  %v1431_v34 = vld [vmem:[%s2445_s1 + $0x2a8] sm:$0xf0] }
  0x34   :  { %646 = vmatpush.bf16.msrb.mxu0 %v1374_v26  ;;  %v1631_v26 = vld [vmem:[%s2445_s1 + $0x1d4] sm:$0xf] }
  0x35   :  { %672 = vmatpush.bf16.msrb.mxu2 %v1122_v30  ;;  %v1247_v30 = vld [vmem:[%s2445_s1 + $0x138] sm:$0xf0] }
  0x36   :  { %662 = vmatpush.bf16.msrb.mxu1 %v1414_v35  ;;  %v1391_v35 = vld [vmem:[%s2445_s1 + $0x258] sm:$0xf0] }
  0x37   :  { %685 = vmatpush.bf16.msrb.mxu3 %v1186_v36  ;;  %v1250_v36 = vor.u32 %v1611_v29, %v1247_v30 }
  0x38   :  { %647 = vmatpush.bf16.msrb.mxu0 %v1366_v39 }
  0x39   :  { %673 = vmatpush.bf16.msrb.mxu2 %v1114_v43  ;;  %1443 = vmatmul.msk.bf16.vlgmr.msrb.gmra.mxu1 %vm580_vm1, %v2165_v61 }
  0x3a   :  { %694 = vmatpush.bf16.msra.mxu1 %v1282_v37 }
  0x3b   :  { %686 = vmatpush.bf16.msrb.mxu3 %v1178_v50 }
  0x3c   :  { %648 = vmatpush.bf16.msrb.mxu0 %v1358_v54 }
  0x3d   :  { %674 = vmatpush.bf16.msrb.mxu2 %v1106_v58 }
  0x3e   :  { %695 = vmatpush.bf16.msra.mxu1 %v1274_v51 }
  0x3f   :  { %687 = vmatpush.bf16.msrb.mxu3 %v1170_v3 }
  0x40   :  { %649 = vmatpush.bf16.msrb.mxu0 %v1350_v6 }
  0x41   :  { %675 = vmatpush.bf16.msrb.mxu2 %v1098_v12 }
  0x42   :  { %696 = vmatpush.bf16.msra.mxu1 %v1266_v4 }
  0x43   :  { %650 = vmatmul.bf16.vlgmr.msrb.gmra.mxu0 %v2209_v24  ;;  %688 = vmatpush.bf16.msrb.mxu3 %v1162_v22 }
  0x44   :  { %707 = vmatpush.bf16.msra.mxu0 %v1346_v13  ;;  %676 = vmatmul.bf16.vlgmr.msrb.gmra.mxu2 %v2054_v8 }
  0x45   :  { %720 = vmatpush.bf16.msra.mxu2 %v1410_v16 }
  0x46   :  { %697 = vmatpush.bf16.msra.mxu1 %v1258_v25 }
  0x47   :  { %14 = vsyncpa [#allocation3], 0  ;;  %v1330_v37 = vor.u32 %v1631_v26, %v1327_v28  ;;  %737 = vmatpush.bf16.msra.mxu3 %v588_v23  ;;  %v1629_v38 = vld [vmem:[%s2445_s1 + $0x1c4] sm:$0xf]  ;;  %v1239_v40 = vld [vmem:[%s2445_s1 + $0x128] sm:$0xf0]  ;;  %v1434_v41 = vor.u32 %v1657_v33, %v1431_v34  ;;  %v1394_v8 = vor.u32 %v1647_v32, %v1391_v35 }
  0x48   :  { %708 = vmatpush.bf16.msra.mxu0 %v1338_v27  ;;  %v1609_v39 = vld [vmem:[%s2445_s1 + $0x124] sm:$0xf]  ;;  %689 = vmatmul.bf16.vlgmr.msrb.gmra.mxu3 %v2056_v10  ;;  %v1319_v42 = vld [vmem:[%s2445_s1 + $0x1c8] sm:$0xf0]  ;;  %v1655_v43 = vld [vmem:[%s2445_s1 + $0x294] sm:$0xf] }
  0x49   :  { %721 = vmatpush.bf16.msra.mxu2 %v1402_v31  ;;  %v1423_v44 = vld [vmem:[%s2445_s1 + $0x298] sm:$0xf0]  ;;  %v1645_v45 = vld [vmem:[%s2445_s1 + $0x244] sm:$0xf]  ;;  %v1383_v10 = vld [vmem:[%s2445_s1 + $0x248] sm:$0xf0]  ;;  %v1242_v46 = vor.u32 %v1609_v39, %v1239_v40  ;;  %v1322_v47 = vor.u32 %v1629_v38, %v1319_v42 }
  0x4a   :  { %698 = vmatpush.bf16.msra.mxu1 %v1250_v36  ;;  %v1627_v48 = vld [vmem:[%s2445_s1 + $0x1b4] sm:$0xf]  ;;  %v1231_v50 = vld [vmem:[%s2445_s1 + $0x118] sm:$0xf0]  ;;  %v1426_v51 = vor.u32 %v1655_v43, %v1423_v44  ;;  %v1386_v52 = vor.u32 %v1645_v45, %v1383_v10  ;;  %v1653_v54 = vld [vmem:[%s2445_s1 + $0x284] sm:$0xf] }
  0x4b   :  { %738 = vmatpush.bf16.msra.mxu3 %v1434_v41  ;;  %v1607_v49 = vld [vmem:[%s2445_s1 + $0x114] sm:$0xf]  ;;  %v1311_v53 = vld [vmem:[%s2445_s1 + $0x1b8] sm:$0xf0]  ;;  %v1415_v55 = vld [vmem:[%s2445_s1 + $0x288] sm:$0xf0] }
  0x4c   :  { %709 = vmatpush.bf16.msra.mxu0 %v1330_v37  ;;  %v1643_v56 = vld [vmem:[%s2445_s1 + $0x234] sm:$0xf]  ;;  %v1375_v57 = vld [vmem:[%s2445_s1 + $0x238] sm:$0xf0]  ;;  %v1234_v58 = vor.u32 %v1607_v49, %v1231_v50  ;;  %v1314_v59 = vor.u32 %v1627_v48, %v1311_v53  ;;  %v1605_v60 = vld [vmem:[%s2445_s1 + $0x104] sm:$0xf]  ;;  %v1418_v63 = vor.u32 %v1653_v54, %v1415_v55 }
  0x4d   :  { %722 = vmatpush.bf16.msra.mxu2 %v1394_v8  ;;  %v1223_v62 = vld [vmem:[%s2445_s1 + $0x108] sm:$0xf0]  ;;  %v1378_v0 = vor.u32 %v1643_v56, %v1375_v57  ;;  %v1625_v1 = vld [vmem:[%s2445_s1 + $0x1a4] sm:$0xf]  ;;  %v1668_v7 = vld [vmem:[%s2447_s3 + $0x38] sm:$0xff]  ;;  %s1723_s15 = smov [#allocation2]  }
  0x4e   :  { %699 = vmatpush.bf16.msra.mxu1 %v1242_v46  ;;  %v1303_v2 = vld [vmem:[%s2445_s1 + $0x1a8] sm:$0xf0]  ;;  %v1641_v3 = vld [vmem:[%s2445_s1 + $0x224] sm:$0xf]  ;;  %v1226_v5 = vor.u32 %v1605_v60, %v1223_v62  ;;  %v1623_v12 = vld [vmem:[%s2445_s1 + $0x194] sm:$0xf] }
  0x4f   :  { %739 = vmatpush.bf16.msra.mxu3 %v1426_v51  ;;  %v1367_v4 = vld [vmem:[%s2445_s1 + $0x228] sm:$0xf0]  ;;  %v1306_v6 = vor.u32 %v1625_v1, %v1303_v2  ;;  %v1295_v13 = vld [vmem:[%s2445_s1 + $0x198] sm:$0xf0]  ;;  %v1639_v14 = vld [vmem:[%s2445_s1 + $0x214] sm:$0xf] }
  0x50   :  { %710 = vmatpush.bf16.msra.mxu0 %v1322_v47  ;;  %v1370_v9 = vor.u32 %v1641_v3, %v1367_v4  ;;  %v1359_v15 = vld [vmem:[%s2445_s1 + $0x218] sm:$0xf0]  ;;  %v1298_v16 = vor.u32 %v1623_v12, %v1295_v13  ;;  %v1667_v17 = vld [vmem:[%s2447_s3 + $0x30] sm:$0xff]  ;;  %v1621_v20 = vld [vmem:[%s2445_s1 + $0x184] sm:$0xf]  ;;  %s1080_s16 = sshll.u32 %s1723_s15, 4  ;;  %s1081_s16 = int_to_ptr.vmem [resolvable:$true] %s1080_s16 }
  0x51   :  { %723 = vmatpush.bf16.msra.mxu2 %v1386_v52  ;;  %v1362_v19 = vor.u32 %v1639_v14, %v1359_v15  ;;  %v1287_v21 = vld [vmem:[%s2445_s1 + $0x188] sm:$0xf0]  ;;  %v1637_v22 = vld [vmem:[%s2445_s1 + $0x204] sm:$0xf]  ;;  %v1664_v27 = vld [vmem:[%s2447_s3 + $0x18] sm:$0xff] }
  0x52   :  { %700 = vmatpush.bf16.msra.mxu1 %v1234_v58  ;;  %v1351_v23 = vld [vmem:[%s2445_s1 + $0x208] sm:$0xf0]  ;;  %v1665_v26 = vld [vmem:[%s2447_s3 + $0x20] sm:$0xff]  ;;  %v1676_v32 = vld [vmem:[%s2447_s3 + $0x78] sm:$0xff] }
  0x53   :  { %740 = vmatpush.bf16.msra.mxu3 %v1418_v63  ;;  %v1354_v25 = vor.u32 %v1637_v22, %v1351_v23  ;;  %v1661_v28 = vld [vmem:[%s2447_s3] sm:$0xff]  ;;  %v1675_v33 = vld [vmem:[%s2447_s3 + $0x70] sm:$0xff]  ;;  %v1674_v38 = vld [vmem:[%s2447_s3 + $0x68] sm:$0xff] }
  0x54   :  { %711 = vmatpush.bf16.msra.mxu0 %v1314_v59  ;;  %v123_v30 = vld [vmem:[%s2446_s2] sm:$0x3]  ;;  %v1672_v10 = vld [vmem:[%s2447_s3 + $0x58] sm:$0xff]  ;;  %v1671_v47 = vld [vmem:[%s2447_s3 + $0x50] sm:$0xff] }
  0x55   :  { %724 = vmatpush.bf16.msra.mxu2 %v1378_v0  ;;  %v125_v34 = vperm.slane %v123_v30, 0  ;;  %v1673_v8 = vld [vmem:[%s2447_s3 + $0x60] sm:$0xff]  ;;  %v1670_v52 = vld [vmem:[%s2447_s3 + $0x48] sm:$0xff]  ;;  %v126_v63 = vperm.slane %v123_v30, 1  ;;  %v1680_v23 = vld [vmem:[%s2449_s5 + $0x18] sm:$0xff] }
  0x56   :  { %701 = vmatpush.bf16.msra.mxu1 %v1226_v5  ;;  %v1669_v57 = vld [vmem:[%s2447_s3 + $0x40] sm:$0xff]  ;;  %v1688_v30 = vld [vmem:[%s2451_s7 + $0x18] sm:$0xff] }
  0x57   :  { %895 = vmatpush.bf16.msrb.mxu3 %v1676_v32  ;;  %v1681_v22 = vld [vmem:[%s2449_s5 + $0x20] sm:$0xff] }
  0x58   :  { %712 = vmatpush.bf16.msra.mxu0 %v1306_v6  ;;  %1444 = vmatmul.msk.bf16.vlgmr.msra.gmra.mxu3 %vm580_vm1, %v2165_v61  ;;  %v1290_v61 = vor.u32 %v1621_v20, %v1287_v21  ;;  %v1683_v20 = vld [vmem:[%s2449_s5 + $0x30] sm:$0xff]  ;;  %v1682_v21 = vld [vmem:[%s2449_s5 + $0x28] sm:$0xff]  ;;  %v1694_v32 = vld [vmem:[%s2448_s4] ss:$0 sm:$0xff] }
  0x59   :  { %725 = vmatpush.bf16.msra.mxu2 %v1370_v9  ;;  %702 = vmatmul.bf16.vlgmr.msra.gmra.mxu1 %v2058_v11  ;;  %v1666_v11 = vld [vmem:[%s2447_s3 + $0x28] sm:$0xff] }
  0x5a   :  { %882 = vmatpush.bf16.msrb.mxu1 %v1668_v7 }
  0x5b   :  { %896 = vmatpush.bf16.msrb.mxu3 %v1675_v33 }
  0x5c   :  { %713 = vmatpush.bf16.msra.mxu0 %v1298_v16 }
  0x5d   :  { %726 = vmatpush.bf16.msra.mxu2 %v1362_v19  ;;  %v1684_v19 = vld [vmem:[%s2449_s5 + $0x38] sm:$0xff] }
  0x5e   :  { %883 = vmatpush.bf16.msrb.mxu1 %v1667_v17 }
  0x5f   :  { %897 = vmatpush.bf16.msrb.mxu3 %v1674_v38 }
  0x60   :  { %714 = vmatpush.bf16.msra.mxu0 %v1290_v61  ;;  %v1679_v61 = vld [vmem:[%s2449_s5 + $0x10] sm:$0xff] }
  0x61   :  { %727 = vmatpush.bf16.msra.mxu2 %v1354_v25 }
  0x62   :  { %884 = vmatpush.bf16.msrb.mxu1 %v1666_v11 }
  0x63   :  { %715 = vmatmul.bf16.vlgmr.msra.gmra.mxu0 %v2074_v18  ;;  %v1663_v18 = vld [vmem:[%s2447_s3 + $0x10] sm:$0xff]  ;;  %898 = vmatpush.bf16.msrb.mxu3 %v1673_v8 }
  0x64   :  { %728 = vmatmul.bf16.vlgmr.msra.gmra.mxu2 %v2209_v24  ;;  %v1662_v24 = vld [vmem:[%s2447_s3 + $0x8] sm:$0xff]  ;;  %978 = vmatpush.bf16.msrb.mxu0 %v1684_v19 }
  0x66   :  { %885 = vmatpush.bf16.msrb.mxu1 %v1665_v26  ;;  %v1678_v26 = vld [vmem:[%s2449_s5 + $0x8] sm:$0xff] }
  0x67   :  { %899 = vmatpush.bf16.msrb.mxu3 %v1672_v10  ;;  %v1696_v10 = vld [vmem:[%s2452_s8] ss:$0 sm:$0xff] }
  0x68   :  { %979 = vmatpush.bf16.msrb.mxu0 %v1683_v20 }
  0x6a   :  { %886 = vmatpush.bf16.msrb.mxu1 %v1664_v27  ;;  %v1677_v27 = vld [vmem:[%s2449_s5] sm:$0xff] }
  0x6b   :  { %900 = vmatpush.bf16.msrb.mxu3 %v1671_v47 }
  0x6c   :  { %980 = vmatpush.bf16.msrb.mxu0 %v1682_v21 }
  0x6e   :  { %887 = vmatpush.bf16.msrb.mxu1 %v1663_v18  ;;  %v1692_v18 = vld [vmem:[%s2451_s7 + $0x38] sm:$0xff] }
  0x6f   :  { %901 = vmatpush.bf16.msrb.mxu3 %v1670_v52  ;;  %1061 = vmatpush.bf16.msrb.mxu2 %v1692_v18 }
  0x70   :  { %981 = vmatpush.bf16.msrb.mxu0 %v1681_v22 }
  0x72   :  { %888 = vmatpush.bf16.msrb.mxu1 %v1662_v24  ;;  %v1691_v24 = vld [vmem:[%s2451_s7 + $0x30] sm:$0xff] }
  0x73   :  { %902 = vmatpush.bf16.msrb.mxu3 %v1669_v57  ;;  %1062 = vmatpush.bf16.msrb.mxu2 %v1691_v24 }
  0x74   :  { %982 = vmatpush.bf16.msrb.mxu0 %v1680_v23 }
  0x76   :  { %889 = vmatpush.bf16.msrb.mxu1 %v1661_v28  ;;  %v1690_v28 = vld [vmem:[%s2451_s7 + $0x28] sm:$0xff] }
  0x77   :  { %1063 = vmatpush.bf16.msrb.mxu2 %v1690_v28 }
  0x78   :  { %983 = vmatpush.bf16.msrb.mxu0 %v1679_v61 }
  0x7c   :  { %984 = vmatpush.bf16.msrb.mxu0 %v1678_v26 }
  0x80   :  { %985 = vmatpush.bf16.msrb.mxu0 %v1677_v27 }
  0xa0   :  { %v599_v31 = vpop.f32.mrf.mxu0 }
  0xa1   :  { %v600_v35 = vadd.f32 %v599_v31, %v125_v34  ;;  %v1687_v31 = vld [vmem:[%s2451_s7 + $0x10] sm:$0xff] }
  0xa6   :  { %v612_v29 = vpop.f32.mrf.mxu1 }
  0xa7   :  { %v625_v37 = vpop.f32.mrf.mxu2  ;;  %v613_v41 = vadd.f32 %v612_v29, %v600_v35  ;;  %v1689_v29 = vld [vmem:[%s2451_s7 + $0x20] sm:$0xff] }
  0xa8   :  { %v601_v39 = vpop.f32.mrf.mxu0  ;;  %1064 = vmatpush.bf16.msrb.mxu2 %v1689_v29 }
  0xa9   :  { %v638_v40 = vpop.f32.mrf.mxu3  ;;  %v626_v42 = vadd.f32 %v625_v37, %v613_v41  ;;  %v1686_v39 = vld [vmem:[%s2451_s7 + $0x8] sm:$0xff]  ;;  %v1695_v41 = vld [vmem:[%s2450_s6] ss:$0 sm:$0xff] }
  0xab   :  { %v639_v46 = vadd.f32 %v638_v40, %v626_v42  ;;  %v1685_v40 = vld [vmem:[%s2451_s7] sm:$0xff]  ;;  %s1082_s7 = sshll.u32 %s2453_s9, 4  ;;  %s1083_s7 = int_to_ptr.hbm [resolvable:$true] %s1082_s7 }
  0xac   :  { %1065 = vmatpush.bf16.msrb.mxu2 %v1688_v30 }
  0xae   :  { %v614_v36 = vpop.f32.mrf.mxu1 }
  0xaf   :  { %v627_v44 = vpop.f32.mrf.mxu2 }
  0xb0   :  { %1066 = vmatpush.bf16.msrb.mxu2 %v1687_v31 }
  0xb1   :  { %v640_v45 = vpop.f32.mrf.mxu3 }
  0xb4   :  { %1067 = vmatpush.bf16.msrb.mxu2 %v1686_v39 }
  0xb6   :  { %v664_v43 = vpop.f32.mrf.mxu1 }
  0xb8   :  { %1068 = vmatpush.bf16.msrb.mxu2 %v1685_v40 }
  0xbe   :  { %v666_v50 = vpop.f32.mrf.mxu1 }
  0xc0   :  { %v651_v48 = vpop.f32.mrf.mxu0 }
  0xc1   :  { %v652_v49 = vadd.f32 %v651_v48, %v639_v46 }
  0xc3   :  { %v665_v51 = vadd.f32 %v664_v43, %v652_v49 }
  0xc5   :  { %v746_v53 = vmax.f32 %v665_v51, 0.0 }
  0xc7   :  { %v748_v54 = vpack.c.bf16 %v746_v53, %v746_v53  ;;  %v677_v55 = vpop.f32.mrf.mxu2 }
  0xc8   :  { %v653_v56 = vpop.f32.mrf.mxu0  ;;  %v678_v0 = vadd.f32 %v677_v55, %v126_v63 }
  0xc9   :  { %890 = vmatmul.bf16.vlgmr.msrb.gmra.mxu1 %v748_v54 }
  0xcb   :  { %v690_v58 = vpop.f32.mrf.mxu3 }
  0xcc   :  { %v691_v3 = vadd.f32 %v690_v58, %v678_v0 }
  0xcf   :  { %v679_v59 = vpop.f32.mrf.mxu2 }
  0xd3   :  { %v692_v60 = vpop.f32.mrf.mxu3 }
  0xd6   :  { %v703_v62 = vpop.f32.mrf.mxu1 }
  0xd7   :  { %v704_v5 = vadd.f32 %v703_v62, %v691_v3 }
  0xdb   :  { %v742_v1 = vpop.f32.mrf.mxu3 }
  0xde   :  { %v705_v2 = vpop.f32.mrf.mxu1 }
  0xe0   :  { %v716_v4 = vpop.f32.mrf.mxu0 }
  0xe1   :  { %v717_v7 = vadd.f32 %v716_v4, %v704_v5 }
  0xe3   :  { %v744_v6 = vpop.f32.mrf.mxu3 }
  0xe7   :  { %v729_v9 = vpop.f32.mrf.mxu2 }
  0xe8   :  { %v730_v12 = vadd.f32 %v729_v9, %v717_v7  ;;  %v718_v13 = vpop.f32.mrf.mxu0 }
  0xea   :  { %v743_v14 = vadd.f32 %v742_v1, %v730_v12 }
  0xec   :  { %v747_v15 = vmax.f32 %v743_v14, 0.0 }
  0xee   :  { %v749_v16 = vpack.c.bf16 %v747_v15, %v747_v15 }
  0xef   :  { %v731_v17 = vpop.f32.mrf.mxu2 }
  0xf0   :  { %903 = vmatmul.bf16.vlgmr.msrb.gmra.mxu3 %v749_v16 }
 0x146   :  { %v891_v25 = vpop.f32.mrf.mxu1 }
 0x147   :  { %v892_v33 = vadd.f32 %v1694_v32, %v891_v25 }
 0x14e   :  { %v893_v11 = vpop.f32.mrf.mxu1 }
 0x173   :  { %v904_v34 = vpop.f32.mrf.mxu3 }
 0x174   :  { %v905_v35 = vadd.f32 %v904_v34, %v892_v33 }
 0x176   :  { %v908_v36 = vmax.f32 %v905_v35, 0.0 }
 0x178   :  { %v909_v37 = vpack.c.bf16 %v908_v36, %v908_v36 }
 0x17a   :  { %986 = vmatmul.bf16.vlgmr.msrb.gmra.mxu0 %v909_v37 }
 0x17b   :  { %v906_v38 = vpop.f32.mrf.mxu3 }
 0x1f7   :  { %v987_v8 = vpop.f32.mrf.mxu0 }
 0x1f8   :  { %v988_v42 = vadd.f32 %v1695_v41, %v987_v8 }
 0x1fa   :  { %v991_v43 = vmax.f32 %v988_v42, 0.0 }
 0x1fc   :  { %v992_v44 = vpack.c.bf16 %v991_v43, %v991_v43 }
 0x1fe   :  { %1069 = vmatmul.bf16.vlgmr.msrb.gmra.mxu2 %v992_v44 }
 0x1ff   :  { %v989_v45 = vpop.f32.mrf.mxu0 }
 0x281   :  { %v1070_v46 = vpop.f32.mrf.mxu2 }
 0x282   :  { %v1071_v47 = vadd.f32 %v1696_v10, %v1070_v46 }
 0x284   :  { %1074 = vst [vmem:[#allocation2] sm:$0x3] %v1071_v47 }
 0x285   :  { %1085 = dma.vmem_to_hbm [thread:$0]  %s1081_s16, 32, %s1083_s7, [#allocation3]  }
 0x289   :  { %v1072_v48 = vpop.f32.mrf.mxu2 }
 0x28a   :  { %1721 = dma.done.wait [#allocation3], 32  }
 0x28b   :  { %1722 = vsyncadd [#allocation3], 4294967264 }
 0x28c   :  { %1090 = vsyncpa [#allocation3], 1 }

</bundles_post_ra>
